<compile_context>
chip_gen: v7x
topology: tpu7x:2x2x1
jax: 0.10.0
libtpu: 0.0.40
codegen_flags: <defaults>
</compile_context>

<pallas_src>
import jax
import jax.numpy as jnp
from jax.experimental import pallas as pl
from jax.experimental.pallas import tpu as pltpu

INPUT_SIZE = 10
HIDDEN_SIZE = 20
OUTPUT_SIZE = 5
BATCH = 3
SEQ = 15
_BP = 8            # batch padded to the sublane size -> tile-aligned per-step slabs
_GS = 128          # gate lane stride (one vreg lane-width per gate)
_GP = 4 * _GS      # per-direction padded gate width (512 lanes)


def _bilstm_fc_kernel(x_ref,        # (T*BP, I)   time-major, batch padded to BP, f32
                      wih_ref,      # (I, 2*GP)   bf16, [fwd | bwd], gate g at [g*GS, g*GS+H)
                      b_ref,        # (1, 2*GP)   f32, combined b_ih + b_hh, same layout
                      whh_f_ref,    # (H, GP)     bf16
                      whh_b_ref,    # (H, GP)     bf16
                      fcw_f_ref,    # (H, O)      f32
                      fcw_b_ref,    # (H, O)      f32
                      fcb_ref,      # (1, O)      f32
                      out_ref,      # (B, O)      f32
                      xp_ref):      # VMEM scratch (T*BP, 2*GP) f32
    H = whh_f_ref.shape[0]
    GP = whh_f_ref.shape[1]
    GS = GP // 4
    B = out_ref.shape[0]
    BP = _BP
    T = x_ref.shape[0] // BP

    # ---- Hoisted input projection: ONE single-pass bf16 MXU matmul covers every
    # timestep of BOTH directions, biases folded in.  Staged in VMEM scratch so
    # the unrolled loop re-loads aligned (BP, GP) slabs instead of keeping the
    # whole (T*BP, 2*GP) value live in vregs.
    xp_ref[...] = (jnp.dot(x_ref[...].astype(jnp.bfloat16), wih_ref[...],
                           preferred_element_type=jnp.float32)
                   + b_ref[...])

    whh_f = whh_f_ref[...]            # bf16, held across the loop
    whh_b = whh_b_ref[...]

    def sig(v):
        # sigmoid(x) == 0.5 * tanh(0.5 * x) + 0.5  -> single EUP op per gate.
        return 0.5 * jnp.tanh(0.5 * v) + 0.5

    def cell(h, c, pre):
        # pre: (BP, GP), gate g at lanes [g*GS, g*GS+H)  (vreg-aligned slices)
        i_g = sig(pre[:, 0 * GS:0 * GS + H])
        f_g = sig(pre[:, 1 * GS:1 * GS + H])
        g_g = jnp.tanh(pre[:, 2 * GS:2 * GS + H])
        o_g = sig(pre[:, 3 * GS:3 * GS + H])
        c_new = f_g * c + i_g * g_g
        h_new = o_g * jnp.tanh(c_new)
        return h_new, c_new

    z = jnp.zeros((BP, H), jnp.float32)
    h_f, c_f, h_b, c_b = z, z, z, z

    # ---- Fully-unrolled recurrence (T static & small).  One single-pass bf16
    # matmul per direction per step; fwd/bwd chains are independent, so their
    # MXU pushes and EUP latencies interleave.
    for t in range(T):
        xf = xp_ref[t * BP:(t + 1) * BP, :GP]               # fwd reads step t
        xb = xp_ref[(T - 1 - t) * BP:(T - t) * BP, GP:]     # bwd reads T-1-t
        pre_f = xf + jnp.dot(h_f.astype(jnp.bfloat16), whh_f,
                             preferred_element_type=jnp.float32)
        pre_b = xb + jnp.dot(h_b.astype(jnp.bfloat16), whh_b,
                             preferred_element_type=jnp.float32)
        h_f, c_f = cell(h_f, c_f, pre_f)
        h_b, c_b = cell(h_b, c_b, pre_b)

    # ---- Head: Linear(2H, O) on cat([h_fwd_final, h_bwd_final]) ==
    # split-matmul sum (avoids an in-kernel lane concat).  Runs once; kept f32.
    out = (jnp.dot(h_f, fcw_f_ref[...], preferred_element_type=jnp.float32)
           + jnp.dot(h_b, fcw_b_ref[...], preferred_element_type=jnp.float32)
           + fcb_ref[...])                                   # (BP, O)
    out_ref[...] = out[:B, :].astype(out_ref.dtype)


@jax.jit
def bidirectional_rnn_pallas(x, packed):
    """x: (B, T, I) float32 (batch-first, like PyTorch).  Returns (B, O)."""
    wih_p, b_p, whh_f_p, whh_b_p, fcw_f, fcw_b, fcb = packed
    B, T, I = x.shape
    # Layout plumbing (fused inside this jit, adjacent to the custom call):
    # batch-first -> time-major, pad batch to the sublane size, flatten (T, BP).
    x_tm = jnp.transpose(x, (1, 0, 2))                           # (T, B, I)
    x_pad = jnp.zeros((T, _BP, I), x.dtype).at[:, :B, :].set(x_tm)
    x2d = x_pad.reshape(T * _BP, I)

    vmem = pl.BlockSpec(memory_space=pltpu.MemorySpace.VMEM)
    return pl.pallas_call(
        _bilstm_fc_kernel,
        out_shape=jax.ShapeDtypeStruct((B, OUTPUT_SIZE), jnp.float32),
        in_specs=[vmem] * 8,
        out_specs=vmem,
        scratch_shapes=[pltpu.VMEM((T * _BP, 2 * _GP), jnp.float32)],
    )(x2d, wih_p, b_p, whh_f_p, whh_b_p, fcw_f, fcw_b, fcb)


def init_params(key):
    """Deterministic synthetic init mirroring PyTorch's uniform(-1/sqrt(H), ...).

    Raw layout is (in_features, 4H) with gate order i|f|g|o.  NOTE: PyTorch
    nn.LSTM stores weight_ih/weight_hh as (4H, in); importing real checkpoints
    requires a transpose (gate-block order is already i|f|g|o in PyTorch).
    """
    H, I, O = HIDDEN_SIZE, INPUT_SIZE, OUTPUT_SIZE
    ks = jax.random.split(key, 9)
    lstm_bound = 1.0 / jnp.sqrt(H)
    fc_bound = 1.0 / jnp.sqrt(2 * H)

    def u(k, shape, bound):
        return jax.random.uniform(k, shape, jnp.float32, -bound, bound)

    wih_f = u(ks[0], (I, 4 * H), lstm_bound)
    whh_f = u(ks[1], (H, 4 * H), lstm_bound)
    b_f = u(ks[2], (1, 4 * H), lstm_bound)     # combined b_ih + b_hh (fwd)
    wih_b = u(ks[3], (I, 4 * H), lstm_bound)
    whh_b = u(ks[4], (H, 4 * H), lstm_bound)
    b_b = u(ks[5], (1, 4 * H), lstm_bound)     # combined b_ih + b_hh (bwd)
    fcw_f = u(ks[6], (H, O), fc_bound)         # fc weight rows for fwd hidden
    fcw_b = u(ks[7], (H, O), fc_bound)         # fc weight rows for bwd hidden
    fcb = u(ks[8], (1, O), fc_bound)
    return (wih_f, whh_f, b_f, wih_b, whh_b, b_b, fcw_f, fcw_b, fcb)


def pack_params(raw):
    """Repack raw f32 params into the kernel's 128-lane-strided bf16 layout."""
    wih_f, whh_f, b_f, wih_b, whh_b, b_b, fcw_f, fcw_b, fcb = raw
    H = HIDDEN_SIZE

    def pad_gates(w):
        # (rows, 4H) -> (rows, 4*_GS), gate g at lanes [g*_GS, g*_GS + H)
        rows = w.shape[0]
        out = jnp.zeros((rows, 4 * _GS), w.dtype)
        for g in range(4):
            out = out.at[:, g * _GS:g * _GS + H].set(w[:, g * H:(g + 1) * H])
        return out

    wih_p = jnp.concatenate([pad_gates(wih_f), pad_gates(wih_b)],
                            axis=1).astype(jnp.bfloat16)        # (I, 2*GP) bf16
    b_p = jnp.concatenate([pad_gates(b_f), pad_gates(b_b)], axis=1)  # (1, 2*GP) f32
    whh_f_p = pad_gates(whh_f).astype(jnp.bfloat16)              # (H, GP) bf16
    whh_b_p = pad_gates(whh_b).astype(jnp.bfloat16)              # (H, GP) bf16
    return (wih_p, b_p, whh_f_p, whh_b_p, fcw_f, fcw_b, fcb)


def reference(x, raw):
    """Pure-JAX f32 reference of the same forward pass (PyTorch semantics)."""
    wih_f, whh_f, b_f, wih_b, whh_b, b_b, fcw_f, fcw_b, fcb = raw
    B, T, _ = x.shape
    H = HIDDEN_SIZE

    def cell(h, c, x_t, wih, whh, b):
        pre = x_t @ wih + h @ whh + b
        i = jax.nn.sigmoid(pre[:, 0:H])
        f = jax.nn.sigmoid(pre[:, H:2 * H])
        g = jnp.tanh(pre[:, 2 * H:3 * H])
        o = jax.nn.sigmoid(pre[:, 3 * H:4 * H])
        c = f * c + i * g
        h = o * jnp.tanh(c)
        return h, c

    h_f = c_f = jnp.zeros((B, H), jnp.float32)
    for t in range(T):
        h_f, c_f = cell(h_f, c_f, x[:, t], wih_f, whh_f, b_f)
    h_b = c_b = jnp.zeros((B, H), jnp.float32)
    for t in range(T - 1, -1, -1):
        h_b, c_b = cell(h_b, c_b, x[:, t], wih_b, whh_b, b_b)
    return h_f @ fcw_f + h_b @ fcw_b + fcb


if __name__ == "__main__":
    key = jax.random.PRNGKey(0)
    k_x, k_p = jax.random.split(key)
    x = jax.random.normal(k_x, (BATCH, SEQ, INPUT_SIZE), jnp.float32)
    raw = init_params(k_p)
    packed = pack_params(raw)

    out = jax.block_until_ready(bidirectional_rnn_pallas(x, packed))
    ref = jax.block_until_ready(reference(x, raw))
    assert out.shape == (BATCH, OUTPUT_SIZE), out.shape
    # bf16 MXU operands vs f32 reference -> tolerance relaxed (per perf review);
    # 15 recurrent steps keep the drift well under 5e-2.
    err = jnp.max(jnp.abs(out - ref))
    assert jnp.allclose(out, ref, rtol=5e-2, atol=5e-2), (out, ref, err)
    print("KERNEL_OK")
</pallas_src>

<mosaic_0001>
module attributes {stable_mosaic.version = 11 : i64} {
  func.func @_bilstm_fc_kernel(%arg0: memref<120x10xf32, #tpu.memory_space<vmem>>, %arg1: memref<10x1024xbf16, #tpu.memory_space<vmem>>, %arg2: memref<1x1024xf32, #tpu.memory_space<vmem>>, %arg3: memref<20x512xbf16, #tpu.memory_space<vmem>>, %arg4: memref<20x512xbf16, #tpu.memory_space<vmem>>, %arg5: memref<20x5xf32, #tpu.memory_space<vmem>>, %arg6: memref<20x5xf32, #tpu.memory_space<vmem>>, %arg7: memref<1x5xf32, #tpu.memory_space<vmem>>, %arg8: memref<3x5xf32, #tpu.memory_space<vmem>>, %arg9: memref<120x1024xf32, #tpu.memory_space<vmem>>) attributes {dimension_semantics = [], scalar_prefetch = 0 : i64, scratch_operands = 1 : i64, tpu.core_type = #tpu.core_type<tc>} {
    %c0 = arith.constant 0 : index
    %c0_0 = arith.constant 0 : index
    %0 = vector.load %arg0[%c0, %c0_0] : memref<120x10xf32, #tpu.memory_space<vmem>>, vector<120x10xf32>
    %1 = arith.truncf %0 : vector<120x10xf32> to vector<120x10xbf16>
    %c0_1 = arith.constant 0 : index
    %c0_2 = arith.constant 0 : index
    %2 = vector.load %arg1[%c0_1, %c0_2] : memref<10x1024xbf16, #tpu.memory_space<vmem>>, vector<10x1024xbf16>
    %cst = arith.constant dense<0.000000e+00> : vector<120x1024xf32>
    %3 = tpu.matmul %1, %2, %cst {dimension_numbers = #tpu.dot_dimension_numbers<[1], [0], [0], [1], [0, 0, 1, 1], [], []>} : vector<120x10xbf16>, vector<10x1024xbf16>, vector<120x1024xf32> -> vector<120x1024xf32>
    %c0_3 = arith.constant 0 : index
    %c0_4 = arith.constant 0 : index
    %4 = vector.load %arg2[%c0_3, %c0_4] : memref<1x1024xf32, #tpu.memory_space<vmem>>, vector<1x1024xf32>
    %5 = vector.broadcast %4 : vector<1x1024xf32> to vector<120x1024xf32>
    %6 = arith.addf %3, %5 : vector<120x1024xf32>
    %c0_5 = arith.constant 0 : index
    %c0_6 = arith.constant 0 : index
    %7 = vector.load %arg9[%c0_5, %c0_6] : memref<120x1024xf32, #tpu.memory_space<vmem>>, vector<120x1024xf32>
    tpu.vector_store %arg9[%c0_5, %c0_6], %6 {strides = array<i32>} : memref<120x1024xf32, #tpu.memory_space<vmem>>, vector<120x1024xf32>,
    %c0_7 = arith.constant 0 : index
    %c0_8 = arith.constant 0 : index
    %8 = vector.load %arg3[%c0_7, %c0_8] : memref<20x512xbf16, #tpu.memory_space<vmem>>, vector<20x512xbf16>
    %c0_9 = arith.constant 0 : index
    %c0_10 = arith.constant 0 : index
    %9 = vector.load %arg4[%c0_9, %c0_10] : memref<20x512xbf16, #tpu.memory_space<vmem>>, vector<20x512xbf16>
    %cst_11 = arith.constant 0.000000e+00 : f32
    %10 = vector.broadcast %cst_11 : f32 to vector<8x20xf32>
    %c0_12 = arith.constant 0 : index
    %c0_13 = arith.constant 0 : index
    %11 = vector.load %arg9[%c0_12, %c0_13] : memref<120x1024xf32, #tpu.memory_space<vmem>>, vector<8x512xf32>
    %c112 = arith.constant 112 : index
    %c512 = arith.constant 512 : index
    %12 = vector.load %arg9[%c112, %c512] : memref<120x1024xf32, #tpu.memory_space<vmem>>, vector<8x512xf32>
    %13 = arith.truncf %10 : vector<8x20xf32> to vector<8x20xbf16>
    %cst_14 = arith.constant dense<0.000000e+00> : vector<8x512xf32>
    %14 = tpu.matmul %13, %8, %cst_14 {dimension_numbers = #tpu.dot_dimension_numbers<[1], [0], [0], [1], [0, 0, 1, 1], [], []>} : vector<8x20xbf16>, vector<20x512xbf16>, vector<8x512xf32> -> vector<8x512xf32>
    %15 = arith.addf %11, %14 : vector<8x512xf32>
    %16 = arith.truncf %10 : vector<8x20xf32> to vector<8x20xbf16>
    %cst_15 = arith.constant dense<0.000000e+00> : vector<8x512xf32>
    %17 = tpu.matmul %16, %9, %cst_15 {dimension_numbers = #tpu.dot_dimension_numbers<[1], [0], [0], [1], [0, 0, 1, 1], [], []>} : vector<8x20xbf16>, vector<20x512xbf16>, vector<8x512xf32> -> vector<8x512xf32>
    %18 = arith.addf %12, %17 : vector<8x512xf32>
    %19 = vector.extract_strided_slice %15 {offsets = [0, 0], sizes = [8, 20], strides = [1, 1]} : vector<8x512xf32> to vector<8x20xf32>
    %cst_16 = arith.constant 5.000000e-01 : f32
    %20 = vector.broadcast %cst_16 : f32 to vector<8x20xf32>
    %21 = arith.mulf %20, %19 : vector<8x20xf32>
    %22 = math.tanh %21 : vector<8x20xf32>
    %cst_17 = arith.constant 5.000000e-01 : f32
    %23 = vector.broadcast %cst_17 : f32 to vector<8x20xf32>
    %24 = arith.mulf %23, %22 : vector<8x20xf32>
    %cst_18 = arith.constant 5.000000e-01 : f32
    %25 = vector.broadcast %cst_18 : f32 to vector<8x20xf32>
    %26 = arith.addf %24, %25 : vector<8x20xf32>
    %27 = vector.extract_strided_slice %15 {offsets = [0, 128], sizes = [8, 20], strides = [1, 1]} : vector<8x512xf32> to vector<8x20xf32>
    %cst_19 = arith.constant 5.000000e-01 : f32
    %28 = vector.broadcast %cst_19 : f32 to vector<8x20xf32>
    %29 = arith.mulf %28, %27 : vector<8x20xf32>
    %30 = math.tanh %29 : vector<8x20xf32>
    %cst_20 = arith.constant 5.000000e-01 : f32
    %31 = vector.broadcast %cst_20 : f32 to vector<8x20xf32>
    %32 = arith.mulf %31, %30 : vector<8x20xf32>
    %cst_21 = arith.constant 5.000000e-01 : f32
    %33 = vector.broadcast %cst_21 : f32 to vector<8x20xf32>
    %34 = arith.addf %32, %33 : vector<8x20xf32>
    %35 = vector.extract_strided_slice %15 {offsets = [0, 256], sizes = [8, 20], strides = [1, 1]} : vector<8x512xf32> to vector<8x20xf32>
    %36 = math.tanh %35 : vector<8x20xf32>
    %37 = vector.extract_strided_slice %15 {offsets = [0, 384], sizes = [8, 20], strides = [1, 1]} : vector<8x512xf32> to vector<8x20xf32>
    %cst_22 = arith.constant 5.000000e-01 : f32
    %38 = vector.broadcast %cst_22 : f32 to vector<8x20xf32>
    %39 = arith.mulf %38, %37 : vector<8x20xf32>
    %40 = math.tanh %39 : vector<8x20xf32>
    %cst_23 = arith.constant 5.000000e-01 : f32
    %41 = vector.broadcast %cst_23 : f32 to vector<8x20xf32>
    %42 = arith.mulf %41, %40 : vector<8x20xf32>
    %cst_24 = arith.constant 5.000000e-01 : f32
    %43 = vector.broadcast %cst_24 : f32 to vector<8x20xf32>
    %44 = arith.addf %42, %43 : vector<8x20xf32>
    %45 = arith.mulf %34, %10 : vector<8x20xf32>
    %46 = arith.mulf %26, %36 : vector<8x20xf32>
    %47 = arith.addf %45, %46 : vector<8x20xf32>
    %48 = math.tanh %47 : vector<8x20xf32>
    %49 = arith.mulf %44, %48 : vector<8x20xf32>
    %50 = vector.extract_strided_slice %18 {offsets = [0, 0], sizes = [8, 20], strides = [1, 1]} : vector<8x512xf32> to vector<8x20xf32>
    %cst_25 = arith.constant 5.000000e-01 : f32
    %51 = vector.broadcast %cst_25 : f32 to vector<8x20xf32>
    %52 = arith.mulf %51, %50 : vector<8x20xf32>
    %53 = math.tanh %52 : vector<8x20xf32>
    %cst_26 = arith.constant 5.000000e-01 : f32
    %54 = vector.broadcast %cst_26 : f32 to vector<8x20xf32>
    %55 = arith.mulf %54, %53 : vector<8x20xf32>
    %cst_27 = arith.constant 5.000000e-01 : f32
    %56 = vector.broadcast %cst_27 : f32 to vector<8x20xf32>
    %57 = arith.addf %55, %56 : vector<8x20xf32>
    %58 = vector.extract_strided_slice %18 {offsets = [0, 128], sizes = [8, 20], strides = [1, 1]} : vector<8x512xf32> to vector<8x20xf32>
    %cst_28 = arith.constant 5.000000e-01 : f32
    %59 = vector.broadcast %cst_28 : f32 to vector<8x20xf32>
    %60 = arith.mulf %59, %58 : vector<8x20xf32>
    %61 = math.tanh %60 : vector<8x20xf32>
    %cst_29 = arith.constant 5.000000e-01 : f32
    %62 = vector.broadcast %cst_29 : f32 to vector<8x20xf32>
    %63 = arith.mulf %62, %61 : vector<8x20xf32>
    %cst_30 = arith.constant 5.000000e-01 : f32
    %64 = vector.broadcast %cst_30 : f32 to vector<8x20xf32>
    %65 = arith.addf %63, %64 : vector<8x20xf32>
    %66 = vector.extract_strided_slice %18 {offsets = [0, 256], sizes = [8, 20], strides = [1, 1]} : vector<8x512xf32> to vector<8x20xf32>
    %67 = math.tanh %66 : vector<8x20xf32>
    %68 = vector.extract_strided_slice %18 {offsets = [0, 384], sizes = [8, 20], strides = [1, 1]} : vector<8x512xf32> to vector<8x20xf32>
    %cst_31 = arith.constant 5.000000e-01 : f32
    %69 = vector.broadcast %cst_31 : f32 to vector<8x20xf32>
    %70 = arith.mulf %69, %68 : vector<8x20xf32>
    %71 = math.tanh %70 : vector<8x20xf32>
    %cst_32 = arith.constant 5.000000e-01 : f32
    %72 = vector.broadcast %cst_32 : f32 to vector<8x20xf32>
    %73 = arith.mulf %72, %71 : vector<8x20xf32>
    %cst_33 = arith.constant 5.000000e-01 : f32
    %74 = vector.broadcast %cst_33 : f32 to vector<8x20xf32>
    %75 = arith.addf %73, %74 : vector<8x20xf32>
    %76 = arith.mulf %65, %10 : vector<8x20xf32>
    %77 = arith.mulf %57, %67 : vector<8x20xf32>
    %78 = arith.addf %76, %77 : vector<8x20xf32>
    %79 = math.tanh %78 : vector<8x20xf32>
    %80 = arith.mulf %75, %79 : vector<8x20xf32>
    %c8 = arith.constant 8 : index
    %c0_34 = arith.constant 0 : index
    %81 = vector.load %arg9[%c8, %c0_34] : memref<120x1024xf32, #tpu.memory_space<vmem>>, vector<8x512xf32>
    %c104 = arith.constant 104 : index
    %c512_35 = arith.constant 512 : index
    %82 = vector.load %arg9[%c104, %c512_35] : memref<120x1024xf32, #tpu.memory_space<vmem>>, vector<8x512xf32>
    %83 = arith.truncf %49 : vector<8x20xf32> to vector<8x20xbf16>
    %cst_36 = arith.constant dense<0.000000e+00> : vector<8x512xf32>
    %84 = tpu.matmul %83, %8, %cst_36 {dimension_numbers = #tpu.dot_dimension_numbers<[1], [0], [0], [1], [0, 0, 1, 1], [], []>} : vector<8x20xbf16>, vector<20x512xbf16>, vector<8x512xf32> -> vector<8x512xf32>
    %85 = arith.addf %81, %84 : vector<8x512xf32>
    %86 = arith.truncf %80 : vector<8x20xf32> to vector<8x20xbf16>
    %cst_37 = arith.constant dense<0.000000e+00> : vector<8x512xf32>
    %87 = tpu.matmul %86, %9, %cst_37 {dimension_numbers = #tpu.dot_dimension_numbers<[1], [0], [0], [1], [0, 0, 1, 1], [], []>} : vector<8x20xbf16>, vector<20x512xbf16>, vector<8x512xf32> -> vector<8x512xf32>
    %88 = arith.addf %82, %87 : vector<8x512xf32>
    %89 = vector.extract_strided_slice %85 {offsets = [0, 0], sizes = [8, 20], strides = [1, 1]} : vector<8x512xf32> to vector<8x20xf32>
    %cst_38 = arith.constant 5.000000e-01 : f32
    %90 = vector.broadcast %cst_38 : f32 to vector<8x20xf32>
    %91 = arith.mulf %90, %89 : vector<8x20xf32>
    %92 = math.tanh %91 : vector<8x20xf32>
    %cst_39 = arith.constant 5.000000e-01 : f32
    %93 = vector.broadcast %cst_39 : f32 to vector<8x20xf32>
    %94 = arith.mulf %93, %92 : vector<8x20xf32>
    %cst_40 = arith.constant 5.000000e-01 : f32
    %95 = vector.broadcast %cst_40 : f32 to vector<8x20xf32>
    %96 = arith.addf %94, %95 : vector<8x20xf32>
    %97 = vector.extract_strided_slice %85 {offsets = [0, 128], sizes = [8, 20], strides = [1, 1]} : vector<8x512xf32> to vector<8x20xf32>
    %cst_41 = arith.constant 5.000000e-01 : f32
    %98 = vector.broadcast %cst_41 : f32 to vector<8x20xf32>
    %99 = arith.mulf %98, %97 : vector<8x20xf32>
    %100 = math.tanh %99 : vector<8x20xf32>
    %cst_42 = arith.constant 5.000000e-01 : f32
    %101 = vector.broadcast %cst_42 : f32 to vector<8x20xf32>
    %102 = arith.mulf %101, %100 : vector<8x20xf32>
    %cst_43 = arith.constant 5.000000e-01 : f32
    %103 = vector.broadcast %cst_43 : f32 to vector<8x20xf32>
    %104 = arith.addf %102, %103 : vector<8x20xf32>
    %105 = vector.extract_strided_slice %85 {offsets = [0, 256], sizes = [8, 20], strides = [1, 1]} : vector<8x512xf32> to vector<8x20xf32>
    %106 = math.tanh %105 : vector<8x20xf32>
    %107 = vector.extract_strided_slice %85 {offsets = [0, 384], sizes = [8, 20], strides = [1, 1]} : vector<8x512xf32> to vector<8x20xf32>
    %cst_44 = arith.constant 5.000000e-01 : f32
    %108 = vector.broadcast %cst_44 : f32 to vector<8x20xf32>
    %109 = arith.mulf %108, %107 : vector<8x20xf32>
    %110 = math.tanh %109 : vector<8x20xf32>
    %cst_45 = arith.constant 5.000000e-01 : f32
    %111 = vector.broadcast %cst_45 : f32 to vector<8x20xf32>
    %112 = arith.mulf %111, %110 : vector<8x20xf32>
    %cst_46 = arith.constant 5.000000e-01 : f32
    %113 = vector.broadcast %cst_46 : f32 to vector<8x20xf32>
    %114 = arith.addf %112, %113 : vector<8x20xf32>
    %115 = arith.mulf %104, %47 : vector<8x20xf32>
    %116 = arith.mulf %96, %106 : vector<8x20xf32>
    %117 = arith.addf %115, %116 : vector<8x20xf32>
    %118 = math.tanh %117 : vector<8x20xf32>
    %119 = arith.mulf %114, %118 : vector<8x20xf32>
    %120 = vector.extract_strided_slice %88 {offsets = [0, 0], sizes = [8, 20], strides = [1, 1]} : vector<8x512xf32> to vector<8x20xf32>
    %cst_47 = arith.constant 5.000000e-01 : f32
    %121 = vector.broadcast %cst_47 : f32 to vector<8x20xf32>
    %122 = arith.mulf %121, %120 : vector<8x20xf32>
    %123 = math.tanh %122 : vector<8x20xf32>
    %cst_48 = arith.constant 5.000000e-01 : f32
    %124 = vector.broadcast %cst_48 : f32 to vector<8x20xf32>
    %125 = arith.mulf %124, %123 : vector<8x20xf32>
    %cst_49 = arith.constant 5.000000e-01 : f32
    %126 = vector.broadcast %cst_49 : f32 to vector<8x20xf32>
    %127 = arith.addf %125, %126 : vector<8x20xf32>
    %128 = vector.extract_strided_slice %88 {offsets = [0, 128], sizes = [8, 20], strides = [1, 1]} : vector<8x512xf32> to vector<8x20xf32>
    %cst_50 = arith.constant 5.000000e-01 : f32
    %129 = vector.broadcast %cst_50 : f32 to vector<8x20xf32>
    %130 = arith.mulf %129, %128 : vector<8x20xf32>
    %131 = math.tanh %130 : vector<8x20xf32>
    %cst_51 = arith.constant 5.000000e-01 : f32
    %132 = vector.broadcast %cst_51 : f32 to vector<8x20xf32>
    %133 = arith.mulf %132, %131 : vector<8x20xf32>
    %cst_52 = arith.constant 5.000000e-01 : f32
    %134 = vector.broadcast %cst_52 : f32 to vector<8x20xf32>
    %135 = arith.addf %133, %134 : vector<8x20xf32>
    %136 = vector.extract_strided_slice %88 {offsets = [0, 256], sizes = [8, 20], strides = [1, 1]} : vector<8x512xf32> to vector<8x20xf32>
    %137 = math.tanh %136 : vector<8x20xf32>
    %138 = vector.extract_strided_slice %88 {offsets = [0, 384], sizes = [8, 20], strides = [1, 1]} : vector<8x512xf32> to vector<8x20xf32>
    %cst_53 = arith.constant 5.000000e-01 : f32
    %139 = vector.broadcast %cst_53 : f32 to vector<8x20xf32>
    %140 = arith.mulf %139, %138 : vector<8x20xf32>
    %141 = math.tanh %140 : vector<8x20xf32>
    %cst_54 = arith.constant 5.000000e-01 : f32
    %142 = vector.broadcast %cst_54 : f32 to vector<8x20xf32>
    %143 = arith.mulf %142, %141 : vector<8x20xf32>
    %cst_55 = arith.constant 5.000000e-01 : f32
    %144 = vector.broadcast %cst_55 : f32 to vector<8x20xf32>
    %145 = arith.addf %143, %144 : vector<8x20xf32>
    %146 = arith.mulf %135, %78 : vector<8x20xf32>
    %147 = arith.mulf %127, %137 : vector<8x20xf32>
    %148 = arith.addf %146, %147 : vector<8x20xf32>
    %149 = math.tanh %148 : vector<8x20xf32>
    %150 = arith.mulf %145, %149 : vector<8x20xf32>
    %c16 = arith.constant 16 : index
    %c0_56 = arith.constant 0 : index
    %151 = vector.load %arg9[%c16, %c0_56] : memref<120x1024xf32, #tpu.memory_space<vmem>>, vector<8x512xf32>
    %c96 = arith.constant 96 : index
    %c512_57 = arith.constant 512 : index
    %152 = vector.load %arg9[%c96, %c512_57] : memref<120x1024xf32, #tpu.memory_space<vmem>>, vector<8x512xf32>
    %153 = arith.truncf %119 : vector<8x20xf32> to vector<8x20xbf16>
    %cst_58 = arith.constant dense<0.000000e+00> : vector<8x512xf32>
    %154 = tpu.matmul %153, %8, %cst_58 {dimension_numbers = #tpu.dot_dimension_numbers<[1], [0], [0], [1], [0, 0, 1, 1], [], []>} : vector<8x20xbf16>, vector<20x512xbf16>, vector<8x512xf32> -> vector<8x512xf32>
    %155 = arith.addf %151, %154 : vector<8x512xf32>
    %156 = arith.truncf %150 : vector<8x20xf32> to vector<8x20xbf16>
    %cst_59 = arith.constant dense<0.000000e+00> : vector<8x512xf32>
    %157 = tpu.matmul %156, %9, %cst_59 {dimension_numbers = #tpu.dot_dimension_numbers<[1], [0], [0], [1], [0, 0, 1, 1], [], []>} : vector<8x20xbf16>, vector<20x512xbf16>, vector<8x512xf32> -> vector<8x512xf32>
    %158 = arith.addf %152, %157 : vector<8x512xf32>
    %159 = vector.extract_strided_slice %155 {offsets = [0, 0], sizes = [8, 20], strides = [1, 1]} : vector<8x512xf32> to vector<8x20xf32>
    %cst_60 = arith.constant 5.000000e-01 : f32
    %160 = vector.broadcast %cst_60 : f32 to vector<8x20xf32>
    %161 = arith.mulf %160, %159 : vector<8x20xf32>
    %162 = math.tanh %161 : vector<8x20xf32>
    %cst_61 = arith.constant 5.000000e-01 : f32
    %163 = vector.broadcast %cst_61 : f32 to vector<8x20xf32>
    %164 = arith.mulf %163, %162 : vector<8x20xf32>
    %cst_62 = arith.constant 5.000000e-01 : f32
    %165 = vector.broadcast %cst_62 : f32 to vector<8x20xf32>
    %166 = arith.addf %164, %165 : vector<8x20xf32>
    %167 = vector.extract_strided_slice %155 {offsets = [0, 128], sizes = [8, 20], strides = [1, 1]} : vector<8x512xf32> to vector<8x20xf32>
    %cst_63 = arith.constant 5.000000e-01 : f32
    %168 = vector.broadcast %cst_63 : f32 to vector<8x20xf32>
    %169 = arith.mulf %168, %167 : vector<8x20xf32>
    %170 = math.tanh %169 : vector<8x20xf32>
    %cst_64 = arith.constant 5.000000e-01 : f32
    %171 = vector.broadcast %cst_64 : f32 to vector<8x20xf32>
    %172 = arith.mulf %171, %170 : vector<8x20xf32>
    %cst_65 = arith.constant 5.000000e-01 : f32
    %173 = vector.broadcast %cst_65 : f32 to vector<8x20xf32>
    %174 = arith.addf %172, %173 : vector<8x20xf32>
    %175 = vector.extract_strided_slice %155 {offsets = [0, 256], sizes = [8, 20], strides = [1, 1]} : vector<8x512xf32> to vector<8x20xf32>
    %176 = math.tanh %175 : vector<8x20xf32>
    %177 = vector.extract_strided_slice %155 {offsets = [0, 384], sizes = [8, 20], strides = [1, 1]} : vector<8x512xf32> to vector<8x20xf32>
    %cst_66 = arith.constant 5.000000e-01 : f32
    %178 = vector.broadcast %cst_66 : f32 to vector<8x20xf32>
    %179 = arith.mulf %178, %177 : vector<8x20xf32>
    %180 = math.tanh %179 : vector<8x20xf32>
    %cst_67 = arith.constant 5.000000e-01 : f32
    %181 = vector.broadcast %cst_67 : f32 to vector<8x20xf32>
    %182 = arith.mulf %181, %180 : vector<8x20xf32>
    %cst_68 = arith.constant 5.000000e-01 : f32
    %183 = vector.broadcast %cst_68 : f32 to vector<8x20xf32>
    %184 = arith.addf %182, %183 : vector<8x20xf32>
    %185 = arith.mulf %174, %117 : vector<8x20xf32>
    %186 = arith.mulf %166, %176 : vector<8x20xf32>
    %187 = arith.addf %185, %186 : vector<8x20xf32>
    %188 = math.tanh %187 : vector<8x20xf32>
    %189 = arith.mulf %184, %188 : vector<8x20xf32>
    %190 = vector.extract_strided_slice %158 {offsets = [0, 0], sizes = [8, 20], strides = [1, 1]} : vector<8x512xf32> to vector<8x20xf32>
    %cst_69 = arith.constant 5.000000e-01 : f32
    %191 = vector.broadcast %cst_69 : f32 to vector<8x20xf32>
    %192 = arith.mulf %191, %190 : vector<8x20xf32>
    %193 = math.tanh %192 : vector<8x20xf32>
    %cst_70 = arith.constant 5.000000e-01 : f32
    %194 = vector.broadcast %cst_70 : f32 to vector<8x20xf32>
    %195 = arith.mulf %194, %193 : vector<8x20xf32>
    %cst_71 = arith.constant 5.000000e-01 : f32
    %196 = vector.broadcast %cst_71 : f32 to vector<8x20xf32>
    %197 = arith.addf %195, %196 : vector<8x20xf32>
    %198 = vector.extract_strided_slice %158 {offsets = [0, 128], sizes = [8, 20], strides = [1, 1]} : vector<8x512xf32> to vector<8x20xf32>
    %cst_72 = arith.constant 5.000000e-01 : f32
    %199 = vector.broadcast %cst_72 : f32 to vector<8x20xf32>
    %200 = arith.mulf %199, %198 : vector<8x20xf32>
    %201 = math.tanh %200 : vector<8x20xf32>
    %cst_73 = arith.constant 5.000000e-01 : f32
    %202 = vector.broadcast %cst_73 : f32 to vector<8x20xf32>
    %203 = arith.mulf %202, %201 : vector<8x20xf32>
    %cst_74 = arith.constant 5.000000e-01 : f32
    %204 = vector.broadcast %cst_74 : f32 to vector<8x20xf32>
    %205 = arith.addf %203, %204 : vector<8x20xf32>
    %206 = vector.extract_strided_slice %158 {offsets = [0, 256], sizes = [8, 20], strides = [1, 1]} : vector<8x512xf32> to vector<8x20xf32>
    %207 = math.tanh %206 : vector<8x20xf32>
    %208 = vector.extract_strided_slice %158 {offsets = [0, 384], sizes = [8, 20], strides = [1, 1]} : vector<8x512xf32> to vector<8x20xf32>
    %cst_75 = arith.constant 5.000000e-01 : f32
    %209 = vector.broadcast %cst_75 : f32 to vector<8x20xf32>
    %210 = arith.mulf %209, %208 : vector<8x20xf32>
    %211 = math.tanh %210 : vector<8x20xf32>
    %cst_76 = arith.constant 5.000000e-01 : f32
    %212 = vector.broadcast %cst_76 : f32 to vector<8x20xf32>
    %213 = arith.mulf %212, %211 : vector<8x20xf32>
    %cst_77 = arith.constant 5.000000e-01 : f32
    %214 = vector.broadcast %cst_77 : f32 to vector<8x20xf32>
    %215 = arith.addf %213, %214 : vector<8x20xf32>
    %216 = arith.mulf %205, %148 : vector<8x20xf32>
    %217 = arith.mulf %197, %207 : vector<8x20xf32>
    %218 = arith.addf %216, %217 : vector<8x20xf32>
    %219 = math.tanh %218 : vector<8x20xf32>
    %220 = arith.mulf %215, %219 : vector<8x20xf32>
    %c24 = arith.constant 24 : index
    %c0_78 = arith.constant 0 : index
    %221 = vector.load %arg9[%c24, %c0_78] : memref<120x1024xf32, #tpu.memory_space<vmem>>, vector<8x512xf32>
    %c88 = arith.constant 88 : index
    %c512_79 = arith.constant 512 : index
    %222 = vector.load %arg9[%c88, %c512_79] : memref<120x1024xf32, #tpu.memory_space<vmem>>, vector<8x512xf32>
    %223 = arith.truncf %189 : vector<8x20xf32> to vector<8x20xbf16>
    %cst_80 = arith.constant dense<0.000000e+00> : vector<8x512xf32>
    %224 = tpu.matmul %223, %8, %cst_80 {dimension_numbers = #tpu.dot_dimension_numbers<[1], [0], [0], [1], [0, 0, 1, 1], [], []>} : vector<8x20xbf16>, vector<20x512xbf16>, vector<8x512xf32> -> vector<8x512xf32>
    %225 = arith.addf %221, %224 : vector<8x512xf32>
    %226 = arith.truncf %220 : vector<8x20xf32> to vector<8x20xbf16>
    %cst_81 = arith.constant dense<0.000000e+00> : vector<8x512xf32>
    %227 = tpu.matmul %226, %9, %cst_81 {dimension_numbers = #tpu.dot_dimension_numbers<[1], [0], [0], [1], [0, 0, 1, 1], [], []>} : vector<8x20xbf16>, vector<20x512xbf16>, vector<8x512xf32> -> vector<8x512xf32>
    %228 = arith.addf %222, %227 : vector<8x512xf32>
    %229 = vector.extract_strided_slice %225 {offsets = [0, 0], sizes = [8, 20], strides = [1, 1]} : vector<8x512xf32> to vector<8x20xf32>
    %cst_82 = arith.constant 5.000000e-01 : f32
    %230 = vector.broadcast %cst_82 : f32 to vector<8x20xf32>
    %231 = arith.mulf %230, %229 : vector<8x20xf32>
    %232 = math.tanh %231 : vector<8x20xf32>
    %cst_83 = arith.constant 5.000000e-01 : f32
    %233 = vector.broadcast %cst_83 : f32 to vector<8x20xf32>
    %234 = arith.mulf %233, %232 : vector<8x20xf32>
    %cst_84 = arith.constant 5.000000e-01 : f32
    %235 = vector.broadcast %cst_84 : f32 to vector<8x20xf32>
    %236 = arith.addf %234, %235 : vector<8x20xf32>
    %237 = vector.extract_strided_slice %225 {offsets = [0, 128], sizes = [8, 20], strides = [1, 1]} : vector<8x512xf32> to vector<8x20xf32>
    %cst_85 = arith.constant 5.000000e-01 : f32
    %238 = vector.broadcast %cst_85 : f32 to vector<8x20xf32>
    %239 = arith.mulf %238, %237 : vector<8x20xf32>
    %240 = math.tanh %239 : vector<8x20xf32>
    %cst_86 = arith.constant 5.000000e-01 : f32
    %241 = vector.broadcast %cst_86 : f32 to vector<8x20xf32>
    %242 = arith.mulf %241, %240 : vector<8x20xf32>
    %cst_87 = arith.constant 5.000000e-01 : f32
    %243 = vector.broadcast %cst_87 : f32 to vector<8x20xf32>
    %244 = arith.addf %242, %243 : vector<8x20xf32>
    %245 = vector.extract_strided_slice %225 {offsets = [0, 256], sizes = [8, 20], strides = [1, 1]} : vector<8x512xf32> to vector<8x20xf32>
    %246 = math.tanh %245 : vector<8x20xf32>
    %247 = vector.extract_strided_slice %225 {offsets = [0, 384], sizes = [8, 20], strides = [1, 1]} : vector<8x512xf32> to vector<8x20xf32>
    %cst_88 = arith.constant 5.000000e-01 : f32
    %248 = vector.broadcast %cst_88 : f32 to vector<8x20xf32>
    %249 = arith.mulf %248, %247 : vector<8x20xf32>
    %250 = math.tanh %249 : vector<8x20xf32>
    %cst_89 = arith.constant 5.000000e-01 : f32
    %251 = vector.broadcast %cst_89 : f32 to vector<8x20xf32>
    %252 = arith.mulf %251, %250 : vector<8x20xf32>
    %cst_90 = arith.constant 5.000000e-01 : f32
    %253 = vector.broadcast %cst_90 : f32 to vector<8x20xf32>
    %254 = arith.addf %252, %253 : vector<8x20xf32>
    %255 = arith.mulf %244, %187 : vector<8x20xf32>
    %256 = arith.mulf %236, %246 : vector<8x20xf32>
    %257 = arith.addf %255, %256 : vector<8x20xf32>
    %258 = math.tanh %257 : vector<8x20xf32>
    %259 = arith.mulf %254, %258 : vector<8x20xf32>
    %260 = vector.extract_strided_slice %228 {offsets = [0, 0], sizes = [8, 20], strides = [1, 1]} : vector<8x512xf32> to vector<8x20xf32>
    %cst_91 = arith.constant 5.000000e-01 : f32
    %261 = vector.broadcast %cst_91 : f32 to vector<8x20xf32>
    %262 = arith.mulf %261, %260 : vector<8x20xf32>
    %263 = math.tanh %262 : vector<8x20xf32>
    %cst_92 = arith.constant 5.000000e-01 : f32
    %264 = vector.broadcast %cst_92 : f32 to vector<8x20xf32>
    %265 = arith.mulf %264, %263 : vector<8x20xf32>
    %cst_93 = arith.constant 5.000000e-01 : f32
    %266 = vector.broadcast %cst_93 : f32 to vector<8x20xf32>
    %267 = arith.addf %265, %266 : vector<8x20xf32>
    %268 = vector.extract_strided_slice %228 {offsets = [0, 128], sizes = [8, 20], strides = [1, 1]} : vector<8x512xf32> to vector<8x20xf32>
    %cst_94 = arith.constant 5.000000e-01 : f32
    %269 = vector.broadcast %cst_94 : f32 to vector<8x20xf32>
    %270 = arith.mulf %269, %268 : vector<8x20xf32>
    %271 = math.tanh %270 : vector<8x20xf32>
    %cst_95 = arith.constant 5.000000e-01 : f32
    %272 = vector.broadcast %cst_95 : f32 to vector<8x20xf32>
    %273 = arith.mulf %272, %271 : vector<8x20xf32>
    %cst_96 = arith.constant 5.000000e-01 : f32
    %274 = vector.broadcast %cst_96 : f32 to vector<8x20xf32>
    %275 = arith.addf %273, %274 : vector<8x20xf32>
    %276 = vector.extract_strided_slice %228 {offsets = [0, 256], sizes = [8, 20], strides = [1, 1]} : vector<8x512xf32> to vector<8x20xf32>
    %277 = math.tanh %276 : vector<8x20xf32>
    %278 = vector.extract_strided_slice %228 {offsets = [0, 384], sizes = [8, 20], strides = [1, 1]} : vector<8x512xf32> to vector<8x20xf32>
    %cst_97 = arith.constant 5.000000e-01 : f32
    %279 = vector.broadcast %cst_97 : f32 to vector<8x20xf32>
    %280 = arith.mulf %279, %278 : vector<8x20xf32>
    %281 = math.tanh %280 : vector<8x20xf32>
    %cst_98 = arith.constant 5.000000e-01 : f32
    %282 = vector.broadcast %cst_98 : f32 to vector<8x20xf32>
    %283 = arith.mulf %282, %281 : vector<8x20xf32>
    %cst_99 = arith.constant 5.000000e-01 : f32
    %284 = vector.broadcast %cst_99 : f32 to vector<8x20xf32>
    %285 = arith.addf %283, %284 : vector<8x20xf32>
    %286 = arith.mulf %275, %218 : vector<8x20xf32>
    %287 = arith.mulf %267, %277 : vector<8x20xf32>
    %288 = arith.addf %286, %287 : vector<8x20xf32>
    %289 = math.tanh %288 : vector<8x20xf32>
    %290 = arith.mulf %285, %289 : vector<8x20xf32>
    %c32 = arith.constant 32 : index
    %c0_100 = arith.constant 0 : index
    %291 = vector.load %arg9[%c32, %c0_100] : memref<120x1024xf32, #tpu.memory_space<vmem>>, vector<8x512xf32>
    %c80 = arith.constant 80 : index
    %c512_101 = arith.constant 512 : index
    %292 = vector.load %arg9[%c80, %c512_101] : memref<120x1024xf32, #tpu.memory_space<vmem>>, vector<8x512xf32>
    %293 = arith.truncf %259 : vector<8x20xf32> to vector<8x20xbf16>
    %cst_102 = arith.constant dense<0.000000e+00> : vector<8x512xf32>
    %294 = tpu.matmul %293, %8, %cst_102 {dimension_numbers = #tpu.dot_dimension_numbers<[1], [0], [0], [1], [0, 0, 1, 1], [], []>} : vector<8x20xbf16>, vector<20x512xbf16>, vector<8x512xf32> -> vector<8x512xf32>
    %295 = arith.addf %291, %294 : vector<8x512xf32>
    %296 = arith.truncf %290 : vector<8x20xf32> to vector<8x20xbf16>
    %cst_103 = arith.constant dense<0.000000e+00> : vector<8x512xf32>
    %297 = tpu.matmul %296, %9, %cst_103 {dimension_numbers = #tpu.dot_dimension_numbers<[1], [0], [0], [1], [0, 0, 1, 1], [], []>} : vector<8x20xbf16>, vector<20x512xbf16>, vector<8x512xf32> -> vector<8x512xf32>
    %298 = arith.addf %292, %297 : vector<8x512xf32>
    %299 = vector.extract_strided_slice %295 {offsets = [0, 0], sizes = [8, 20], strides = [1, 1]} : vector<8x512xf32> to vector<8x20xf32>
    %cst_104 = arith.constant 5.000000e-01 : f32
    %300 = vector.broadcast %cst_104 : f32 to vector<8x20xf32>
    %301 = arith.mulf %300, %299 : vector<8x20xf32>
    %302 = math.tanh %301 : vector<8x20xf32>
    %cst_105 = arith.constant 5.000000e-01 : f32
    %303 = vector.broadcast %cst_105 : f32 to vector<8x20xf32>
    %304 = arith.mulf %303, %302 : vector<8x20xf32>
    %cst_106 = arith.constant 5.000000e-01 : f32
    %305 = vector.broadcast %cst_106 : f32 to vector<8x20xf32>
    %306 = arith.addf %304, %305 : vector<8x20xf32>
    %307 = vector.extract_strided_slice %295 {offsets = [0, 128], sizes = [8, 20], strides = [1, 1]} : vector<8x512xf32> to vector<8x20xf32>
    %cst_107 = arith.constant 5.000000e-01 : f32
    %308 = vector.broadcast %cst_107 : f32 to vector<8x20xf32>
    %309 = arith.mulf %308, %307 : vector<8x20xf32>
    %310 = math.tanh %309 : vector<8x20xf32>
    %cst_108 = arith.constant 5.000000e-01 : f32
    %311 = vector.broadcast %cst_108 : f32 to vector<8x20xf32>
    %312 = arith.mulf %311, %310 : vector<8x20xf32>
    %cst_109 = arith.constant 5.000000e-01 : f32
    %313 = vector.broadcast %cst_109 : f32 to vector<8x20xf32>
    %314 = arith.addf %312, %313 : vector<8x20xf32>
    %315 = vector.extract_strided_slice %295 {offsets = [0, 256], sizes = [8, 20], strides = [1, 1]} : vector<8x512xf32> to vector<8x20xf32>
    %316 = math.tanh %315 : vector<8x20xf32>
    %317 = vector.extract_strided_slice %295 {offsets = [0, 384], sizes = [8, 20], strides = [1, 1]} : vector<8x512xf32> to vector<8x20xf32>
    %cst_110 = arith.constant 5.000000e-01 : f32
    %318 = vector.broadcast %cst_110 : f32 to vector<8x20xf32>
    %319 = arith.mulf %318, %317 : vector<8x20xf32>
    %320 = math.tanh %319 : vector<8x20xf32>
    %cst_111 = arith.constant 5.000000e-01 : f32
    %321 = vector.broadcast %cst_111 : f32 to vector<8x20xf32>
    %322 = arith.mulf %321, %320 : vector<8x20xf32>
    %cst_112 = arith.constant 5.000000e-01 : f32
    %323 = vector.broadcast %cst_112 : f32 to vector<8x20xf32>
    %324 = arith.addf %322, %323 : vector<8x20xf32>
    %325 = arith.mulf %314, %257 : vector<8x20xf32>
    %326 = arith.mulf %306, %316 : vector<8x20xf32>
    %327 = arith.addf %325, %326 : vector<8x20xf32>
    %328 = math.tanh %327 : vector<8x20xf32>
    %329 = arith.mulf %324, %328 : vector<8x20xf32>
    %330 = vector.extract_strided_slice %298 {offsets = [0, 0], sizes = [8, 20], strides = [1, 1]} : vector<8x512xf32> to vector<8x20xf32>
    %cst_113 = arith.constant 5.000000e-01 : f32
    %331 = vector.broadcast %cst_113 : f32 to vector<8x20xf32>
    %332 = arith.mulf %331, %330 : vector<8x20xf32>
    %333 = math.tanh %332 : vector<8x20xf32>
    %cst_114 = arith.constant 5.000000e-01 : f32
    %334 = vector.broadcast %cst_114 : f32 to vector<8x20xf32>
    %335 = arith.mulf %334, %333 : vector<8x20xf32>
    %cst_115 = arith.constant 5.000000e-01 : f32
    %336 = vector.broadcast %cst_115 : f32 to vector<8x20xf32>
    %337 = arith.addf %335, %336 : vector<8x20xf32>
    %338 = vector.extract_strided_slice %298 {offsets = [0, 128], sizes = [8, 20], strides = [1, 1]} : vector<8x512xf32> to vector<8x20xf32>
    %cst_116 = arith.constant 5.000000e-01 : f32
    %339 = vector.broadcast %cst_116 : f32 to vector<8x20xf32>
    %340 = arith.mulf %339, %338 : vector<8x20xf32>
    %341 = math.tanh %340 : vector<8x20xf32>
    %cst_117 = arith.constant 5.000000e-01 : f32
    %342 = vector.broadcast %cst_117 : f32 to vector<8x20xf32>
    %343 = arith.mulf %342, %341 : vector<8x20xf32>
    %cst_118 = arith.constant 5.000000e-01 : f32
    %344 = vector.broadcast %cst_118 : f32 to vector<8x20xf32>
    %345 = arith.addf %343, %344 : vector<8x20xf32>
    %346 = vector.extract_strided_slice %298 {offsets = [0, 256], sizes = [8, 20], strides = [1, 1]} : vector<8x512xf32> to vector<8x20xf32>
    %347 = math.tanh %346 : vector<8x20xf32>
    %348 = vector.extract_strided_slice %298 {offsets = [0, 384], sizes = [8, 20], strides = [1, 1]} : vector<8x512xf32> to vector<8x20xf32>
    %cst_119 = arith.constant 5.000000e-01 : f32
    %349 = vector.broadcast %cst_119 : f32 to vector<8x20xf32>
    %350 = arith.mulf %349, %348 : vector<8x20xf32>
    %351 = math.tanh %350 : vector<8x20xf32>
    %cst_120 = arith.constant 5.000000e-01 : f32
    %352 = vector.broadcast %cst_120 : f32 to vector<8x20xf32>
    %353 = arith.mulf %352, %351 : vector<8x20xf32>
    %cst_121 = arith.constant 5.000000e-01 : f32
    %354 = vector.broadcast %cst_121 : f32 to vector<8x20xf32>
    %355 = arith.addf %353, %354 : vector<8x20xf32>
    %356 = arith.mulf %345, %288 : vector<8x20xf32>
    %357 = arith.mulf %337, %347 : vector<8x20xf32>
    %358 = arith.addf %356, %357 : vector<8x20xf32>
    %359 = math.tanh %358 : vector<8x20xf32>
    %360 = arith.mulf %355, %359 : vector<8x20xf32>
    %c40 = arith.constant 40 : index
    %c0_122 = arith.constant 0 : index
    %361 = vector.load %arg9[%c40, %c0_122] : memref<120x1024xf32, #tpu.memory_space<vmem>>, vector<8x512xf32>
    %c72 = arith.constant 72 : index
    %c512_123 = arith.constant 512 : index
    %362 = vector.load %arg9[%c72, %c512_123] : memref<120x1024xf32, #tpu.memory_space<vmem>>, vector<8x512xf32>
    %363 = arith.truncf %329 : vector<8x20xf32> to vector<8x20xbf16>
    %cst_124 = arith.constant dense<0.000000e+00> : vector<8x512xf32>
    %364 = tpu.matmul %363, %8, %cst_124 {dimension_numbers = #tpu.dot_dimension_numbers<[1], [0], [0], [1], [0, 0, 1, 1], [], []>} : vector<8x20xbf16>, vector<20x512xbf16>, vector<8x512xf32> -> vector<8x512xf32>
    %365 = arith.addf %361, %364 : vector<8x512xf32>
    %366 = arith.truncf %360 : vector<8x20xf32> to vector<8x20xbf16>
    %cst_125 = arith.constant dense<0.000000e+00> : vector<8x512xf32>
    %367 = tpu.matmul %366, %9, %cst_125 {dimension_numbers = #tpu.dot_dimension_numbers<[1], [0], [0], [1], [0, 0, 1, 1], [], []>} : vector<8x20xbf16>, vector<20x512xbf16>, vector<8x512xf32> -> vector<8x512xf32>
    %368 = arith.addf %362, %367 : vector<8x512xf32>
    %369 = vector.extract_strided_slice %365 {offsets = [0, 0], sizes = [8, 20], strides = [1, 1]} : vector<8x512xf32> to vector<8x20xf32>
    %cst_126 = arith.constant 5.000000e-01 : f32
    %370 = vector.broadcast %cst_126 : f32 to vector<8x20xf32>
    %371 = arith.mulf %370, %369 : vector<8x20xf32>
    %372 = math.tanh %371 : vector<8x20xf32>
    %cst_127 = arith.constant 5.000000e-01 : f32
    %373 = vector.broadcast %cst_127 : f32 to vector<8x20xf32>
    %374 = arith.mulf %373, %372 : vector<8x20xf32>
    %cst_128 = arith.constant 5.000000e-01 : f32
    %375 = vector.broadcast %cst_128 : f32 to vector<8x20xf32>
    %376 = arith.addf %374, %375 : vector<8x20xf32>
    %377 = vector.extract_strided_slice %365 {offsets = [0, 128], sizes = [8, 20], strides = [1, 1]} : vector<8x512xf32> to vector<8x20xf32>
    %cst_129 = arith.constant 5.000000e-01 : f32
    %378 = vector.broadcast %cst_129 : f32 to vector<8x20xf32>
    %379 = arith.mulf %378, %377 : vector<8x20xf32>
    %380 = math.tanh %379 : vector<8x20xf32>
    %cst_130 = arith.constant 5.000000e-01 : f32
    %381 = vector.broadcast %cst_130 : f32 to vector<8x20xf32>
    %382 = arith.mulf %381, %380 : vector<8x20xf32>
    %cst_131 = arith.constant 5.000000e-01 : f32
    %383 = vector.broadcast %cst_131 : f32 to vector<8x20xf32>
    %384 = arith.addf %382, %383 : vector<8x20xf32>
    %385 = vector.extract_strided_slice %365 {offsets = [0, 256], sizes = [8, 20], strides = [1, 1]} : vector<8x512xf32> to vector<8x20xf32>
    %386 = math.tanh %385 : vector<8x20xf32>
    %387 = vector.extract_strided_slice %365 {offsets = [0, 384], sizes = [8, 20], strides = [1, 1]} : vector<8x512xf32> to vector<8x20xf32>
    %cst_132 = arith.constant 5.000000e-01 : f32
    %388 = vector.broadcast %cst_132 : f32 to vector<8x20xf32>
    %389 = arith.mulf %388, %387 : vector<8x20xf32>
    %390 = math.tanh %389 : vector<8x20xf32>
    %cst_133 = arith.constant 5.000000e-01 : f32
    %391 = vector.broadcast %cst_133 : f32 to vector<8x20xf32>
    %392 = arith.mulf %391, %390 : vector<8x20xf32>
    %cst_134 = arith.constant 5.000000e-01 : f32
    %393 = vector.broadcast %cst_134 : f32 to vector<8x20xf32>
    %394 = arith.addf %392, %393 : vector<8x20xf32>
    %395 = arith.mulf %384, %327 : vector<8x20xf32>
    %396 = arith.mulf %376, %386 : vector<8x20xf32>
    %397 = arith.addf %395, %396 : vector<8x20xf32>
    %398 = math.tanh %397 : vector<8x20xf32>
    %399 = arith.mulf %394, %398 : vector<8x20xf32>
    %400 = vector.extract_strided_slice %368 {offsets = [0, 0], sizes = [8, 20], strides = [1, 1]} : vector<8x512xf32> to vector<8x20xf32>
    %cst_135 = arith.constant 5.000000e-01 : f32
    %401 = vector.broadcast %cst_135 : f32 to vector<8x20xf32>
    %402 = arith.mulf %401, %400 : vector<8x20xf32>
    %403 = math.tanh %402 : vector<8x20xf32>
    %cst_136 = arith.constant 5.000000e-01 : f32
    %404 = vector.broadcast %cst_136 : f32 to vector<8x20xf32>
    %405 = arith.mulf %404, %403 : vector<8x20xf32>
    %cst_137 = arith.constant 5.000000e-01 : f32
    %406 = vector.broadcast %cst_137 : f32 to vector<8x20xf32>
    %407 = arith.addf %405, %406 : vector<8x20xf32>
    %408 = vector.extract_strided_slice %368 {offsets = [0, 128], sizes = [8, 20], strides = [1, 1]} : vector<8x512xf32> to vector<8x20xf32>
    %cst_138 = arith.constant 5.000000e-01 : f32
    %409 = vector.broadcast %cst_138 : f32 to vector<8x20xf32>
    %410 = arith.mulf %409, %408 : vector<8x20xf32>
    %411 = math.tanh %410 : vector<8x20xf32>
    %cst_139 = arith.constant 5.000000e-01 : f32
    %412 = vector.broadcast %cst_139 : f32 to vector<8x20xf32>
    %413 = arith.mulf %412, %411 : vector<8x20xf32>
    %cst_140 = arith.constant 5.000000e-01 : f32
    %414 = vector.broadcast %cst_140 : f32 to vector<8x20xf32>
    %415 = arith.addf %413, %414 : vector<8x20xf32>
    %416 = vector.extract_strided_slice %368 {offsets = [0, 256], sizes = [8, 20], strides = [1, 1]} : vector<8x512xf32> to vector<8x20xf32>
    %417 = math.tanh %416 : vector<8x20xf32>
    %418 = vector.extract_strided_slice %368 {offsets = [0, 384], sizes = [8, 20], strides = [1, 1]} : vector<8x512xf32> to vector<8x20xf32>
    %cst_141 = arith.constant 5.000000e-01 : f32
    %419 = vector.broadcast %cst_141 : f32 to vector<8x20xf32>
    %420 = arith.mulf %419, %418 : vector<8x20xf32>
    %421 = math.tanh %420 : vector<8x20xf32>
    %cst_142 = arith.constant 5.000000e-01 : f32
    %422 = vector.broadcast %cst_142 : f32 to vector<8x20xf32>
    %423 = arith.mulf %422, %421 : vector<8x20xf32>
    %cst_143 = arith.constant 5.000000e-01 : f32
    %424 = vector.broadcast %cst_143 : f32 to vector<8x20xf32>
    %425 = arith.addf %423, %424 : vector<8x20xf32>
    %426 = arith.mulf %415, %358 : vector<8x20xf32>
    %427 = arith.mulf %407, %417 : vector<8x20xf32>
    %428 = arith.addf %426, %427 : vector<8x20xf32>
    %429 = math.tanh %428 : vector<8x20xf32>
    %430 = arith.mulf %425, %429 : vector<8x20xf32>
    %c48 = arith.constant 48 : index
    %c0_144 = arith.constant 0 : index
    %431 = vector.load %arg9[%c48, %c0_144] : memref<120x1024xf32, #tpu.memory_space<vmem>>, vector<8x512xf32>
    %c64 = arith.constant 64 : index
    %c512_145 = arith.constant 512 : index
    %432 = vector.load %arg9[%c64, %c512_145] : memref<120x1024xf32, #tpu.memory_space<vmem>>, vector<8x512xf32>
    %433 = arith.truncf %399 : vector<8x20xf32> to vector<8x20xbf16>
    %cst_146 = arith.constant dense<0.000000e+00> : vector<8x512xf32>
    %434 = tpu.matmul %433, %8, %cst_146 {dimension_numbers = #tpu.dot_dimension_numbers<[1], [0], [0], [1], [0, 0, 1, 1], [], []>} : vector<8x20xbf16>, vector<20x512xbf16>, vector<8x512xf32> -> vector<8x512xf32>
    %435 = arith.addf %431, %434 : vector<8x512xf32>
    %436 = arith.truncf %430 : vector<8x20xf32> to vector<8x20xbf16>
    %cst_147 = arith.constant dense<0.000000e+00> : vector<8x512xf32>
    %437 = tpu.matmul %436, %9, %cst_147 {dimension_numbers = #tpu.dot_dimension_numbers<[1], [0], [0], [1], [0, 0, 1, 1], [], []>} : vector<8x20xbf16>, vector<20x512xbf16>, vector<8x512xf32> -> vector<8x512xf32>
    %438 = arith.addf %432, %437 : vector<8x512xf32>
    %439 = vector.extract_strided_slice %435 {offsets = [0, 0], sizes = [8, 20], strides = [1, 1]} : vector<8x512xf32> to vector<8x20xf32>
    %cst_148 = arith.constant 5.000000e-01 : f32
    %440 = vector.broadcast %cst_148 : f32 to vector<8x20xf32>
    %441 = arith.mulf %440, %439 : vector<8x20xf32>
    %442 = math.tanh %441 : vector<8x20xf32>
    %cst_149 = arith.constant 5.000000e-01 : f32
    %443 = vector.broadcast %cst_149 : f32 to vector<8x20xf32>
    %444 = arith.mulf %443, %442 : vector<8x20xf32>
    %cst_150 = arith.constant 5.000000e-01 : f32
    %445 = vector.broadcast %cst_150 : f32 to vector<8x20xf32>
    %446 = arith.addf %444, %445 : vector<8x20xf32>
    %447 = vector.extract_strided_slice %435 {offsets = [0, 128], sizes = [8, 20], strides = [1, 1]} : vector<8x512xf32> to vector<8x20xf32>
    %cst_151 = arith.constant 5.000000e-01 : f32
    %448 = vector.broadcast %cst_151 : f32 to vector<8x20xf32>
    %449 = arith.mulf %448, %447 : vector<8x20xf32>
    %450 = math.tanh %449 : vector<8x20xf32>
    %cst_152 = arith.constant 5.000000e-01 : f32
    %451 = vector.broadcast %cst_152 : f32 to vector<8x20xf32>
    %452 = arith.mulf %451, %450 : vector<8x20xf32>
    %cst_153 = arith.constant 5.000000e-01 : f32
    %453 = vector.broadcast %cst_153 : f32 to vector<8x20xf32>
    %454 = arith.addf %452, %453 : vector<8x20xf32>
    %455 = vector.extract_strided_slice %435 {offsets = [0, 256], sizes = [8, 20], strides = [1, 1]} : vector<8x512xf32> to vector<8x20xf32>
    %456 = math.tanh %455 : vector<8x20xf32>
    %457 = vector.extract_strided_slice %435 {offsets = [0, 384], sizes = [8, 20], strides = [1, 1]} : vector<8x512xf32> to vector<8x20xf32>
    %cst_154 = arith.constant 5.000000e-01 : f32
    %458 = vector.broadcast %cst_154 : f32 to vector<8x20xf32>
    %459 = arith.mulf %458, %457 : vector<8x20xf32>
    %460 = math.tanh %459 : vector<8x20xf32>
    %cst_155 = arith.constant 5.000000e-01 : f32
    %461 = vector.broadcast %cst_155 : f32 to vector<8x20xf32>
    %462 = arith.mulf %461, %460 : vector<8x20xf32>
    %cst_156 = arith.constant 5.000000e-01 : f32
    %463 = vector.broadcast %cst_156 : f32 to vector<8x20xf32>
    %464 = arith.addf %462, %463 : vector<8x20xf32>
    %465 = arith.mulf %454, %397 : vector<8x20xf32>
    %466 = arith.mulf %446, %456 : vector<8x20xf32>
    %467 = arith.addf %465, %466 : vector<8x20xf32>
    %468 = math.tanh %467 : vector<8x20xf32>
    %469 = arith.mulf %464, %468 : vector<8x20xf32>
    %470 = vector.extract_strided_slice %438 {offsets = [0, 0], sizes = [8, 20], strides = [1, 1]} : vector<8x512xf32> to vector<8x20xf32>
    %cst_157 = arith.constant 5.000000e-01 : f32
    %471 = vector.broadcast %cst_157 : f32 to vector<8x20xf32>
    %472 = arith.mulf %471, %470 : vector<8x20xf32>
    %473 = math.tanh %472 : vector<8x20xf32>
    %cst_158 = arith.constant 5.000000e-01 : f32
    %474 = vector.broadcast %cst_158 : f32 to vector<8x20xf32>
    %475 = arith.mulf %474, %473 : vector<8x20xf32>
    %cst_159 = arith.constant 5.000000e-01 : f32
    %476 = vector.broadcast %cst_159 : f32 to vector<8x20xf32>
    %477 = arith.addf %475, %476 : vector<8x20xf32>
    %478 = vector.extract_strided_slice %438 {offsets = [0, 128], sizes = [8, 20], strides = [1, 1]} : vector<8x512xf32> to vector<8x20xf32>
    %cst_160 = arith.constant 5.000000e-01 : f32
    %479 = vector.broadcast %cst_160 : f32 to vector<8x20xf32>
    %480 = arith.mulf %479, %478 : vector<8x20xf32>
    %481 = math.tanh %480 : vector<8x20xf32>
    %cst_161 = arith.constant 5.000000e-01 : f32
    %482 = vector.broadcast %cst_161 : f32 to vector<8x20xf32>
    %483 = arith.mulf %482, %481 : vector<8x20xf32>
    %cst_162 = arith.constant 5.000000e-01 : f32
    %484 = vector.broadcast %cst_162 : f32 to vector<8x20xf32>
    %485 = arith.addf %483, %484 : vector<8x20xf32>
    %486 = vector.extract_strided_slice %438 {offsets = [0, 256], sizes = [8, 20], strides = [1, 1]} : vector<8x512xf32> to vector<8x20xf32>
    %487 = math.tanh %486 : vector<8x20xf32>
    %488 = vector.extract_strided_slice %438 {offsets = [0, 384], sizes = [8, 20], strides = [1, 1]} : vector<8x512xf32> to vector<8x20xf32>
    %cst_163 = arith.constant 5.000000e-01 : f32
    %489 = vector.broadcast %cst_163 : f32 to vector<8x20xf32>
    %490 = arith.mulf %489, %488 : vector<8x20xf32>
    %491 = math.tanh %490 : vector<8x20xf32>
    %cst_164 = arith.constant 5.000000e-01 : f32
    %492 = vector.broadcast %cst_164 : f32 to vector<8x20xf32>
    %493 = arith.mulf %492, %491 : vector<8x20xf32>
    %cst_165 = arith.constant 5.000000e-01 : f32
    %494 = vector.broadcast %cst_165 : f32 to vector<8x20xf32>
    %495 = arith.addf %493, %494 : vector<8x20xf32>
    %496 = arith.mulf %485, %428 : vector<8x20xf32>
    %497 = arith.mulf %477, %487 : vector<8x20xf32>
    %498 = arith.addf %496, %497 : vector<8x20xf32>
    %499 = math.tanh %498 : vector<8x20xf32>
    %500 = arith.mulf %495, %499 : vector<8x20xf32>
    %c56 = arith.constant 56 : index
    %c0_166 = arith.constant 0 : index
    %501 = vector.load %arg9[%c56, %c0_166] : memref<120x1024xf32, #tpu.memory_space<vmem>>, vector<8x512xf32>
    %c56_167 = arith.constant 56 : index
    %c512_168 = arith.constant 512 : index
    %502 = vector.load %arg9[%c56_167, %c512_168] : memref<120x1024xf32, #tpu.memory_space<vmem>>, vector<8x512xf32>
    %503 = arith.truncf %469 : vector<8x20xf32> to vector<8x20xbf16>
    %cst_169 = arith.constant dense<0.000000e+00> : vector<8x512xf32>
    %504 = tpu.matmul %503, %8, %cst_169 {dimension_numbers = #tpu.dot_dimension_numbers<[1], [0], [0], [1], [0, 0, 1, 1], [], []>} : vector<8x20xbf16>, vector<20x512xbf16>, vector<8x512xf32> -> vector<8x512xf32>
    %505 = arith.addf %501, %504 : vector<8x512xf32>
    %506 = arith.truncf %500 : vector<8x20xf32> to vector<8x20xbf16>
    %cst_170 = arith.constant dense<0.000000e+00> : vector<8x512xf32>
    %507 = tpu.matmul %506, %9, %cst_170 {dimension_numbers = #tpu.dot_dimension_numbers<[1], [0], [0], [1], [0, 0, 1, 1], [], []>} : vector<8x20xbf16>, vector<20x512xbf16>, vector<8x512xf32> -> vector<8x512xf32>
    %508 = arith.addf %502, %507 : vector<8x512xf32>
    %509 = vector.extract_strided_slice %505 {offsets = [0, 0], sizes = [8, 20], strides = [1, 1]} : vector<8x512xf32> to vector<8x20xf32>
    %cst_171 = arith.constant 5.000000e-01 : f32
    %510 = vector.broadcast %cst_171 : f32 to vector<8x20xf32>
    %511 = arith.mulf %510, %509 : vector<8x20xf32>
    %512 = math.tanh %511 : vector<8x20xf32>
    %cst_172 = arith.constant 5.000000e-01 : f32
    %513 = vector.broadcast %cst_172 : f32 to vector<8x20xf32>
    %514 = arith.mulf %513, %512 : vector<8x20xf32>
    %cst_173 = arith.constant 5.000000e-01 : f32
    %515 = vector.broadcast %cst_173 : f32 to vector<8x20xf32>
    %516 = arith.addf %514, %515 : vector<8x20xf32>
    %517 = vector.extract_strided_slice %505 {offsets = [0, 128], sizes = [8, 20], strides = [1, 1]} : vector<8x512xf32> to vector<8x20xf32>
    %cst_174 = arith.constant 5.000000e-01 : f32
    %518 = vector.broadcast %cst_174 : f32 to vector<8x20xf32>
    %519 = arith.mulf %518, %517 : vector<8x20xf32>
    %520 = math.tanh %519 : vector<8x20xf32>
    %cst_175 = arith.constant 5.000000e-01 : f32
    %521 = vector.broadcast %cst_175 : f32 to vector<8x20xf32>
    %522 = arith.mulf %521, %520 : vector<8x20xf32>
    %cst_176 = arith.constant 5.000000e-01 : f32
    %523 = vector.broadcast %cst_176 : f32 to vector<8x20xf32>
    %524 = arith.addf %522, %523 : vector<8x20xf32>
    %525 = vector.extract_strided_slice %505 {offsets = [0, 256], sizes = [8, 20], strides = [1, 1]} : vector<8x512xf32> to vector<8x20xf32>
    %526 = math.tanh %525 : vector<8x20xf32>
    %527 = vector.extract_strided_slice %505 {offsets = [0, 384], sizes = [8, 20], strides = [1, 1]} : vector<8x512xf32> to vector<8x20xf32>
    %cst_177 = arith.constant 5.000000e-01 : f32
    %528 = vector.broadcast %cst_177 : f32 to vector<8x20xf32>
    %529 = arith.mulf %528, %527 : vector<8x20xf32>
    %530 = math.tanh %529 : vector<8x20xf32>
    %cst_178 = arith.constant 5.000000e-01 : f32
    %531 = vector.broadcast %cst_178 : f32 to vector<8x20xf32>
    %532 = arith.mulf %531, %530 : vector<8x20xf32>
    %cst_179 = arith.constant 5.000000e-01 : f32
    %533 = vector.broadcast %cst_179 : f32 to vector<8x20xf32>
    %534 = arith.addf %532, %533 : vector<8x20xf32>
    %535 = arith.mulf %524, %467 : vector<8x20xf32>
    %536 = arith.mulf %516, %526 : vector<8x20xf32>
    %537 = arith.addf %535, %536 : vector<8x20xf32>
    %538 = math.tanh %537 : vector<8x20xf32>
    %539 = arith.mulf %534, %538 : vector<8x20xf32>
    %540 = vector.extract_strided_slice %508 {offsets = [0, 0], sizes = [8, 20], strides = [1, 1]} : vector<8x512xf32> to vector<8x20xf32>
    %cst_180 = arith.constant 5.000000e-01 : f32
    %541 = vector.broadcast %cst_180 : f32 to vector<8x20xf32>
    %542 = arith.mulf %541, %540 : vector<8x20xf32>
    %543 = math.tanh %542 : vector<8x20xf32>
    %cst_181 = arith.constant 5.000000e-01 : f32
    %544 = vector.broadcast %cst_181 : f32 to vector<8x20xf32>
    %545 = arith.mulf %544, %543 : vector<8x20xf32>
    %cst_182 = arith.constant 5.000000e-01 : f32
    %546 = vector.broadcast %cst_182 : f32 to vector<8x20xf32>
    %547 = arith.addf %545, %546 : vector<8x20xf32>
    %548 = vector.extract_strided_slice %508 {offsets = [0, 128], sizes = [8, 20], strides = [1, 1]} : vector<8x512xf32> to vector<8x20xf32>
    %cst_183 = arith.constant 5.000000e-01 : f32
    %549 = vector.broadcast %cst_183 : f32 to vector<8x20xf32>
    %550 = arith.mulf %549, %548 : vector<8x20xf32>
    %551 = math.tanh %550 : vector<8x20xf32>
    %cst_184 = arith.constant 5.000000e-01 : f32
    %552 = vector.broadcast %cst_184 : f32 to vector<8x20xf32>
    %553 = arith.mulf %552, %551 : vector<8x20xf32>
    %cst_185 = arith.constant 5.000000e-01 : f32
    %554 = vector.broadcast %cst_185 : f32 to vector<8x20xf32>
    %555 = arith.addf %553, %554 : vector<8x20xf32>
    %556 = vector.extract_strided_slice %508 {offsets = [0, 256], sizes = [8, 20], strides = [1, 1]} : vector<8x512xf32> to vector<8x20xf32>
    %557 = math.tanh %556 : vector<8x20xf32>
    %558 = vector.extract_strided_slice %508 {offsets = [0, 384], sizes = [8, 20], strides = [1, 1]} : vector<8x512xf32> to vector<8x20xf32>
    %cst_186 = arith.constant 5.000000e-01 : f32
    %559 = vector.broadcast %cst_186 : f32 to vector<8x20xf32>
    %560 = arith.mulf %559, %558 : vector<8x20xf32>
    %561 = math.tanh %560 : vector<8x20xf32>
    %cst_187 = arith.constant 5.000000e-01 : f32
    %562 = vector.broadcast %cst_187 : f32 to vector<8x20xf32>
    %563 = arith.mulf %562, %561 : vector<8x20xf32>
    %cst_188 = arith.constant 5.000000e-01 : f32
    %564 = vector.broadcast %cst_188 : f32 to vector<8x20xf32>
    %565 = arith.addf %563, %564 : vector<8x20xf32>
    %566 = arith.mulf %555, %498 : vector<8x20xf32>
    %567 = arith.mulf %547, %557 : vector<8x20xf32>
    %568 = arith.addf %566, %567 : vector<8x20xf32>
    %569 = math.tanh %568 : vector<8x20xf32>
    %570 = arith.mulf %565, %569 : vector<8x20xf32>
    %c64_189 = arith.constant 64 : index
    %c0_190 = arith.constant 0 : index
    %571 = vector.load %arg9[%c64_189, %c0_190] : memref<120x1024xf32, #tpu.memory_space<vmem>>, vector<8x512xf32>
    %c48_191 = arith.constant 48 : index
    %c512_192 = arith.constant 512 : index
    %572 = vector.load %arg9[%c48_191, %c512_192] : memref<120x1024xf32, #tpu.memory_space<vmem>>, vector<8x512xf32>
    %573 = arith.truncf %539 : vector<8x20xf32> to vector<8x20xbf16>
    %cst_193 = arith.constant dense<0.000000e+00> : vector<8x512xf32>
    %574 = tpu.matmul %573, %8, %cst_193 {dimension_numbers = #tpu.dot_dimension_numbers<[1], [0], [0], [1], [0, 0, 1, 1], [], []>} : vector<8x20xbf16>, vector<20x512xbf16>, vector<8x512xf32> -> vector<8x512xf32>
    %575 = arith.addf %571, %574 : vector<8x512xf32>
    %576 = arith.truncf %570 : vector<8x20xf32> to vector<8x20xbf16>
    %cst_194 = arith.constant dense<0.000000e+00> : vector<8x512xf32>
    %577 = tpu.matmul %576, %9, %cst_194 {dimension_numbers = #tpu.dot_dimension_numbers<[1], [0], [0], [1], [0, 0, 1, 1], [], []>} : vector<8x20xbf16>, vector<20x512xbf16>, vector<8x512xf32> -> vector<8x512xf32>
    %578 = arith.addf %572, %577 : vector<8x512xf32>
    %579 = vector.extract_strided_slice %575 {offsets = [0, 0], sizes = [8, 20], strides = [1, 1]} : vector<8x512xf32> to vector<8x20xf32>
    %cst_195 = arith.constant 5.000000e-01 : f32
    %580 = vector.broadcast %cst_195 : f32 to vector<8x20xf32>
    %581 = arith.mulf %580, %579 : vector<8x20xf32>
    %582 = math.tanh %581 : vector<8x20xf32>
    %cst_196 = arith.constant 5.000000e-01 : f32
    %583 = vector.broadcast %cst_196 : f32 to vector<8x20xf32>
    %584 = arith.mulf %583, %582 : vector<8x20xf32>
    %cst_197 = arith.constant 5.000000e-01 : f32
    %585 = vector.broadcast %cst_197 : f32 to vector<8x20xf32>
    %586 = arith.addf %584, %585 : vector<8x20xf32>
    %587 = vector.extract_strided_slice %575 {offsets = [0, 128], sizes = [8, 20], strides = [1, 1]} : vector<8x512xf32> to vector<8x20xf32>
    %cst_198 = arith.constant 5.000000e-01 : f32
    %588 = vector.broadcast %cst_198 : f32 to vector<8x20xf32>
    %589 = arith.mulf %588, %587 : vector<8x20xf32>
    %590 = math.tanh %589 : vector<8x20xf32>
    %cst_199 = arith.constant 5.000000e-01 : f32
    %591 = vector.broadcast %cst_199 : f32 to vector<8x20xf32>
    %592 = arith.mulf %591, %590 : vector<8x20xf32>
    %cst_200 = arith.constant 5.000000e-01 : f32
    %593 = vector.broadcast %cst_200 : f32 to vector<8x20xf32>
    %594 = arith.addf %592, %593 : vector<8x20xf32>
    %595 = vector.extract_strided_slice %575 {offsets = [0, 256], sizes = [8, 20], strides = [1, 1]} : vector<8x512xf32> to vector<8x20xf32>
    %596 = math.tanh %595 : vector<8x20xf32>
    %597 = vector.extract_strided_slice %575 {offsets = [0, 384], sizes = [8, 20], strides = [1, 1]} : vector<8x512xf32> to vector<8x20xf32>
    %cst_201 = arith.constant 5.000000e-01 : f32
    %598 = vector.broadcast %cst_201 : f32 to vector<8x20xf32>
    %599 = arith.mulf %598, %597 : vector<8x20xf32>
    %600 = math.tanh %599 : vector<8x20xf32>
    %cst_202 = arith.constant 5.000000e-01 : f32
    %601 = vector.broadcast %cst_202 : f32 to vector<8x20xf32>
    %602 = arith.mulf %601, %600 : vector<8x20xf32>
    %cst_203 = arith.constant 5.000000e-01 : f32
    %603 = vector.broadcast %cst_203 : f32 to vector<8x20xf32>
    %604 = arith.addf %602, %603 : vector<8x20xf32>
    %605 = arith.mulf %594, %537 : vector<8x20xf32>
    %606 = arith.mulf %586, %596 : vector<8x20xf32>
    %607 = arith.addf %605, %606 : vector<8x20xf32>
    %608 = math.tanh %607 : vector<8x20xf32>
    %609 = arith.mulf %604, %608 : vector<8x20xf32>
    %610 = vector.extract_strided_slice %578 {offsets = [0, 0], sizes = [8, 20], strides = [1, 1]} : vector<8x512xf32> to vector<8x20xf32>
    %cst_204 = arith.constant 5.000000e-01 : f32
    %611 = vector.broadcast %cst_204 : f32 to vector<8x20xf32>
    %612 = arith.mulf %611, %610 : vector<8x20xf32>
    %613 = math.tanh %612 : vector<8x20xf32>
    %cst_205 = arith.constant 5.000000e-01 : f32
    %614 = vector.broadcast %cst_205 : f32 to vector<8x20xf32>
    %615 = arith.mulf %614, %613 : vector<8x20xf32>
    %cst_206 = arith.constant 5.000000e-01 : f32
    %616 = vector.broadcast %cst_206 : f32 to vector<8x20xf32>
    %617 = arith.addf %615, %616 : vector<8x20xf32>
    %618 = vector.extract_strided_slice %578 {offsets = [0, 128], sizes = [8, 20], strides = [1, 1]} : vector<8x512xf32> to vector<8x20xf32>
    %cst_207 = arith.constant 5.000000e-01 : f32
    %619 = vector.broadcast %cst_207 : f32 to vector<8x20xf32>
    %620 = arith.mulf %619, %618 : vector<8x20xf32>
    %621 = math.tanh %620 : vector<8x20xf32>
    %cst_208 = arith.constant 5.000000e-01 : f32
    %622 = vector.broadcast %cst_208 : f32 to vector<8x20xf32>
    %623 = arith.mulf %622, %621 : vector<8x20xf32>
    %cst_209 = arith.constant 5.000000e-01 : f32
    %624 = vector.broadcast %cst_209 : f32 to vector<8x20xf32>
    %625 = arith.addf %623, %624 : vector<8x20xf32>
    %626 = vector.extract_strided_slice %578 {offsets = [0, 256], sizes = [8, 20], strides = [1, 1]} : vector<8x512xf32> to vector<8x20xf32>
    %627 = math.tanh %626 : vector<8x20xf32>
    %628 = vector.extract_strided_slice %578 {offsets = [0, 384], sizes = [8, 20], strides = [1, 1]} : vector<8x512xf32> to vector<8x20xf32>
    %cst_210 = arith.constant 5.000000e-01 : f32
    %629 = vector.broadcast %cst_210 : f32 to vector<8x20xf32>
    %630 = arith.mulf %629, %628 : vector<8x20xf32>
    %631 = math.tanh %630 : vector<8x20xf32>
    %cst_211 = arith.constant 5.000000e-01 : f32
    %632 = vector.broadcast %cst_211 : f32 to vector<8x20xf32>
    %633 = arith.mulf %632, %631 : vector<8x20xf32>
    %cst_212 = arith.constant 5.000000e-01 : f32
    %634 = vector.broadcast %cst_212 : f32 to vector<8x20xf32>
    %635 = arith.addf %633, %634 : vector<8x20xf32>
    %636 = arith.mulf %625, %568 : vector<8x20xf32>
    %637 = arith.mulf %617, %627 : vector<8x20xf32>
    %638 = arith.addf %636, %637 : vector<8x20xf32>
    %639 = math.tanh %638 : vector<8x20xf32>
    %640 = arith.mulf %635, %639 : vector<8x20xf32>
    %c72_213 = arith.constant 72 : index
    %c0_214 = arith.constant 0 : index
    %641 = vector.load %arg9[%c72_213, %c0_214] : memref<120x1024xf32, #tpu.memory_space<vmem>>, vector<8x512xf32>
    %c40_215 = arith.constant 40 : index
    %c512_216 = arith.constant 512 : index
    %642 = vector.load %arg9[%c40_215, %c512_216] : memref<120x1024xf32, #tpu.memory_space<vmem>>, vector<8x512xf32>
    %643 = arith.truncf %609 : vector<8x20xf32> to vector<8x20xbf16>
    %cst_217 = arith.constant dense<0.000000e+00> : vector<8x512xf32>
    %644 = tpu.matmul %643, %8, %cst_217 {dimension_numbers = #tpu.dot_dimension_numbers<[1], [0], [0], [1], [0, 0, 1, 1], [], []>} : vector<8x20xbf16>, vector<20x512xbf16>, vector<8x512xf32> -> vector<8x512xf32>
    %645 = arith.addf %641, %644 : vector<8x512xf32>
    %646 = arith.truncf %640 : vector<8x20xf32> to vector<8x20xbf16>
    %cst_218 = arith.constant dense<0.000000e+00> : vector<8x512xf32>
    %647 = tpu.matmul %646, %9, %cst_218 {dimension_numbers = #tpu.dot_dimension_numbers<[1], [0], [0], [1], [0, 0, 1, 1], [], []>} : vector<8x20xbf16>, vector<20x512xbf16>, vector<8x512xf32> -> vector<8x512xf32>
    %648 = arith.addf %642, %647 : vector<8x512xf32>
    %649 = vector.extract_strided_slice %645 {offsets = [0, 0], sizes = [8, 20], strides = [1, 1]} : vector<8x512xf32> to vector<8x20xf32>
    %cst_219 = arith.constant 5.000000e-01 : f32
    %650 = vector.broadcast %cst_219 : f32 to vector<8x20xf32>
    %651 = arith.mulf %650, %649 : vector<8x20xf32>
    %652 = math.tanh %651 : vector<8x20xf32>
    %cst_220 = arith.constant 5.000000e-01 : f32
    %653 = vector.broadcast %cst_220 : f32 to vector<8x20xf32>
    %654 = arith.mulf %653, %652 : vector<8x20xf32>
    %cst_221 = arith.constant 5.000000e-01 : f32
    %655 = vector.broadcast %cst_221 : f32 to vector<8x20xf32>
    %656 = arith.addf %654, %655 : vector<8x20xf32>
    %657 = vector.extract_strided_slice %645 {offsets = [0, 128], sizes = [8, 20], strides = [1, 1]} : vector<8x512xf32> to vector<8x20xf32>
    %cst_222 = arith.constant 5.000000e-01 : f32
    %658 = vector.broadcast %cst_222 : f32 to vector<8x20xf32>
    %659 = arith.mulf %658, %657 : vector<8x20xf32>
    %660 = math.tanh %659 : vector<8x20xf32>
    %cst_223 = arith.constant 5.000000e-01 : f32
    %661 = vector.broadcast %cst_223 : f32 to vector<8x20xf32>
    %662 = arith.mulf %661, %660 : vector<8x20xf32>
    %cst_224 = arith.constant 5.000000e-01 : f32
    %663 = vector.broadcast %cst_224 : f32 to vector<8x20xf32>
    %664 = arith.addf %662, %663 : vector<8x20xf32>
    %665 = vector.extract_strided_slice %645 {offsets = [0, 256], sizes = [8, 20], strides = [1, 1]} : vector<8x512xf32> to vector<8x20xf32>
    %666 = math.tanh %665 : vector<8x20xf32>
    %667 = vector.extract_strided_slice %645 {offsets = [0, 384], sizes = [8, 20], strides = [1, 1]} : vector<8x512xf32> to vector<8x20xf32>
    %cst_225 = arith.constant 5.000000e-01 : f32
    %668 = vector.broadcast %cst_225 : f32 to vector<8x20xf32>
    %669 = arith.mulf %668, %667 : vector<8x20xf32>
    %670 = math.tanh %669 : vector<8x20xf32>
    %cst_226 = arith.constant 5.000000e-01 : f32
    %671 = vector.broadcast %cst_226 : f32 to vector<8x20xf32>
    %672 = arith.mulf %671, %670 : vector<8x20xf32>
    %cst_227 = arith.constant 5.000000e-01 : f32
    %673 = vector.broadcast %cst_227 : f32 to vector<8x20xf32>
    %674 = arith.addf %672, %673 : vector<8x20xf32>
    %675 = arith.mulf %664, %607 : vector<8x20xf32>
    %676 = arith.mulf %656, %666 : vector<8x20xf32>
    %677 = arith.addf %675, %676 : vector<8x20xf32>
    %678 = math.tanh %677 : vector<8x20xf32>
    %679 = arith.mulf %674, %678 : vector<8x20xf32>
    %680 = vector.extract_strided_slice %648 {offsets = [0, 0], sizes = [8, 20], strides = [1, 1]} : vector<8x512xf32> to vector<8x20xf32>
    %cst_228 = arith.constant 5.000000e-01 : f32
    %681 = vector.broadcast %cst_228 : f32 to vector<8x20xf32>
    %682 = arith.mulf %681, %680 : vector<8x20xf32>
    %683 = math.tanh %682 : vector<8x20xf32>
    %cst_229 = arith.constant 5.000000e-01 : f32
    %684 = vector.broadcast %cst_229 : f32 to vector<8x20xf32>
    %685 = arith.mulf %684, %683 : vector<8x20xf32>
    %cst_230 = arith.constant 5.000000e-01 : f32
    %686 = vector.broadcast %cst_230 : f32 to vector<8x20xf32>
    %687 = arith.addf %685, %686 : vector<8x20xf32>
    %688 = vector.extract_strided_slice %648 {offsets = [0, 128], sizes = [8, 20], strides = [1, 1]} : vector<8x512xf32> to vector<8x20xf32>
    %cst_231 = arith.constant 5.000000e-01 : f32
    %689 = vector.broadcast %cst_231 : f32 to vector<8x20xf32>
    %690 = arith.mulf %689, %688 : vector<8x20xf32>
    %691 = math.tanh %690 : vector<8x20xf32>
    %cst_232 = arith.constant 5.000000e-01 : f32
    %692 = vector.broadcast %cst_232 : f32 to vector<8x20xf32>
    %693 = arith.mulf %692, %691 : vector<8x20xf32>
    %cst_233 = arith.constant 5.000000e-01 : f32
    %694 = vector.broadcast %cst_233 : f32 to vector<8x20xf32>
    %695 = arith.addf %693, %694 : vector<8x20xf32>
    %696 = vector.extract_strided_slice %648 {offsets = [0, 256], sizes = [8, 20], strides = [1, 1]} : vector<8x512xf32> to vector<8x20xf32>
    %697 = math.tanh %696 : vector<8x20xf32>
    %698 = vector.extract_strided_slice %648 {offsets = [0, 384], sizes = [8, 20], strides = [1, 1]} : vector<8x512xf32> to vector<8x20xf32>
    %cst_234 = arith.constant 5.000000e-01 : f32
    %699 = vector.broadcast %cst_234 : f32 to vector<8x20xf32>
    %700 = arith.mulf %699, %698 : vector<8x20xf32>
    %701 = math.tanh %700 : vector<8x20xf32>
    %cst_235 = arith.constant 5.000000e-01 : f32
    %702 = vector.broadcast %cst_235 : f32 to vector<8x20xf32>
    %703 = arith.mulf %702, %701 : vector<8x20xf32>
    %cst_236 = arith.constant 5.000000e-01 : f32
    %704 = vector.broadcast %cst_236 : f32 to vector<8x20xf32>
    %705 = arith.addf %703, %704 : vector<8x20xf32>
    %706 = arith.mulf %695, %638 : vector<8x20xf32>
    %707 = arith.mulf %687, %697 : vector<8x20xf32>
    %708 = arith.addf %706, %707 : vector<8x20xf32>
    %709 = math.tanh %708 : vector<8x20xf32>
    %710 = arith.mulf %705, %709 : vector<8x20xf32>
    %c80_237 = arith.constant 80 : index
    %c0_238 = arith.constant 0 : index
    %711 = vector.load %arg9[%c80_237, %c0_238] : memref<120x1024xf32, #tpu.memory_space<vmem>>, vector<8x512xf32>
    %c32_239 = arith.constant 32 : index
    %c512_240 = arith.constant 512 : index
    %712 = vector.load %arg9[%c32_239, %c512_240] : memref<120x1024xf32, #tpu.memory_space<vmem>>, vector<8x512xf32>
    %713 = arith.truncf %679 : vector<8x20xf32> to vector<8x20xbf16>
    %cst_241 = arith.constant dense<0.000000e+00> : vector<8x512xf32>
    %714 = tpu.matmul %713, %8, %cst_241 {dimension_numbers = #tpu.dot_dimension_numbers<[1], [0], [0], [1], [0, 0, 1, 1], [], []>} : vector<8x20xbf16>, vector<20x512xbf16>, vector<8x512xf32> -> vector<8x512xf32>
    %715 = arith.addf %711, %714 : vector<8x512xf32>
    %716 = arith.truncf %710 : vector<8x20xf32> to vector<8x20xbf16>
    %cst_242 = arith.constant dense<0.000000e+00> : vector<8x512xf32>
    %717 = tpu.matmul %716, %9, %cst_242 {dimension_numbers = #tpu.dot_dimension_numbers<[1], [0], [0], [1], [0, 0, 1, 1], [], []>} : vector<8x20xbf16>, vector<20x512xbf16>, vector<8x512xf32> -> vector<8x512xf32>
    %718 = arith.addf %712, %717 : vector<8x512xf32>
    %719 = vector.extract_strided_slice %715 {offsets = [0, 0], sizes = [8, 20], strides = [1, 1]} : vector<8x512xf32> to vector<8x20xf32>
    %cst_243 = arith.constant 5.000000e-01 : f32
    %720 = vector.broadcast %cst_243 : f32 to vector<8x20xf32>
    %721 = arith.mulf %720, %719 : vector<8x20xf32>
    %722 = math.tanh %721 : vector<8x20xf32>
    %cst_244 = arith.constant 5.000000e-01 : f32
    %723 = vector.broadcast %cst_244 : f32 to vector<8x20xf32>
    %724 = arith.mulf %723, %722 : vector<8x20xf32>
    %cst_245 = arith.constant 5.000000e-01 : f32
    %725 = vector.broadcast %cst_245 : f32 to vector<8x20xf32>
    %726 = arith.addf %724, %725 : vector<8x20xf32>
    %727 = vector.extract_strided_slice %715 {offsets = [0, 128], sizes = [8, 20], strides = [1, 1]} : vector<8x512xf32> to vector<8x20xf32>
    %cst_246 = arith.constant 5.000000e-01 : f32
    %728 = vector.broadcast %cst_246 : f32 to vector<8x20xf32>
    %729 = arith.mulf %728, %727 : vector<8x20xf32>
    %730 = math.tanh %729 : vector<8x20xf32>
    %cst_247 = arith.constant 5.000000e-01 : f32
    %731 = vector.broadcast %cst_247 : f32 to vector<8x20xf32>
    %732 = arith.mulf %731, %730 : vector<8x20xf32>
    %cst_248 = arith.constant 5.000000e-01 : f32
    %733 = vector.broadcast %cst_248 : f32 to vector<8x20xf32>
    %734 = arith.addf %732, %733 : vector<8x20xf32>
    %735 = vector.extract_strided_slice %715 {offsets = [0, 256], sizes = [8, 20], strides = [1, 1]} : vector<8x512xf32> to vector<8x20xf32>
    %736 = math.tanh %735 : vector<8x20xf32>
    %737 = vector.extract_strided_slice %715 {offsets = [0, 384], sizes = [8, 20], strides = [1, 1]} : vector<8x512xf32> to vector<8x20xf32>
    %cst_249 = arith.constant 5.000000e-01 : f32
    %738 = vector.broadcast %cst_249 : f32 to vector<8x20xf32>
    %739 = arith.mulf %738, %737 : vector<8x20xf32>
    %740 = math.tanh %739 : vector<8x20xf32>
    %cst_250 = arith.constant 5.000000e-01 : f32
    %741 = vector.broadcast %cst_250 : f32 to vector<8x20xf32>
    %742 = arith.mulf %741, %740 : vector<8x20xf32>
    %cst_251 = arith.constant 5.000000e-01 : f32
    %743 = vector.broadcast %cst_251 : f32 to vector<8x20xf32>
    %744 = arith.addf %742, %743 : vector<8x20xf32>
    %745 = arith.mulf %734, %677 : vector<8x20xf32>
    %746 = arith.mulf %726, %736 : vector<8x20xf32>
    %747 = arith.addf %745, %746 : vector<8x20xf32>
    %748 = math.tanh %747 : vector<8x20xf32>
    %749 = arith.mulf %744, %748 : vector<8x20xf32>
    %750 = vector.extract_strided_slice %718 {offsets = [0, 0], sizes = [8, 20], strides = [1, 1]} : vector<8x512xf32> to vector<8x20xf32>
    %cst_252 = arith.constant 5.000000e-01 : f32
    %751 = vector.broadcast %cst_252 : f32 to vector<8x20xf32>
    %752 = arith.mulf %751, %750 : vector<8x20xf32>
    %753 = math.tanh %752 : vector<8x20xf32>
    %cst_253 = arith.constant 5.000000e-01 : f32
    %754 = vector.broadcast %cst_253 : f32 to vector<8x20xf32>
    %755 = arith.mulf %754, %753 : vector<8x20xf32>
    %cst_254 = arith.constant 5.000000e-01 : f32
    %756 = vector.broadcast %cst_254 : f32 to vector<8x20xf32>
    %757 = arith.addf %755, %756 : vector<8x20xf32>
    %758 = vector.extract_strided_slice %718 {offsets = [0, 128], sizes = [8, 20], strides = [1, 1]} : vector<8x512xf32> to vector<8x20xf32>
    %cst_255 = arith.constant 5.000000e-01 : f32
    %759 = vector.broadcast %cst_255 : f32 to vector<8x20xf32>
    %760 = arith.mulf %759, %758 : vector<8x20xf32>
    %761 = math.tanh %760 : vector<8x20xf32>
    %cst_256 = arith.constant 5.000000e-01 : f32
    %762 = vector.broadcast %cst_256 : f32 to vector<8x20xf32>
    %763 = arith.mulf %762, %761 : vector<8x20xf32>
    %cst_257 = arith.constant 5.000000e-01 : f32
    %764 = vector.broadcast %cst_257 : f32 to vector<8x20xf32>
    %765 = arith.addf %763, %764 : vector<8x20xf32>
    %766 = vector.extract_strided_slice %718 {offsets = [0, 256], sizes = [8, 20], strides = [1, 1]} : vector<8x512xf32> to vector<8x20xf32>
    %767 = math.tanh %766 : vector<8x20xf32>
    %768 = vector.extract_strided_slice %718 {offsets = [0, 384], sizes = [8, 20], strides = [1, 1]} : vector<8x512xf32> to vector<8x20xf32>
    %cst_258 = arith.constant 5.000000e-01 : f32
    %769 = vector.broadcast %cst_258 : f32 to vector<8x20xf32>
    %770 = arith.mulf %769, %768 : vector<8x20xf32>
    %771 = math.tanh %770 : vector<8x20xf32>
    %cst_259 = arith.constant 5.000000e-01 : f32
    %772 = vector.broadcast %cst_259 : f32 to vector<8x20xf32>
    %773 = arith.mulf %772, %771 : vector<8x20xf32>
    %cst_260 = arith.constant 5.000000e-01 : f32
    %774 = vector.broadcast %cst_260 : f32 to vector<8x20xf32>
    %775 = arith.addf %773, %774 : vector<8x20xf32>
    %776 = arith.mulf %765, %708 : vector<8x20xf32>
    %777 = arith.mulf %757, %767 : vector<8x20xf32>
    %778 = arith.addf %776, %777 : vector<8x20xf32>
    %779 = math.tanh %778 : vector<8x20xf32>
    %780 = arith.mulf %775, %779 : vector<8x20xf32>
    %c88_261 = arith.constant 88 : index
    %c0_262 = arith.constant 0 : index
    %781 = vector.load %arg9[%c88_261, %c0_262] : memref<120x1024xf32, #tpu.memory_space<vmem>>, vector<8x512xf32>
    %c24_263 = arith.constant 24 : index
    %c512_264 = arith.constant 512 : index
    %782 = vector.load %arg9[%c24_263, %c512_264] : memref<120x1024xf32, #tpu.memory_space<vmem>>, vector<8x512xf32>
    %783 = arith.truncf %749 : vector<8x20xf32> to vector<8x20xbf16>
    %cst_265 = arith.constant dense<0.000000e+00> : vector<8x512xf32>
    %784 = tpu.matmul %783, %8, %cst_265 {dimension_numbers = #tpu.dot_dimension_numbers<[1], [0], [0], [1], [0, 0, 1, 1], [], []>} : vector<8x20xbf16>, vector<20x512xbf16>, vector<8x512xf32> -> vector<8x512xf32>
    %785 = arith.addf %781, %784 : vector<8x512xf32>
    %786 = arith.truncf %780 : vector<8x20xf32> to vector<8x20xbf16>
    %cst_266 = arith.constant dense<0.000000e+00> : vector<8x512xf32>
    %787 = tpu.matmul %786, %9, %cst_266 {dimension_numbers = #tpu.dot_dimension_numbers<[1], [0], [0], [1], [0, 0, 1, 1], [], []>} : vector<8x20xbf16>, vector<20x512xbf16>, vector<8x512xf32> -> vector<8x512xf32>
    %788 = arith.addf %782, %787 : vector<8x512xf32>
    %789 = vector.extract_strided_slice %785 {offsets = [0, 0], sizes = [8, 20], strides = [1, 1]} : vector<8x512xf32> to vector<8x20xf32>
    %cst_267 = arith.constant 5.000000e-01 : f32
    %790 = vector.broadcast %cst_267 : f32 to vector<8x20xf32>
    %791 = arith.mulf %790, %789 : vector<8x20xf32>
    %792 = math.tanh %791 : vector<8x20xf32>
    %cst_268 = arith.constant 5.000000e-01 : f32
    %793 = vector.broadcast %cst_268 : f32 to vector<8x20xf32>
    %794 = arith.mulf %793, %792 : vector<8x20xf32>
    %cst_269 = arith.constant 5.000000e-01 : f32
    %795 = vector.broadcast %cst_269 : f32 to vector<8x20xf32>
    %796 = arith.addf %794, %795 : vector<8x20xf32>
    %797 = vector.extract_strided_slice %785 {offsets = [0, 128], sizes = [8, 20], strides = [1, 1]} : vector<8x512xf32> to vector<8x20xf32>
    %cst_270 = arith.constant 5.000000e-01 : f32
    %798 = vector.broadcast %cst_270 : f32 to vector<8x20xf32>
    %799 = arith.mulf %798, %797 : vector<8x20xf32>
    %800 = math.tanh %799 : vector<8x20xf32>
    %cst_271 = arith.constant 5.000000e-01 : f32
    %801 = vector.broadcast %cst_271 : f32 to vector<8x20xf32>
    %802 = arith.mulf %801, %800 : vector<8x20xf32>
    %cst_272 = arith.constant 5.000000e-01 : f32
    %803 = vector.broadcast %cst_272 : f32 to vector<8x20xf32>
    %804 = arith.addf %802, %803 : vector<8x20xf32>
    %805 = vector.extract_strided_slice %785 {offsets = [0, 256], sizes = [8, 20], strides = [1, 1]} : vector<8x512xf32> to vector<8x20xf32>
    %806 = math.tanh %805 : vector<8x20xf32>
    %807 = vector.extract_strided_slice %785 {offsets = [0, 384], sizes = [8, 20], strides = [1, 1]} : vector<8x512xf32> to vector<8x20xf32>
    %cst_273 = arith.constant 5.000000e-01 : f32
    %808 = vector.broadcast %cst_273 : f32 to vector<8x20xf32>
    %809 = arith.mulf %808, %807 : vector<8x20xf32>
    %810 = math.tanh %809 : vector<8x20xf32>
    %cst_274 = arith.constant 5.000000e-01 : f32
    %811 = vector.broadcast %cst_274 : f32 to vector<8x20xf32>
    %812 = arith.mulf %811, %810 : vector<8x20xf32>
    %cst_275 = arith.constant 5.000000e-01 : f32
    %813 = vector.broadcast %cst_275 : f32 to vector<8x20xf32>
    %814 = arith.addf %812, %813 : vector<8x20xf32>
    %815 = arith.mulf %804, %747 : vector<8x20xf32>
    %816 = arith.mulf %796, %806 : vector<8x20xf32>
    %817 = arith.addf %815, %816 : vector<8x20xf32>
    %818 = math.tanh %817 : vector<8x20xf32>
    %819 = arith.mulf %814, %818 : vector<8x20xf32>
    %820 = vector.extract_strided_slice %788 {offsets = [0, 0], sizes = [8, 20], strides = [1, 1]} : vector<8x512xf32> to vector<8x20xf32>
    %cst_276 = arith.constant 5.000000e-01 : f32
    %821 = vector.broadcast %cst_276 : f32 to vector<8x20xf32>
    %822 = arith.mulf %821, %820 : vector<8x20xf32>
    %823 = math.tanh %822 : vector<8x20xf32>
    %cst_277 = arith.constant 5.000000e-01 : f32
    %824 = vector.broadcast %cst_277 : f32 to vector<8x20xf32>
    %825 = arith.mulf %824, %823 : vector<8x20xf32>
    %cst_278 = arith.constant 5.000000e-01 : f32
    %826 = vector.broadcast %cst_278 : f32 to vector<8x20xf32>
    %827 = arith.addf %825, %826 : vector<8x20xf32>
    %828 = vector.extract_strided_slice %788 {offsets = [0, 128], sizes = [8, 20], strides = [1, 1]} : vector<8x512xf32> to vector<8x20xf32>
    %cst_279 = arith.constant 5.000000e-01 : f32
    %829 = vector.broadcast %cst_279 : f32 to vector<8x20xf32>
    %830 = arith.mulf %829, %828 : vector<8x20xf32>
    %831 = math.tanh %830 : vector<8x20xf32>
    %cst_280 = arith.constant 5.000000e-01 : f32
    %832 = vector.broadcast %cst_280 : f32 to vector<8x20xf32>
    %833 = arith.mulf %832, %831 : vector<8x20xf32>
    %cst_281 = arith.constant 5.000000e-01 : f32
    %834 = vector.broadcast %cst_281 : f32 to vector<8x20xf32>
    %835 = arith.addf %833, %834 : vector<8x20xf32>
    %836 = vector.extract_strided_slice %788 {offsets = [0, 256], sizes = [8, 20], strides = [1, 1]} : vector<8x512xf32> to vector<8x20xf32>
    %837 = math.tanh %836 : vector<8x20xf32>
    %838 = vector.extract_strided_slice %788 {offsets = [0, 384], sizes = [8, 20], strides = [1, 1]} : vector<8x512xf32> to vector<8x20xf32>
    %cst_282 = arith.constant 5.000000e-01 : f32
    %839 = vector.broadcast %cst_282 : f32 to vector<8x20xf32>
    %840 = arith.mulf %839, %838 : vector<8x20xf32>
    %841 = math.tanh %840 : vector<8x20xf32>
    %cst_283 = arith.constant 5.000000e-01 : f32
    %842 = vector.broadcast %cst_283 : f32 to vector<8x20xf32>
    %843 = arith.mulf %842, %841 : vector<8x20xf32>
    %cst_284 = arith.constant 5.000000e-01 : f32
    %844 = vector.broadcast %cst_284 : f32 to vector<8x20xf32>
    %845 = arith.addf %843, %844 : vector<8x20xf32>
    %846 = arith.mulf %835, %778 : vector<8x20xf32>
    %847 = arith.mulf %827, %837 : vector<8x20xf32>
    %848 = arith.addf %846, %847 : vector<8x20xf32>
    %849 = math.tanh %848 : vector<8x20xf32>
    %850 = arith.mulf %845, %849 : vector<8x20xf32>
    %c96_285 = arith.constant 96 : index
    %c0_286 = arith.constant 0 : index
    %851 = vector.load %arg9[%c96_285, %c0_286] : memref<120x1024xf32, #tpu.memory_space<vmem>>, vector<8x512xf32>
    %c16_287 = arith.constant 16 : index
    %c512_288 = arith.constant 512 : index
    %852 = vector.load %arg9[%c16_287, %c512_288] : memref<120x1024xf32, #tpu.memory_space<vmem>>, vector<8x512xf32>
    %853 = arith.truncf %819 : vector<8x20xf32> to vector<8x20xbf16>
    %cst_289 = arith.constant dense<0.000000e+00> : vector<8x512xf32>
    %854 = tpu.matmul %853, %8, %cst_289 {dimension_numbers = #tpu.dot_dimension_numbers<[1], [0], [0], [1], [0, 0, 1, 1], [], []>} : vector<8x20xbf16>, vector<20x512xbf16>, vector<8x512xf32> -> vector<8x512xf32>
    %855 = arith.addf %851, %854 : vector<8x512xf32>
    %856 = arith.truncf %850 : vector<8x20xf32> to vector<8x20xbf16>
    %cst_290 = arith.constant dense<0.000000e+00> : vector<8x512xf32>
    %857 = tpu.matmul %856, %9, %cst_290 {dimension_numbers = #tpu.dot_dimension_numbers<[1], [0], [0], [1], [0, 0, 1, 1], [], []>} : vector<8x20xbf16>, vector<20x512xbf16>, vector<8x512xf32> -> vector<8x512xf32>
    %858 = arith.addf %852, %857 : vector<8x512xf32>
    %859 = vector.extract_strided_slice %855 {offsets = [0, 0], sizes = [8, 20], strides = [1, 1]} : vector<8x512xf32> to vector<8x20xf32>
    %cst_291 = arith.constant 5.000000e-01 : f32
    %860 = vector.broadcast %cst_291 : f32 to vector<8x20xf32>
    %861 = arith.mulf %860, %859 : vector<8x20xf32>
    %862 = math.tanh %861 : vector<8x20xf32>
    %cst_292 = arith.constant 5.000000e-01 : f32
    %863 = vector.broadcast %cst_292 : f32 to vector<8x20xf32>
    %864 = arith.mulf %863, %862 : vector<8x20xf32>
    %cst_293 = arith.constant 5.000000e-01 : f32
    %865 = vector.broadcast %cst_293 : f32 to vector<8x20xf32>
    %866 = arith.addf %864, %865 : vector<8x20xf32>
    %867 = vector.extract_strided_slice %855 {offsets = [0, 128], sizes = [8, 20], strides = [1, 1]} : vector<8x512xf32> to vector<8x20xf32>
    %cst_294 = arith.constant 5.000000e-01 : f32
    %868 = vector.broadcast %cst_294 : f32 to vector<8x20xf32>
    %869 = arith.mulf %868, %867 : vector<8x20xf32>
    %870 = math.tanh %869 : vector<8x20xf32>
    %cst_295 = arith.constant 5.000000e-01 : f32
    %871 = vector.broadcast %cst_295 : f32 to vector<8x20xf32>
    %872 = arith.mulf %871, %870 : vector<8x20xf32>
    %cst_296 = arith.constant 5.000000e-01 : f32
    %873 = vector.broadcast %cst_296 : f32 to vector<8x20xf32>
    %874 = arith.addf %872, %873 : vector<8x20xf32>
    %875 = vector.extract_strided_slice %855 {offsets = [0, 256], sizes = [8, 20], strides = [1, 1]} : vector<8x512xf32> to vector<8x20xf32>
    %876 = math.tanh %875 : vector<8x20xf32>
    %877 = vector.extract_strided_slice %855 {offsets = [0, 384], sizes = [8, 20], strides = [1, 1]} : vector<8x512xf32> to vector<8x20xf32>
    %cst_297 = arith.constant 5.000000e-01 : f32
    %878 = vector.broadcast %cst_297 : f32 to vector<8x20xf32>
    %879 = arith.mulf %878, %877 : vector<8x20xf32>
    %880 = math.tanh %879 : vector<8x20xf32>
    %cst_298 = arith.constant 5.000000e-01 : f32
    %881 = vector.broadcast %cst_298 : f32 to vector<8x20xf32>
    %882 = arith.mulf %881, %880 : vector<8x20xf32>
    %cst_299 = arith.constant 5.000000e-01 : f32
    %883 = vector.broadcast %cst_299 : f32 to vector<8x20xf32>
    %884 = arith.addf %882, %883 : vector<8x20xf32>
    %885 = arith.mulf %874, %817 : vector<8x20xf32>
    %886 = arith.mulf %866, %876 : vector<8x20xf32>
    %887 = arith.addf %885, %886 : vector<8x20xf32>
    %888 = math.tanh %887 : vector<8x20xf32>
    %889 = arith.mulf %884, %888 : vector<8x20xf32>
    %890 = vector.extract_strided_slice %858 {offsets = [0, 0], sizes = [8, 20], strides = [1, 1]} : vector<8x512xf32> to vector<8x20xf32>
    %cst_300 = arith.constant 5.000000e-01 : f32
    %891 = vector.broadcast %cst_300 : f32 to vector<8x20xf32>
    %892 = arith.mulf %891, %890 : vector<8x20xf32>
    %893 = math.tanh %892 : vector<8x20xf32>
    %cst_301 = arith.constant 5.000000e-01 : f32
    %894 = vector.broadcast %cst_301 : f32 to vector<8x20xf32>
    %895 = arith.mulf %894, %893 : vector<8x20xf32>
    %cst_302 = arith.constant 5.000000e-01 : f32
    %896 = vector.broadcast %cst_302 : f32 to vector<8x20xf32>
    %897 = arith.addf %895, %896 : vector<8x20xf32>
    %898 = vector.extract_strided_slice %858 {offsets = [0, 128], sizes = [8, 20], strides = [1, 1]} : vector<8x512xf32> to vector<8x20xf32>
    %cst_303 = arith.constant 5.000000e-01 : f32
    %899 = vector.broadcast %cst_303 : f32 to vector<8x20xf32>
    %900 = arith.mulf %899, %898 : vector<8x20xf32>
    %901 = math.tanh %900 : vector<8x20xf32>
    %cst_304 = arith.constant 5.000000e-01 : f32
    %902 = vector.broadcast %cst_304 : f32 to vector<8x20xf32>
    %903 = arith.mulf %902, %901 : vector<8x20xf32>
    %cst_305 = arith.constant 5.000000e-01 : f32
    %904 = vector.broadcast %cst_305 : f32 to vector<8x20xf32>
    %905 = arith.addf %903, %904 : vector<8x20xf32>
    %906 = vector.extract_strided_slice %858 {offsets = [0, 256], sizes = [8, 20], strides = [1, 1]} : vector<8x512xf32> to vector<8x20xf32>
    %907 = math.tanh %906 : vector<8x20xf32>
    %908 = vector.extract_strided_slice %858 {offsets = [0, 384], sizes = [8, 20], strides = [1, 1]} : vector<8x512xf32> to vector<8x20xf32>
    %cst_306 = arith.constant 5.000000e-01 : f32
    %909 = vector.broadcast %cst_306 : f32 to vector<8x20xf32>
    %910 = arith.mulf %909, %908 : vector<8x20xf32>
    %911 = math.tanh %910 : vector<8x20xf32>
    %cst_307 = arith.constant 5.000000e-01 : f32
    %912 = vector.broadcast %cst_307 : f32 to vector<8x20xf32>
    %913 = arith.mulf %912, %911 : vector<8x20xf32>
    %cst_308 = arith.constant 5.000000e-01 : f32
    %914 = vector.broadcast %cst_308 : f32 to vector<8x20xf32>
    %915 = arith.addf %913, %914 : vector<8x20xf32>
    %916 = arith.mulf %905, %848 : vector<8x20xf32>
    %917 = arith.mulf %897, %907 : vector<8x20xf32>
    %918 = arith.addf %916, %917 : vector<8x20xf32>
    %919 = math.tanh %918 : vector<8x20xf32>
    %920 = arith.mulf %915, %919 : vector<8x20xf32>
    %c104_309 = arith.constant 104 : index
    %c0_310 = arith.constant 0 : index
    %921 = vector.load %arg9[%c104_309, %c0_310] : memref<120x1024xf32, #tpu.memory_space<vmem>>, vector<8x512xf32>
    %c8_311 = arith.constant 8 : index
    %c512_312 = arith.constant 512 : index
    %922 = vector.load %arg9[%c8_311, %c512_312] : memref<120x1024xf32, #tpu.memory_space<vmem>>, vector<8x512xf32>
    %923 = arith.truncf %889 : vector<8x20xf32> to vector<8x20xbf16>
    %cst_313 = arith.constant dense<0.000000e+00> : vector<8x512xf32>
    %924 = tpu.matmul %923, %8, %cst_313 {dimension_numbers = #tpu.dot_dimension_numbers<[1], [0], [0], [1], [0, 0, 1, 1], [], []>} : vector<8x20xbf16>, vector<20x512xbf16>, vector<8x512xf32> -> vector<8x512xf32>
    %925 = arith.addf %921, %924 : vector<8x512xf32>
    %926 = arith.truncf %920 : vector<8x20xf32> to vector<8x20xbf16>
    %cst_314 = arith.constant dense<0.000000e+00> : vector<8x512xf32>
    %927 = tpu.matmul %926, %9, %cst_314 {dimension_numbers = #tpu.dot_dimension_numbers<[1], [0], [0], [1], [0, 0, 1, 1], [], []>} : vector<8x20xbf16>, vector<20x512xbf16>, vector<8x512xf32> -> vector<8x512xf32>
    %928 = arith.addf %922, %927 : vector<8x512xf32>
    %929 = vector.extract_strided_slice %925 {offsets = [0, 0], sizes = [8, 20], strides = [1, 1]} : vector<8x512xf32> to vector<8x20xf32>
    %cst_315 = arith.constant 5.000000e-01 : f32
    %930 = vector.broadcast %cst_315 : f32 to vector<8x20xf32>
    %931 = arith.mulf %930, %929 : vector<8x20xf32>
    %932 = math.tanh %931 : vector<8x20xf32>
    %cst_316 = arith.constant 5.000000e-01 : f32
    %933 = vector.broadcast %cst_316 : f32 to vector<8x20xf32>
    %934 = arith.mulf %933, %932 : vector<8x20xf32>
    %cst_317 = arith.constant 5.000000e-01 : f32
    %935 = vector.broadcast %cst_317 : f32 to vector<8x20xf32>
    %936 = arith.addf %934, %935 : vector<8x20xf32>
    %937 = vector.extract_strided_slice %925 {offsets = [0, 128], sizes = [8, 20], strides = [1, 1]} : vector<8x512xf32> to vector<8x20xf32>
    %cst_318 = arith.constant 5.000000e-01 : f32
    %938 = vector.broadcast %cst_318 : f32 to vector<8x20xf32>
    %939 = arith.mulf %938, %937 : vector<8x20xf32>
    %940 = math.tanh %939 : vector<8x20xf32>
    %cst_319 = arith.constant 5.000000e-01 : f32
    %941 = vector.broadcast %cst_319 : f32 to vector<8x20xf32>
    %942 = arith.mulf %941, %940 : vector<8x20xf32>
    %cst_320 = arith.constant 5.000000e-01 : f32
    %943 = vector.broadcast %cst_320 : f32 to vector<8x20xf32>
    %944 = arith.addf %942, %943 : vector<8x20xf32>
    %945 = vector.extract_strided_slice %925 {offsets = [0, 256], sizes = [8, 20], strides = [1, 1]} : vector<8x512xf32> to vector<8x20xf32>
    %946 = math.tanh %945 : vector<8x20xf32>
    %947 = vector.extract_strided_slice %925 {offsets = [0, 384], sizes = [8, 20], strides = [1, 1]} : vector<8x512xf32> to vector<8x20xf32>
    %cst_321 = arith.constant 5.000000e-01 : f32
    %948 = vector.broadcast %cst_321 : f32 to vector<8x20xf32>
    %949 = arith.mulf %948, %947 : vector<8x20xf32>
    %950 = math.tanh %949 : vector<8x20xf32>
    %cst_322 = arith.constant 5.000000e-01 : f32
    %951 = vector.broadcast %cst_322 : f32 to vector<8x20xf32>
    %952 = arith.mulf %951, %950 : vector<8x20xf32>
    %cst_323 = arith.constant 5.000000e-01 : f32
    %953 = vector.broadcast %cst_323 : f32 to vector<8x20xf32>
    %954 = arith.addf %952, %953 : vector<8x20xf32>
    %955 = arith.mulf %944, %887 : vector<8x20xf32>
    %956 = arith.mulf %936, %946 : vector<8x20xf32>
    %957 = arith.addf %955, %956 : vector<8x20xf32>
    %958 = math.tanh %957 : vector<8x20xf32>
    %959 = arith.mulf %954, %958 : vector<8x20xf32>
    %960 = vector.extract_strided_slice %928 {offsets = [0, 0], sizes = [8, 20], strides = [1, 1]} : vector<8x512xf32> to vector<8x20xf32>
    %cst_324 = arith.constant 5.000000e-01 : f32
    %961 = vector.broadcast %cst_324 : f32 to vector<8x20xf32>
    %962 = arith.mulf %961, %960 : vector<8x20xf32>
    %963 = math.tanh %962 : vector<8x20xf32>
    %cst_325 = arith.constant 5.000000e-01 : f32
    %964 = vector.broadcast %cst_325 : f32 to vector<8x20xf32>
    %965 = arith.mulf %964, %963 : vector<8x20xf32>
    %cst_326 = arith.constant 5.000000e-01 : f32
    %966 = vector.broadcast %cst_326 : f32 to vector<8x20xf32>
    %967 = arith.addf %965, %966 : vector<8x20xf32>
    %968 = vector.extract_strided_slice %928 {offsets = [0, 128], sizes = [8, 20], strides = [1, 1]} : vector<8x512xf32> to vector<8x20xf32>
    %cst_327 = arith.constant 5.000000e-01 : f32
    %969 = vector.broadcast %cst_327 : f32 to vector<8x20xf32>
    %970 = arith.mulf %969, %968 : vector<8x20xf32>
    %971 = math.tanh %970 : vector<8x20xf32>
    %cst_328 = arith.constant 5.000000e-01 : f32
    %972 = vector.broadcast %cst_328 : f32 to vector<8x20xf32>
    %973 = arith.mulf %972, %971 : vector<8x20xf32>
    %cst_329 = arith.constant 5.000000e-01 : f32
    %974 = vector.broadcast %cst_329 : f32 to vector<8x20xf32>
    %975 = arith.addf %973, %974 : vector<8x20xf32>
    %976 = vector.extract_strided_slice %928 {offsets = [0, 256], sizes = [8, 20], strides = [1, 1]} : vector<8x512xf32> to vector<8x20xf32>
    %977 = math.tanh %976 : vector<8x20xf32>
    %978 = vector.extract_strided_slice %928 {offsets = [0, 384], sizes = [8, 20], strides = [1, 1]} : vector<8x512xf32> to vector<8x20xf32>
    %cst_330 = arith.constant 5.000000e-01 : f32
    %979 = vector.broadcast %cst_330 : f32 to vector<8x20xf32>
    %980 = arith.mulf %979, %978 : vector<8x20xf32>
    %981 = math.tanh %980 : vector<8x20xf32>
    %cst_331 = arith.constant 5.000000e-01 : f32
    %982 = vector.broadcast %cst_331 : f32 to vector<8x20xf32>
    %983 = arith.mulf %982, %981 : vector<8x20xf32>
    %cst_332 = arith.constant 5.000000e-01 : f32
    %984 = vector.broadcast %cst_332 : f32 to vector<8x20xf32>
    %985 = arith.addf %983, %984 : vector<8x20xf32>
    %986 = arith.mulf %975, %918 : vector<8x20xf32>
    %987 = arith.mulf %967, %977 : vector<8x20xf32>
    %988 = arith.addf %986, %987 : vector<8x20xf32>
    %989 = math.tanh %988 : vector<8x20xf32>
    %990 = arith.mulf %985, %989 : vector<8x20xf32>
    %c112_333 = arith.constant 112 : index
    %c0_334 = arith.constant 0 : index
    %991 = vector.load %arg9[%c112_333, %c0_334] : memref<120x1024xf32, #tpu.memory_space<vmem>>, vector<8x512xf32>
    %c0_335 = arith.constant 0 : index
    %c512_336 = arith.constant 512 : index
    %992 = vector.load %arg9[%c0_335, %c512_336] : memref<120x1024xf32, #tpu.memory_space<vmem>>, vector<8x512xf32>
    %993 = arith.truncf %959 : vector<8x20xf32> to vector<8x20xbf16>
    %cst_337 = arith.constant dense<0.000000e+00> : vector<8x512xf32>
    %994 = tpu.matmul %993, %8, %cst_337 {dimension_numbers = #tpu.dot_dimension_numbers<[1], [0], [0], [1], [0, 0, 1, 1], [], []>} : vector<8x20xbf16>, vector<20x512xbf16>, vector<8x512xf32> -> vector<8x512xf32>
    %995 = arith.addf %991, %994 : vector<8x512xf32>
    %996 = arith.truncf %990 : vector<8x20xf32> to vector<8x20xbf16>
    %cst_338 = arith.constant dense<0.000000e+00> : vector<8x512xf32>
    %997 = tpu.matmul %996, %9, %cst_338 {dimension_numbers = #tpu.dot_dimension_numbers<[1], [0], [0], [1], [0, 0, 1, 1], [], []>} : vector<8x20xbf16>, vector<20x512xbf16>, vector<8x512xf32> -> vector<8x512xf32>
    %998 = arith.addf %992, %997 : vector<8x512xf32>
    %999 = vector.extract_strided_slice %995 {offsets = [0, 0], sizes = [8, 20], strides = [1, 1]} : vector<8x512xf32> to vector<8x20xf32>
    %cst_339 = arith.constant 5.000000e-01 : f32
    %1000 = vector.broadcast %cst_339 : f32 to vector<8x20xf32>
    %1001 = arith.mulf %1000, %999 : vector<8x20xf32>
    %1002 = math.tanh %1001 : vector<8x20xf32>
    %cst_340 = arith.constant 5.000000e-01 : f32
    %1003 = vector.broadcast %cst_340 : f32 to vector<8x20xf32>
    %1004 = arith.mulf %1003, %1002 : vector<8x20xf32>
    %cst_341 = arith.constant 5.000000e-01 : f32
    %1005 = vector.broadcast %cst_341 : f32 to vector<8x20xf32>
    %1006 = arith.addf %1004, %1005 : vector<8x20xf32>
    %1007 = vector.extract_strided_slice %995 {offsets = [0, 128], sizes = [8, 20], strides = [1, 1]} : vector<8x512xf32> to vector<8x20xf32>
    %cst_342 = arith.constant 5.000000e-01 : f32
    %1008 = vector.broadcast %cst_342 : f32 to vector<8x20xf32>
    %1009 = arith.mulf %1008, %1007 : vector<8x20xf32>
    %1010 = math.tanh %1009 : vector<8x20xf32>
    %cst_343 = arith.constant 5.000000e-01 : f32
    %1011 = vector.broadcast %cst_343 : f32 to vector<8x20xf32>
    %1012 = arith.mulf %1011, %1010 : vector<8x20xf32>
    %cst_344 = arith.constant 5.000000e-01 : f32
    %1013 = vector.broadcast %cst_344 : f32 to vector<8x20xf32>
    %1014 = arith.addf %1012, %1013 : vector<8x20xf32>
    %1015 = vector.extract_strided_slice %995 {offsets = [0, 256], sizes = [8, 20], strides = [1, 1]} : vector<8x512xf32> to vector<8x20xf32>
    %1016 = math.tanh %1015 : vector<8x20xf32>
    %1017 = vector.extract_strided_slice %995 {offsets = [0, 384], sizes = [8, 20], strides = [1, 1]} : vector<8x512xf32> to vector<8x20xf32>
    %cst_345 = arith.constant 5.000000e-01 : f32
    %1018 = vector.broadcast %cst_345 : f32 to vector<8x20xf32>
    %1019 = arith.mulf %1018, %1017 : vector<8x20xf32>
    %1020 = math.tanh %1019 : vector<8x20xf32>
    %cst_346 = arith.constant 5.000000e-01 : f32
    %1021 = vector.broadcast %cst_346 : f32 to vector<8x20xf32>
    %1022 = arith.mulf %1021, %1020 : vector<8x20xf32>
    %cst_347 = arith.constant 5.000000e-01 : f32
    %1023 = vector.broadcast %cst_347 : f32 to vector<8x20xf32>
    %1024 = arith.addf %1022, %1023 : vector<8x20xf32>
    %1025 = arith.mulf %1014, %957 : vector<8x20xf32>
    %1026 = arith.mulf %1006, %1016 : vector<8x20xf32>
    %1027 = arith.addf %1025, %1026 : vector<8x20xf32>
    %1028 = math.tanh %1027 : vector<8x20xf32>
    %1029 = arith.mulf %1024, %1028 : vector<8x20xf32>
    %1030 = vector.extract_strided_slice %998 {offsets = [0, 0], sizes = [8, 20], strides = [1, 1]} : vector<8x512xf32> to vector<8x20xf32>
    %cst_348 = arith.constant 5.000000e-01 : f32
    %1031 = vector.broadcast %cst_348 : f32 to vector<8x20xf32>
    %1032 = arith.mulf %1031, %1030 : vector<8x20xf32>
    %1033 = math.tanh %1032 : vector<8x20xf32>
    %cst_349 = arith.constant 5.000000e-01 : f32
    %1034 = vector.broadcast %cst_349 : f32 to vector<8x20xf32>
    %1035 = arith.mulf %1034, %1033 : vector<8x20xf32>
    %cst_350 = arith.constant 5.000000e-01 : f32
    %1036 = vector.broadcast %cst_350 : f32 to vector<8x20xf32>
    %1037 = arith.addf %1035, %1036 : vector<8x20xf32>
    %1038 = vector.extract_strided_slice %998 {offsets = [0, 128], sizes = [8, 20], strides = [1, 1]} : vector<8x512xf32> to vector<8x20xf32>
    %cst_351 = arith.constant 5.000000e-01 : f32
    %1039 = vector.broadcast %cst_351 : f32 to vector<8x20xf32>
    %1040 = arith.mulf %1039, %1038 : vector<8x20xf32>
    %1041 = math.tanh %1040 : vector<8x20xf32>
    %cst_352 = arith.constant 5.000000e-01 : f32
    %1042 = vector.broadcast %cst_352 : f32 to vector<8x20xf32>
    %1043 = arith.mulf %1042, %1041 : vector<8x20xf32>
    %cst_353 = arith.constant 5.000000e-01 : f32
    %1044 = vector.broadcast %cst_353 : f32 to vector<8x20xf32>
    %1045 = arith.addf %1043, %1044 : vector<8x20xf32>
    %1046 = vector.extract_strided_slice %998 {offsets = [0, 256], sizes = [8, 20], strides = [1, 1]} : vector<8x512xf32> to vector<8x20xf32>
    %1047 = math.tanh %1046 : vector<8x20xf32>
    %1048 = vector.extract_strided_slice %998 {offsets = [0, 384], sizes = [8, 20], strides = [1, 1]} : vector<8x512xf32> to vector<8x20xf32>
    %cst_354 = arith.constant 5.000000e-01 : f32
    %1049 = vector.broadcast %cst_354 : f32 to vector<8x20xf32>
    %1050 = arith.mulf %1049, %1048 : vector<8x20xf32>
    %1051 = math.tanh %1050 : vector<8x20xf32>
    %cst_355 = arith.constant 5.000000e-01 : f32
    %1052 = vector.broadcast %cst_355 : f32 to vector<8x20xf32>
    %1053 = arith.mulf %1052, %1051 : vector<8x20xf32>
    %cst_356 = arith.constant 5.000000e-01 : f32
    %1054 = vector.broadcast %cst_356 : f32 to vector<8x20xf32>
    %1055 = arith.addf %1053, %1054 : vector<8x20xf32>
    %1056 = arith.mulf %1045, %988 : vector<8x20xf32>
    %1057 = arith.mulf %1037, %1047 : vector<8x20xf32>
    %1058 = arith.addf %1056, %1057 : vector<8x20xf32>
    %1059 = math.tanh %1058 : vector<8x20xf32>
    %1060 = arith.mulf %1055, %1059 : vector<8x20xf32>
    %c0_357 = arith.constant 0 : index
    %c0_358 = arith.constant 0 : index
    %1061 = vector.load %arg5[%c0_357, %c0_358] : memref<20x5xf32, #tpu.memory_space<vmem>>, vector<20x5xf32>
    %cst_359 = arith.constant dense<0.000000e+00> : vector<8x5xf32>
    %1062 = tpu.matmul %1029, %1061, %cst_359 {dimension_numbers = #tpu.dot_dimension_numbers<[1], [0], [0], [1], [0, 0, 1, 1], [], []>} : vector<8x20xf32>, vector<20x5xf32>, vector<8x5xf32> -> vector<8x5xf32>
    %c0_360 = arith.constant 0 : index
    %c0_361 = arith.constant 0 : index
    %1063 = vector.load %arg6[%c0_360, %c0_361] : memref<20x5xf32, #tpu.memory_space<vmem>>, vector<20x5xf32>
    %cst_362 = arith.constant dense<0.000000e+00> : vector<8x5xf32>
    %1064 = tpu.matmul %1060, %1063, %cst_362 {dimension_numbers = #tpu.dot_dimension_numbers<[1], [0], [0], [1], [0, 0, 1, 1], [], []>} : vector<8x20xf32>, vector<20x5xf32>, vector<8x5xf32> -> vector<8x5xf32>
    %1065 = arith.addf %1062, %1064 : vector<8x5xf32>
    %c0_363 = arith.constant 0 : index
    %c0_364 = arith.constant 0 : index
    %1066 = vector.load %arg7[%c0_363, %c0_364] : memref<1x5xf32, #tpu.memory_space<vmem>>, vector<1x5xf32>
    %1067 = vector.broadcast %1066 : vector<1x5xf32> to vector<8x5xf32>
    %1068 = arith.addf %1065, %1067 : vector<8x5xf32>
    %1069 = vector.extract_strided_slice %1068 {offsets = [0, 0], sizes = [3, 5], strides = [1, 1]} : vector<8x5xf32> to vector<3x5xf32>
    %c0_365 = arith.constant 0 : index
    %c0_366 = arith.constant 0 : index
    %1070 = vector.load %arg8[%c0_365, %c0_366] : memref<3x5xf32, #tpu.memory_space<vmem>>, vector<3x5xf32>
    tpu.vector_store %arg8[%c0_365, %c0_366], %1069 {strides = array<i32>} : memref<3x5xf32, #tpu.memory_space<vmem>>, vector<3x5xf32>,
    return
  }
}

</mosaic_0001>

<bundles_post_ra>
// kernel: bidirectional_rnn_pallas.1
= control target key start
LH: loop header
LB: loop body
LE: loop exit
PB: predicated region body
PF: predicated region fallthrough
CT: control target
= control target key end

     0   :  { %vm161_vm0 = vcmask 1044480   ;;  %v6430_v6 = vmov 0   ;;  %vm136_vm1 = vcmask 80896   ;;  %s6421_s0 = inlined_call_operand.vmem [shape: f32[120,10], index: 0, kind: input, shape index: {}]   ;;  %s6422_s1 = inlined_call_operand.vmem [shape: bf16[10,1024], index: 1, kind: input, shape index: {}]   ;;  %s6423_s2 = inlined_call_operand.vmem [shape: f32[1,1024], index: 2, kind: input, shape index: {}]   ;;  %s6424_s3 = inlined_call_operand.vmem [shape: bf16[20,512], index: 3, kind: input, shape index: {}]   ;;  %s6425_s4 = inlined_call_operand.vmem [shape: bf16[20,512], index: 4, kind: input, shape index: {}]   ;;  %s6426_s5 = inlined_call_operand.vmem [shape: f32[20,5], index: 5, kind: input, shape index: {}]   ;;  %s6427_s6 = inlined_call_operand.vmem [shape: f32[20,5], index: 6, kind: input, shape index: {}]   ;;  %s6428_s7 = inlined_call_operand.vmem [shape: f32[1,5], index: 7, kind: input, shape index: {}]   ;;  %s6429_s8 = inlined_call_operand.hbm [shape: f32[3,5], index: 8, kind: output, shape index: {}]  }
   0x1   :  { %v54_v0 = vld [vmem:[%s6422_s1] sm:$0xff]  ;;  %v55_v2 = vld [vmem:[%s6422_s1 + $0x8] sm:$0xff]  ;;  %218 = vmatprep.mubr.bf16.mxu0 %v6430_v6  ;;  %329 = vmatprep.mubr.bf16.mxu1 %v6430_v6  ;;  %v56_v11 = vld [vmem:[%s6422_s1 + $0x10] sm:$0xff] }
   0x2   :  { %v58_v1 = vld [vmem:[%s6422_s1 + $0x20] sm:$0x11]  ;;  %v59_v4 = vld [vmem:[%s6422_s1 + $0x28] sm:$0x11]  ;;  %v60_v12 = vld [vmem:[%s6422_s1 + $0x30] sm:$0x11] }
   0x3   :  { %v4387_v3 = vcombine.high %v54_v0, %v58_v1  ;;  %v4386_v5 = vcombine.low %v54_v0, %v58_v1  ;;  %v31_v7 = vld [vmem:[%s6421_s0] sm:$0xff]  ;;  %v32_v8 = vld [vmem:[%s6421_s0 + $0x8] sm:$0xff]  ;;  %v4389_v9 = vcombine.high %v55_v2, %v59_v4  ;;  %v4388_v10 = vcombine.low %v55_v2, %v59_v4  ;;  %v57_v13 = vld [vmem:[%s6422_s1 + $0x18] sm:$0xff] }
   0x4   :  { %v5075_v15 = vpack.c.bf16 %v32_v8, %v31_v7  ;;  %v4391_v16 = vcombine.high %v56_v11, %v60_v12  ;;  %v4390_v17 = vcombine.low %v56_v11, %v60_v12  ;;  %v61_v18 = vld [vmem:[%s6422_s1 + $0x38] sm:$0x11]  ;;  %v33_v23 = vld [vmem:[%s6421_s0 + $0x10] sm:$0xff] }
   0x5   :  { %4394 = vmatprep.subr.msk.bf16.mxu0 %vm161_vm0, %v4387_v3  ;;  %v163_v14 = vsel %vm161_vm0, %v4386_v5, 0  ;;  %4403 = vmatprep.subr.msk.bf16.mxu1 %vm161_vm0, %v4389_v9  ;;  %v169_v19 = vsel %vm161_vm0, %v4388_v10, 0  ;;  %v4393_v20 = vcombine.high %v57_v13, %v61_v18  ;;  %v4392_v21 = vcombine.low %v57_v13, %v61_v18  ;;  %v34_v25 = vld [vmem:[%s6421_s0 + $0x18] sm:$0xff]  ;;  %v5099_v26 = vld [vmem:[%s6424_s3 + $0x4] ss:$16 sps:$4 sm:$0xff]  }
   0x6   :  { %187 = vmatpush1.bf16.msra.mxu0 %v163_v14  ;;  %298 = vmatpush1.bf16.msra.mxu1 %v169_v19  ;;  %v175_v22 = vsel %vm161_vm0, %v4390_v17, 0  ;;  %v5106_v27 = vld [vmem:[%s6424_s3 + $0xc] ss:$16 sps:$4 sm:$0xff]   ;;  %v5109_v28 = vpack.c.bf16 %v34_v25, %v33_v23 }
   0x7   :  { %4412 = vmatprep.subr.msk.bf16.mxu0 %vm161_vm0, %v4391_v16  ;;  %4421 = vmatprep.subr.msk.bf16.mxu1 %vm161_vm0, %v4393_v20  ;;  %v181_v24 = vsel %vm161_vm0, %v4392_v21, 0 }
   0x9   :  { %4395 = vmatmul.mubr.msk.bf16.vlgmr.msra.gmra.mrb[0].mxu0 %vm136_vm1, %v5075_v15  ;;  %4404 = vmatmul.mubr.msk.bf16.vlgmr.msra.gmra.mrb[0].mxu1 %vm136_vm1, %v5075_v15 }
   0xa   :  { %409 = vmatpush1.bf16.msra.mxu0 %v175_v22  ;;  %228 = vmatprep.mubr.bf16.mxu0 %v6430_v6 }
   0xb   :  { %339 = vmatprep.mubr.bf16.mxu1 %v6430_v6  ;;  %520 = vmatpush1.bf16.msra.mxu1 %v181_v24 }
   0xc   :  { %817 = vmatprep.subr.bf16.mxu0 %v5099_v26  ;;  %858 = vmatprep.subr.bf16.mxu1 %v5106_v27 }
   0xd   :  { %13 = vsyncpa [#allocation4], 0  ;;  %v35_v29 = vld [vmem:[%s6421_s0 + $0x20] sm:$0xff]  ;;  %v36_v30 = vld [vmem:[%s6421_s0 + $0x28] sm:$0xff]  ;;  %vm804_vm2 = vcmask 1041408   ;;  %vm800_vm3 = vcmask 162816  }
   0xe   :  { %v5124_v31 = vpack.c.bf16 %v36_v30, %v35_v29  ;;  %v37_v32 = vld [vmem:[%s6421_s0 + $0x30] sm:$0xff]  ;;  %v38_v33 = vld [vmem:[%s6421_s0 + $0x38] sm:$0xff]  ;;  %v39_v35 = vld [vmem:[%s6421_s0 + $0x40] sm:$0xff]  ;;  %vm4212_vm4 = vcmask 1043456   ;;  %vm4997_vm5 = vmmov 0   ;;  %s4998_s10 = smov [#allocation3]  }
   0xf   :  { %v5138_v34 = vpack.c.bf16 %v38_v33, %v37_v32  ;;  %v40_v36 = vld [vmem:[%s6421_s0 + $0x48] sm:$0xff]  ;;  %v41_v38 = vld [vmem:[%s6421_s0 + $0x50] sm:$0xff]  ;;  %v42_v39 = vld [vmem:[%s6421_s0 + $0x58] sm:$0xff]  ;;  %s4378_s11 = sshll.u32 %s4998_s10, 4  ;;  %vm4370_vm6 = vcmask 34816   ;;  %s4379_s11 = int_to_ptr.vmem [resolvable:$true] %s4378_s11 }
  0x10   :  { %v5152_v37 = vpack.c.bf16 %v40_v36, %v39_v35  ;;  %v51_v40 = vpack.c.bf16 %v42_v39, %v41_v38  ;;  %v43_v41 = vld [vmem:[%s6421_s0 + $0x60] sm:$0xff]  ;;  %v44_v42 = vld [vmem:[%s6421_s0 + $0x68] sm:$0xff]  ;;  %v45_v44 = vld [vmem:[%s6421_s0 + $0x70] sm:$0xff]  ;;  %s4970_s12 = scalar_lea.vmem %s4379_s11, 64  ;;  %p4975_p1 = scmp.lt.s32.totalorder %s4379_s11, %s4379_s11 }
  0x11   :  { %4396 = vmatmul.mubr.msk.bf16.gmra.mrb[4].mxu0 %vm136_vm1, %v5109_v28  ;;  %4405 = vmatmul.mubr.msk.bf16.gmra.mrb[4].mxu1 %vm136_vm1, %v5109_v28  ;;  %v52_v43 = vpack.c.bf16 %v44_v42, %v43_v41  ;;  %v53_v45 = vpack.c.bf16 %v45_v44, %v45_v44  ;;  %v754_v46 = vld [vmem:[%s6424_s3 + $0x20] sm:$0x33]  ;;  %v755_v48 = vld [vmem:[%s6424_s3 + $0x28] sm:$0x33]  ;;  %p4971_p0 = scmp.ne.s32.totalorder %s4379_s11, %s4970_s12  ;;  %p4976_p2 = scmp.lt.s32.totalorder %s4970_s12, %s4970_s12 }
  0x12   :  { %238 = vmatprep.mubr.bf16.mxu0 %v6430_v6  ;;  %349 = vmatprep.mubr.bf16.mxu1 %v6430_v6  ;;  %v5193_v47 = vld [vmem:[%s6424_s3] ss:$16 sps:$4 sm:$0xff]   ;;  %v4434_v49 = vcombine.low %v754_v46, %v754_v46  ;;  %v5201_v50 = vld [vmem:[%s6424_s3 + $0x8] ss:$16 sps:$4 sm:$0xff]   ;;  %v5203_v51 = vcombine.high %v754_v46, %v754_v46  ;;  %v5207_v52 = vcombine.high %v755_v48, %v755_v48  ;;  %v5220_v55 = vld [vmem:[%s6425_s4 + $0x4] ss:$16 sps:$4 sm:$0xff]  }
  0x13   :  { %v4436_v53 = vcombine.low %v755_v48, %v755_v48  ;;  %v5233_v57 = vld [vmem:[%s6425_s4 + $0xc] ss:$16 sps:$4 sm:$0xff]   ;;  %v760_v58 = vld [vmem:[%s6425_s4 + $0x20] sm:$0x33]  ;;  %v5289_v61 = vld [vmem:[%s6425_s4 + $0x8] ss:$16 sps:$4 sm:$0xff]   ;;  %p4977_p3 = por %p4976_p2, %p4975_p1 }
  0x14   :  { %v5215_v54 = vsel %vm804_vm2, %v4434_v49, 0  ;;  %v761_v59 = vld [vmem:[%s6425_s4 + $0x28] sm:$0x33]  ;;  %v5284_v60 = vld [vmem:[%s6425_s4] ss:$16 sps:$4 sm:$0xff]   ;;  %v5291_v62 = vcombine.high %v760_v58, %v760_v58  ;;  %v4444_v63 = vcombine.low %v760_v58, %v760_v58 }
  0x15   :  { %v5228_v56 = vsel %vm804_vm2, %v4436_v53, 0  ;;  %v5293_v0 = vcombine.high %v761_v59, %v761_v59  ;;  %v4446_v1 = vcombine.low %v761_v59, %v761_v59  ;;  %p4978_p4 = pnand %p4977_p3, %p4971_p0 }
  0x16   :  { %v5302_v2 = vsel %vm804_vm2, %v4444_v63, 0 }
  0x17   :  { %v5307_v3 = vsel %vm804_vm2, %v4446_v1, 0 }
  0x19   :  { %4397 = vmatmul.mubr.msk.bf16.gmra.mrb[8].mxu0 %vm136_vm1, %v5124_v31  ;;  %4406 = vmatmul.mubr.msk.bf16.gmra.mrb[8].mxu1 %vm136_vm1, %v5124_v31 }
  0x1a   :  { %248 = vmatprep.mubr.bf16.mxu0 %v6430_v6  ;;  %359 = vmatprep.mubr.bf16.mxu1 %v6430_v6 }
  0x21   :  { %4398 = vmatmul.mubr.msk.bf16.gmra.mrb[12].mxu0 %vm136_vm1, %v5138_v34  ;;  %4407 = vmatmul.mubr.msk.bf16.gmra.mrb[12].mxu1 %vm136_vm1, %v5138_v34 }
  0x22   :  { %258 = vmatprep.mubr.bf16.mxu0 %v6430_v6  ;;  %369 = vmatprep.mubr.bf16.mxu1 %v6430_v6 }
  0x29   :  { %4399 = vmatmul.mubr.msk.bf16.gmra.mrb[16].mxu0 %vm136_vm1, %v5152_v37  ;;  %4408 = vmatmul.mubr.msk.bf16.gmra.mrb[16].mxu1 %vm136_vm1, %v5152_v37 }
  0x2a   :  { %268 = vmatprep.mubr.bf16.mxu0 %v6430_v6  ;;  %379 = vmatprep.mubr.bf16.mxu1 %v6430_v6 }
  0x31   :  { %4400 = vmatmul.mubr.msk.bf16.gmra.mrb[20].mxu0 %vm136_vm1, %v51_v40  ;;  %4409 = vmatmul.mubr.msk.bf16.gmra.mrb[20].mxu1 %vm136_vm1, %v51_v40 }
  0x32   :  { %278 = vmatprep.mubr.bf16.mxu0 %v6430_v6  ;;  %389 = vmatprep.mubr.bf16.mxu1 %v6430_v6 }
  0x39   :  { %4401 = vmatmul.mubr.msk.bf16.gmra.mrb[24].mxu0 %vm136_vm1, %v52_v43  ;;  %4410 = vmatmul.mubr.msk.bf16.gmra.mrb[24].mxu1 %vm136_vm1, %v52_v43 }
  0x3a   :  { %288 = vmatprep.mubr.bf16.mxu0 %v6430_v6  ;;  %399 = vmatprep.mubr.bf16.mxu1 %v6430_v6 }
  0x41   :  { %4402 = vmatmul.mubr.msk.bf16.gmra.mrb[28].mxu0 %vm136_vm1, %v53_v45  ;;  %4411 = vmatmul.mubr.msk.bf16.gmra.mrb[28].mxu1 %vm136_vm1, %v53_v45 }
  0x42   :  { %440 = vmatprep.mubr.bf16.mxu0 %v6430_v6  ;;  %551 = vmatprep.mubr.bf16.mxu1 %v6430_v6 }
  0x49   :  { %4413 = vmatmul.mubr.msk.bf16.vlgmr.msra.gmra.mrb[32].mxu0 %vm136_vm1, %v5075_v15  ;;  %4422 = vmatmul.mubr.msk.bf16.vlgmr.msra.gmra.mrb[32].mxu1 %vm136_vm1, %v5075_v15 }
  0x4a   :  { %818 = vmatpush1.bf16.msra.mxu0 %v5193_v47  ;;  %450 = vmatprep.mubr.bf16.mxu0 %v6430_v6 }
  0x4b   :  { %561 = vmatprep.mubr.bf16.mxu1 %v6430_v6  ;;  %859 = vmatpush1.bf16.msra.mxu1 %v5201_v50 }
  0x4c   :  { %4438 = vmatprep.subr.msk.bf16.mxu0 %vm804_vm2, %v5203_v51  ;;  %4439 = vmatprep.subr.msk.bf16.mxu1 %vm804_vm2, %v5207_v52 }
  0x4e   :  { %820 = vmatpush1.bf16.msra.mxu0 %v5215_v54 }
  0x4f   :  { %945 = vmatprep.subr.bf16.mxu0 %v5220_v55  ;;  %861 = vmatpush1.bf16.msra.mxu1 %v5228_v56 }
  0x50   :  { %986 = vmatprep.subr.bf16.mxu1 %v5233_v57 }
  0x51   :  { %4414 = vmatmul.mubr.msk.bf16.gmra.mrb[36].mxu0 %vm136_vm1, %v5109_v28  ;;  %4423 = vmatmul.mubr.msk.bf16.gmra.mrb[36].mxu1 %vm136_vm1, %v5109_v28 }
  0x52   :  { %460 = vmatprep.mubr.bf16.mxu0 %v6430_v6  ;;  %571 = vmatprep.mubr.bf16.mxu1 %v6430_v6 }
  0x59   :  { %4415 = vmatmul.mubr.msk.bf16.gmra.mrb[40].mxu0 %vm136_vm1, %v5124_v31  ;;  %4424 = vmatmul.mubr.msk.bf16.gmra.mrb[40].mxu1 %vm136_vm1, %v5124_v31 }
  0x5a   :  { %470 = vmatprep.mubr.bf16.mxu0 %v6430_v6  ;;  %581 = vmatprep.mubr.bf16.mxu1 %v6430_v6 }
  0x61   :  { %4416 = vmatmul.mubr.msk.bf16.gmra.mrb[44].mxu0 %vm136_vm1, %v5138_v34  ;;  %4425 = vmatmul.mubr.msk.bf16.gmra.mrb[44].mxu1 %vm136_vm1, %v5138_v34 }
  0x62   :  { %480 = vmatprep.mubr.bf16.mxu0 %v6430_v6  ;;  %591 = vmatprep.mubr.bf16.mxu1 %v6430_v6 }
  0x69   :  { %4417 = vmatmul.mubr.msk.bf16.gmra.mrb[48].mxu0 %vm136_vm1, %v5152_v37  ;;  %4426 = vmatmul.mubr.msk.bf16.gmra.mrb[48].mxu1 %vm136_vm1, %v5152_v37 }
  0x6a   :  { %490 = vmatprep.mubr.bf16.mxu0 %v6430_v6  ;;  %601 = vmatprep.mubr.bf16.mxu1 %v6430_v6 }
  0x71   :  { %4418 = vmatmul.mubr.msk.bf16.gmra.mrb[52].mxu0 %vm136_vm1, %v51_v40  ;;  %4427 = vmatmul.mubr.msk.bf16.gmra.mrb[52].mxu1 %vm136_vm1, %v51_v40 }
  0x72   :  { %500 = vmatprep.mubr.bf16.mxu0 %v6430_v6  ;;  %611 = vmatprep.mubr.bf16.mxu1 %v6430_v6 }
  0x79   :  { %4419 = vmatmul.mubr.msk.bf16.gmra.mrb[56].mxu0 %vm136_vm1, %v52_v43  ;;  %4428 = vmatmul.mubr.msk.bf16.gmra.mrb[56].mxu1 %vm136_vm1, %v52_v43 }
  0x7a   :  { %510 = vmatprep.mubr.bf16.mxu0 %v6430_v6  ;;  %621 = vmatprep.mubr.bf16.mxu1 %v6430_v6 }
  0x81   :  { %4420 = vmatmul.mubr.msk.bf16.gmra.mrb[60].mxu0 %vm136_vm1, %v53_v45  ;;  %4429 = vmatmul.mubr.msk.bf16.gmra.mrb[60].mxu1 %vm136_vm1, %v53_v45 }
  0x82   :  { %849 = vmatprep.mubr.bf16.mxu0 %v6430_v6  ;;  %890 = vmatprep.mubr.bf16.mxu1 %v6430_v6 }
  0x89   :  { %850 = vmatmul.mubr.bf16.vlgmr.msra.gmra.mrb[64].mxu0 %v6430_v6  ;;  %891 = vmatmul.mubr.bf16.vlgmr.msra.gmra.mrb[64].mxu1 %v6430_v6 }
  0x8a   :  { %946 = vmatpush1.bf16.msra.mxu0 %v5284_v60  ;;  %987 = vmatpush1.bf16.msra.mxu1 %v5289_v61 }
  0x8b   :  { %4448 = vmatprep.subr.msk.bf16.mxu0 %vm804_vm2, %v5291_v62  ;;  %4449 = vmatprep.subr.msk.bf16.mxu1 %vm804_vm2, %v5293_v0 }
  0x8c   :  { %977 = vmatprep.mubr.bf16.mxu0 %v6430_v6  ;;  %1018 = vmatprep.mubr.bf16.mxu1 %v6430_v6 }
  0x8e   :  { %948 = vmatpush1.bf16.msra.mxu0 %v5302_v2  ;;  %989 = vmatpush1.bf16.msra.mxu1 %v5307_v3 }
  0x8f   :  { %1079 = vmatprep.subr.bf16.mxu0 %v5099_v26  ;;  %1120 = vmatprep.subr.bf16.mxu1 %v5106_v27 }
  0x91   :  { %978 = vmatmul.mubr.bf16.vlgmr.msra.gmra.mrb[60].mxu0 %v6430_v6  ;;  %1019 = vmatmul.mubr.bf16.vlgmr.msra.gmra.mrb[60].mxu1 %v6430_v6 }
  0x92   :  { %1080 = vmatpush1.bf16.msra.mxu0 %v5193_v47  ;;  %1121 = vmatpush1.bf16.msra.mxu1 %v5201_v50 }
  0x93   :  { %4450 = vmatprep.subr.msk.bf16.mxu0 %vm804_vm2, %v5203_v51  ;;  %4452 = vmatprep.subr.msk.bf16.mxu1 %vm804_vm2, %v5207_v52 }
  0x94   :  { %1111 = vmatprep.mubr.bf16.mxu0 %v6430_v6  ;;  %1152 = vmatprep.mubr.bf16.mxu1 %v6430_v6 }
  0x96   :  { %1082 = vmatpush1.bf16.msra.mxu0 %v5215_v54  ;;  %1123 = vmatpush1.bf16.msra.mxu1 %v5228_v56 }
  0x97   :  { %1169 = vmatprep.subr.bf16.mxu0 %v5220_v55  ;;  %1210 = vmatprep.subr.bf16.mxu1 %v5233_v57 }
  0xdc   :  { %v5329_v4 = vpop.f32.mrb[0].mxu0  ;;  %v5333_v7 = vpop.f32.mrb[0].mxu1 }
  0xdd   :  { %v5331_v5 = vpop.f32.mrb[1].mxu0  ;;  %v5337_v9 = vpop.f32.mrb[1].mxu1 }
  0xde   :  { %v5335_v8 = vpop.f32.mrb[2].mxu0  ;;  %v5341_v11 = vpop.f32.mrb[2].mxu1 }
  0xdf   :  { %v5339_v10 = vpop.f32.mrb[3].mxu0  ;;  %v5343_v12 = vpop.f32.mrb[3].mxu1 }
  0xe4   :  { %v5345_v13 = vpop.f32.mrb[4].mxu0  ;;  %v5349_v15 = vpop.f32.mrb[4].mxu1 }
  0xe5   :  { %v5347_v14 = vpop.f32.mrb[5].mxu0  ;;  %v5353_v17 = vpop.f32.mrb[5].mxu1 }
  0xe6   :  { %v5351_v16 = vpop.f32.mrb[6].mxu0  ;;  %v5357_v19 = vpop.f32.mrb[6].mxu1 }
  0xe7   :  { %v5355_v18 = vpop.f32.mrb[7].mxu0  ;;  %v5359_v20 = vpop.f32.mrb[7].mxu1 }
  0xec   :  { %v5361_v21 = vpop.f32.mrb[8].mxu0  ;;  %v5365_v23 = vpop.f32.mrb[8].mxu1 }
  0xed   :  { %6432 = vst [vmem:[#allocation6_spill] sm:$0xff] %v5361_v21  ;;  %v5363_v22 = vpop.f32.mrb[9].mxu0  ;;  %6434 = vst [vmem:[#allocation8_spill] sm:$0xff] %v5365_v23  ;;  %v5369_v25 = vpop.f32.mrb[9].mxu1 }
  0xee   :  { %6433 = vst [vmem:[#allocation7_spill] sm:$0xff] %v5363_v22  ;;  %v5367_v24 = vpop.f32.mrb[10].mxu0  ;;  %6436 = vst [vmem:[#allocation10_spill] sm:$0xff] %v5369_v25  ;;  %v5373_v29 = vpop.f32.mrb[10].mxu1 }
  0xef   :  { %6435 = vst [vmem:[#allocation9_spill] sm:$0xff] %v5367_v24  ;;  %v5371_v28 = vpop.f32.mrb[11].mxu0  ;;  %6438 = vst [vmem:[#allocation12_spill] sm:$0xff] %v5373_v29  ;;  %v5375_v30 = vpop.f32.mrb[11].mxu1 }
  0xf0   :  { %6437 = vst [vmem:[#allocation11_spill] sm:$0xff] %v5371_v28  ;;  %6439 = vst [vmem:[#allocation13_spill] sm:$0xff] %v5375_v30 }
  0xf4   :  { %v5377_v31 = vpop.f32.mrb[12].mxu0  ;;  %v5381_v33 = vpop.f32.mrb[12].mxu1 }
  0xf5   :  { %6440 = vst [vmem:[#allocation14_spill] sm:$0xff] %v5377_v31  ;;  %v5379_v32 = vpop.f32.mrb[13].mxu0  ;;  %6442 = vst [vmem:[#allocation16_spill] sm:$0xff] %v5381_v33  ;;  %v5385_v35 = vpop.f32.mrb[13].mxu1  ;;  %v62_v31 = vld [vmem:[%s6423_s2] sm:$0xff] }
  0xf6   :  { %6441 = vst [vmem:[#allocation15_spill] sm:$0xff] %v5379_v32  ;;  %v5383_v34 = vpop.f32.mrb[14].mxu0  ;;  %6444 = vst [vmem:[#allocation18_spill] sm:$0xff] %v5385_v35  ;;  %v5389_v37 = vpop.f32.mrb[14].mxu1 }
  0xf7   :  { %6443 = vst [vmem:[#allocation17_spill] sm:$0xff] %v5383_v34  ;;  %v5387_v36 = vpop.f32.mrb[15].mxu0  ;;  %6446 = vst [vmem:[#allocation20_spill] sm:$0xff] %v5389_v37  ;;  %v5391_v38 = vpop.f32.mrb[15].mxu1 }
  0xf8   :  { %6445 = vst [vmem:[#allocation19_spill] sm:$0xff] %v5387_v36  ;;  %6447 = vst [vmem:[#allocation21_spill] sm:$0xff] %v5391_v38  ;;  %v64_v38 = vlaneseq }
  0xfc   :  { %v5393_v39 = vpop.f32.mrb[16].mxu0  ;;  %v5397_v41 = vpop.f32.mrb[16].mxu1 }
  0xfd   :  { %6448 = vst [vmem:[#allocation22_spill] sm:$0xff] %v5393_v39  ;;  %v5395_v40 = vpop.f32.mrb[17].mxu0  ;;  %6450 = vst [vmem:[#allocation24_spill] sm:$0xff] %v5397_v41  ;;  %v5401_v43 = vpop.f32.mrb[17].mxu1 }
  0xfe   :  { %6449 = vst [vmem:[#allocation23_spill] sm:$0xff] %v5395_v40  ;;  %v5399_v42 = vpop.f32.mrb[18].mxu0  ;;  %6452 = vst [vmem:[#allocation26_spill] sm:$0xff] %v5401_v43  ;;  %v5405_v45 = vpop.f32.mrb[18].mxu1 }
  0xff   :  { %6451 = vst [vmem:[#allocation25_spill] sm:$0xff] %v5399_v42  ;;  %v5403_v44 = vpop.f32.mrb[19].mxu0  ;;  %6454 = vst [vmem:[#allocation28_spill] sm:$0xff] %v5405_v45  ;;  %v5407_v46 = vpop.f32.mrb[19].mxu1 }
 0x100   :  { %6453 = vst [vmem:[#allocation27_spill] sm:$0xff] %v5403_v44  ;;  %6455 = vst [vmem:[#allocation29_spill] sm:$0xff] %v5407_v46 }
 0x104   :  { %v5409_v48 = vpop.f32.mrb[20].mxu0  ;;  %v5413_v53 = vpop.f32.mrb[20].mxu1 }
 0x105   :  { %6456 = vst [vmem:[#allocation30_spill] sm:$0xff] %v5409_v48  ;;  %v5411_v49 = vpop.f32.mrb[21].mxu0  ;;  %6458 = vst [vmem:[#allocation32_spill] sm:$0xff] %v5413_v53  ;;  %v5417_v59 = vpop.f32.mrb[21].mxu1 }
 0x106   :  { %6457 = vst [vmem:[#allocation31_spill] sm:$0xff] %v5411_v49  ;;  %v5415_v58 = vpop.f32.mrb[22].mxu0  ;;  %6460 = vst [vmem:[#allocation34_spill] sm:$0xff] %v5417_v59  ;;  %v5421_v1 = vpop.f32.mrb[22].mxu1 }
 0x107   :  { %6459 = vst [vmem:[#allocation33_spill] sm:$0xff] %v5415_v58  ;;  %v5419_v63 = vpop.f32.mrb[23].mxu0  ;;  %6462 = vst [vmem:[#allocation36_spill] sm:$0xff] %v5421_v1  ;;  %v5423_v6 = vpop.f32.mrb[23].mxu1 }
 0x108   :  { %6461 = vst [vmem:[#allocation35_spill] sm:$0xff] %v5419_v63  ;;  %6463 = vst [vmem:[#allocation37_spill] sm:$0xff] %v5423_v6 }
 0x10c   :  { %v5425_v44 = vpop.f32.mrb[24].mxu0  ;;  %v5429_v46 = vpop.f32.mrb[24].mxu1 }
 0x10d   :  { %6464 = vst [vmem:[#allocation38_spill] sm:$0xff] %v5425_v44  ;;  %v5427_v45 = vpop.f32.mrb[25].mxu0  ;;  %6466 = vst [vmem:[#allocation40_spill] sm:$0xff] %v5429_v46  ;;  %v5433_v49 = vpop.f32.mrb[25].mxu1 }
 0x10e   :  { %6465 = vst [vmem:[#allocation39_spill] sm:$0xff] %v5427_v45  ;;  %v5431_v48 = vpop.f32.mrb[26].mxu0  ;;  %6468 = vst [vmem:[#allocation42_spill] sm:$0xff] %v5433_v49  ;;  %v5437_v58 = vpop.f32.mrb[26].mxu1 }
 0x10f   :  { %6467 = vst [vmem:[#allocation41_spill] sm:$0xff] %v5431_v48  ;;  %v5435_v53 = vpop.f32.mrb[27].mxu0  ;;  %6470 = vst [vmem:[#allocation44_spill] sm:$0xff] %v5437_v58  ;;  %v5439_v59 = vpop.f32.mrb[27].mxu1 }
 0x110   :  { %6469 = vst [vmem:[#allocation43_spill] sm:$0xff] %v5435_v53  ;;  %6471 = vst [vmem:[#allocation45_spill] sm:$0xff] %v5439_v59 }
 0x11c   :  { %v5441_v63 = vpop.f32.mrb[32].mxu0  ;;  %v5445_v6 = vpop.f32.mrb[32].mxu1 }
 0x11d   :  { %6472 = vst [vmem:[#allocation46_spill] sm:$0xff] %v5441_v63  ;;  %v5443_v1 = vpop.f32.mrb[33].mxu0  ;;  %6474 = vst [vmem:[#allocation48_spill] sm:$0xff] %v5445_v6  ;;  %v5449_v45 = vpop.f32.mrb[33].mxu1 }
 0x11e   :  { %6473 = vst [vmem:[#allocation47_spill] sm:$0xff] %v5443_v1  ;;  %v5447_v44 = vpop.f32.mrb[34].mxu0  ;;  %6476 = vst [vmem:[#allocation50_spill] sm:$0xff] %v5449_v45  ;;  %v5453_v48 = vpop.f32.mrb[34].mxu1 }
 0x11f   :  { %6475 = vst [vmem:[#allocation49_spill] sm:$0xff] %v5447_v44  ;;  %v5451_v46 = vpop.f32.mrb[35].mxu0  ;;  %6478 = vst [vmem:[#allocation52_spill] sm:$0xff] %v5453_v48  ;;  %v5455_v49 = vpop.f32.mrb[35].mxu1 }
 0x120   :  { %6477 = vst [vmem:[#allocation51_spill] sm:$0xff] %v5451_v46  ;;  %6479 = vst [vmem:[#allocation53_spill] sm:$0xff] %v5455_v49 }
 0x124   :  { %v5457_v53 = vpop.f32.mrb[36].mxu0  ;;  %v5461_v59 = vpop.f32.mrb[36].mxu1 }
 0x125   :  { %6480 = vst [vmem:[#allocation54_spill] sm:$0xff] %v5457_v53  ;;  %v5459_v58 = vpop.f32.mrb[37].mxu0  ;;  %6482 = vst [vmem:[#allocation56_spill] sm:$0xff] %v5461_v59  ;;  %v5465_v1 = vpop.f32.mrb[37].mxu1 }
 0x126   :  { %6481 = vst [vmem:[#allocation55_spill] sm:$0xff] %v5459_v58  ;;  %v5463_v63 = vpop.f32.mrb[38].mxu0  ;;  %6484 = vst [vmem:[#allocation58_spill] sm:$0xff] %v5465_v1  ;;  %v5469_v44 = vpop.f32.mrb[38].mxu1 }
 0x127   :  { %6483 = vst [vmem:[#allocation57_spill] sm:$0xff] %v5463_v63  ;;  %v5467_v6 = vpop.f32.mrb[39].mxu0  ;;  %6486 = vst [vmem:[#allocation60_spill] sm:$0xff] %v5469_v44  ;;  %v5471_v45 = vpop.f32.mrb[39].mxu1 }
 0x128   :  { %6485 = vst [vmem:[#allocation59_spill] sm:$0xff] %v5467_v6  ;;  %6487 = vst [vmem:[#allocation61_spill] sm:$0xff] %v5471_v45 }
 0x12c   :  { %v5473_v46 = vpop.f32.mrb[40].mxu0  ;;  %v5477_v49 = vpop.f32.mrb[40].mxu1 }
 0x12d   :  { %6488 = vst [vmem:[#allocation62_spill] sm:$0xff] %v5473_v46  ;;  %v5475_v48 = vpop.f32.mrb[41].mxu0  ;;  %6490 = vst [vmem:[#allocation64_spill] sm:$0xff] %v5477_v49  ;;  %v5481_v58 = vpop.f32.mrb[41].mxu1 }
 0x12e   :  { %6489 = vst [vmem:[#allocation63_spill] sm:$0xff] %v5475_v48  ;;  %v5479_v53 = vpop.f32.mrb[42].mxu0  ;;  %6492 = vst [vmem:[#allocation66_spill] sm:$0xff] %v5481_v58  ;;  %v5485_v63 = vpop.f32.mrb[42].mxu1 }
 0x12f   :  { %6491 = vst [vmem:[#allocation65_spill] sm:$0xff] %v5479_v53  ;;  %v5483_v59 = vpop.f32.mrb[43].mxu0  ;;  %6494 = vst [vmem:[#allocation68_spill] sm:$0xff] %v5485_v63  ;;  %v5487_v1 = vpop.f32.mrb[43].mxu1 }
 0x130   :  { %6493 = vst [vmem:[#allocation67_spill] sm:$0xff] %v5483_v59  ;;  %6495 = vst [vmem:[#allocation69_spill] sm:$0xff] %v5487_v1 }
 0x134   :  { %v5489_v6 = vpop.f32.mrb[44].mxu0  ;;  %v5493_v45 = vpop.f32.mrb[44].mxu1 }
 0x135   :  { %6496 = vst [vmem:[#allocation70_spill] sm:$0xff] %v5489_v6  ;;  %v5491_v44 = vpop.f32.mrb[45].mxu0  ;;  %6498 = vst [vmem:[#allocation72_spill] sm:$0xff] %v5493_v45  ;;  %v5497_v48 = vpop.f32.mrb[45].mxu1 }
 0x136   :  { %6497 = vst [vmem:[#allocation71_spill] sm:$0xff] %v5491_v44  ;;  %v5495_v46 = vpop.f32.mrb[46].mxu0  ;;  %6500 = vst [vmem:[#allocation74_spill] sm:$0xff] %v5497_v48  ;;  %v5501_v53 = vpop.f32.mrb[46].mxu1 }
 0x137   :  { %6499 = vst [vmem:[#allocation73_spill] sm:$0xff] %v5495_v46  ;;  %v5499_v49 = vpop.f32.mrb[47].mxu0  ;;  %6502 = vst [vmem:[#allocation76_spill] sm:$0xff] %v5501_v53  ;;  %v5503_v58 = vpop.f32.mrb[47].mxu1 }
 0x138   :  { %6501 = vst [vmem:[#allocation75_spill] sm:$0xff] %v5499_v49  ;;  %6503 = vst [vmem:[#allocation77_spill] sm:$0xff] %v5503_v58 }
 0x13c   :  { %v5505_v59 = vpop.f32.mrb[48].mxu0  ;;  %v5509_v1 = vpop.f32.mrb[48].mxu1 }
 0x13d   :  { %6504 = vst [vmem:[#allocation78_spill] sm:$0xff] %v5505_v59  ;;  %v5507_v63 = vpop.f32.mrb[49].mxu0  ;;  %6506 = vst [vmem:[#allocation80_spill] sm:$0xff] %v5509_v1  ;;  %v5513_v44 = vpop.f32.mrb[49].mxu1  ;;  %v65_v1 = vshrl.u32 %v64_v38, 7 }
 0x13e   :  { %6505 = vst [vmem:[#allocation79_spill] sm:$0xff] %v5507_v63  ;;  %v5511_v42 = vpop.f32.mrb[50].mxu0  ;;  %6508 = vst [vmem:[#allocation82_spill] sm:$0xff] %v5513_v44  ;;  %v5517_v6 = vpop.f32.mrb[50].mxu1 }
 0x13f   :  { %6507 = vst [vmem:[#allocation81_spill] sm:$0xff] %v5511_v42  ;;  %v5515_v45 = vpop.f32.mrb[51].mxu0  ;;  %6510 = vst [vmem:[#allocation84_spill] sm:$0xff] %v5517_v6  ;;  %v5519_v48 = vpop.f32.mrb[51].mxu1  ;;  %v66_v33 = vsub.s32 0, %v65_v1  ;;  %v78_v6 = vsub.s32 3, %v65_v1 }
 0x140   :  { %6509 = vst [vmem:[#allocation83_spill] sm:$0xff] %v5515_v45  ;;  %6511 = vst [vmem:[#allocation85_spill] sm:$0xff] %v5519_v48  ;;  %v70_v48 = vsub.s32 1, %v65_v1  ;;  %v74_v45 = vsub.s32 2, %v65_v1  ;;  %v82_v23 = vsub.s32 4, %v65_v1 }
 0x141   :  { %v5556_v42 = vrot.slane %v62_v31, %v66_v33  ;;  %v5562_v38 = vrot.slane %v62_v31, %v78_v6 }
 0x142   :  { %v5558_v30 = vrot.slane %v62_v31, %v70_v48  ;;  %v5560_v28 = vrot.slane %v62_v31, %v74_v45 }
 0x143   :  { %v221_v29 = vadd.f32 %v5329_v4, %v5556_v42  ;;  %v334_v33 = vadd.f32 %v5337_v9, %v5562_v38  ;;  %v90_v9 = vsub.s32 6, %v65_v1 }
 0x144   :  { %v5521_v43 = vpop.f32.mrb[52].mxu0  ;;  %v5525_v41 = vpop.f32.mrb[52].mxu1  ;;  %v223_v24 = vadd.f32 %v5331_v5, %v5558_v30  ;;  %v86_v5 = vsub.s32 5, %v65_v1 }
 0x145   :  { %6512 = vst [vmem:[#allocation86_spill] sm:$0xff] %v5521_v43  ;;  %v5523_v40 = vpop.f32.mrb[53].mxu0  ;;  %6514 = vst [vmem:[#allocation88_spill] sm:$0xff] %v5525_v41  ;;  %v5529_v58 = vpop.f32.mrb[53].mxu1 }
 0x146   :  { %6513 = vst [vmem:[#allocation87_spill] sm:$0xff] %v5523_v40  ;;  %v5527_v39 = vpop.f32.mrb[54].mxu0  ;;  %6516 = vst [vmem:[#allocation90_spill] sm:$0xff] %v5529_v58  ;;  %v5533_v53 = vpop.f32.mrb[54].mxu1  ;;  %v332_v58 = vadd.f32 %v5333_v7, %v5560_v28  ;;  %v5572_v7 = vrot.slane %v62_v31, %v82_v23 }
 0x147   :  { %6515 = vst [vmem:[#allocation89_spill] sm:$0xff] %v5527_v39  ;;  %v5531_v49 = vpop.f32.mrb[55].mxu0  ;;  %6518 = vst [vmem:[#allocation92_spill] sm:$0xff] %v5533_v53  ;;  %v5535_v46 = vpop.f32.mrb[55].mxu1 }
 0x148   :  { %6517 = vst [vmem:[#allocation91_spill] sm:$0xff] %v5531_v49  ;;  %6519 = vst [vmem:[#allocation93_spill] sm:$0xff] %v5535_v46 }
 0x14c   :  { %v5537_v36 = vpop.f32.mrb[56].mxu0  ;;  %v5541_v34 = vpop.f32.mrb[56].mxu1 }
 0x14d   :  { %v5539_v37 = vpop.f32.mrb[57].mxu0  ;;  %v5545_v63 = vpop.f32.mrb[57].mxu1 }
 0x14e   :  { %v5543_v44 = vpop.f32.mrb[58].mxu0  ;;  %v5549_v35 = vpop.f32.mrb[58].mxu1 }
 0x14f   :  { %v5547_v59 = vpop.f32.mrb[59].mxu0  ;;  %v5551_v32 = vpop.f32.mrb[59].mxu1 }
 0x15c   :  { %v851_v40 = vpop.f32.mrb[64].mxu0  ;;  %v892_v48 = vpop.f32.mrb[64].mxu1 }
 0x15d   :  { %v899_v41 = vadd.f32 %v851_v40, %v221_v29  ;;  %v853_v43 = vpop.f32.mrb[65].mxu0  ;;  %v901_v45 = vadd.f32 %v892_v48, %v332_v58  ;;  %v894_v6 = vpop.f32.mrb[65].mxu1  ;;  %v5574_v29 = vrot.slane %v62_v31, %v86_v5 }
 0x15e   :  { %v900_v25 = vadd.f32 %v853_v43, %v223_v24  ;;  %v855_v22 = vpop.f32.mrb[66].mxu0  ;;  %v902_v4 = vadd.f32 %v894_v6, %v334_v33  ;;  %v896_v49 = vpop.f32.mrb[66].mxu1 }
 0x15f   :  { %v1031_v21 = vmul.f32 0.5, %v899_v41  ;;  %v856_v46 = vpop.f32.mrb[67].mxu0  ;;  %v897_v39 = vpop.f32.mrb[67].mxu1  ;;  %v94_v41 = vsub.s32 7, %v65_v1 }
 0x160   :  { %v1035_v53 = vmul.f32 0.5, %v900_v25  ;;  %v5578_v25 = vrot.slane %v62_v31, %v90_v9 }
 0x161   :  { %4648 = vtanh.f32 %v1031_v21  ;;  %v5581_v6 = vrot.slane %v62_v31, %v94_v41 }
 0x162   :  { %4650 = vtanh.f32 %v1035_v53  ;;  %v1040_v53 = vmul.f32 0.5, %v902_v4 }
 0x163   :  { %4652 = vtanh.f32 %v901_v45 }
 0x164   :  { %v979_v40 = vpop.f32.mrb[60].mxu0  ;;  %v1020_v22 = vpop.f32.mrb[60].mxu1 }
 0x165   :  { %v4603_v24 = vadd.f32 %v979_v40, %v5572_v7  ;;  %v981_v43 = vpop.f32.mrb[61].mxu0  ;;  %v1022_v49 = vpop.f32.mrb[61].mxu1  ;;  %v4605_v45 = vadd.f32 %v1020_v22, %v5578_v25 }
 0x166   :  { %v4604_v46 = vadd.f32 %v981_v43, %v5574_v29  ;;  %v983_v58 = vpop.f32.mrb[62].mxu0  ;;  %v1024_v39 = vpop.f32.mrb[62].mxu1  ;;  %v4606_v43 = vadd.f32 %v1022_v49, %v5581_v6 }
 0x167   :  { %v1049_v21 = vmul.f32 0.5, %v4603_v24  ;;  %v984_v23 = vpop.f32.mrb[63].mxu0  ;;  %v1025_v48 = vpop.f32.mrb[63].mxu1 }
 0x168   :  { %v1053_v33 = vmul.f32 0.5, %v4604_v46  ;;  %v1058_v46 = vmul.f32 0.5, %v4606_v43 }
 0x169   :  { %4654 = vtanh.f32 %v1049_v21 }
 0x16a   :  { %4656 = vtanh.f32 %v1053_v33 }
 0x16b   :  { %v4649_v5 = vpop.eup %4648  ;;  %4658 = vtanh.f32 %v1040_v53 }
 0x16c   :  { %v4651_v1 = vpop.eup %4650  ;;  %v1033_v40 = vmul.f32 0.5, %v4649_v5  ;;  %4660 = vtanh.f32 %v4605_v45 }
 0x16d   :  { %v1037_v9 = vmul.f32 0.5, %v4651_v1  ;;  %v4653_v58 = vpop.eup %4652  ;;  %4662 = vtanh.f32 %v1058_v46 }
 0x16e   :  { %v1034_v24 = vadd.f32 0.5, %v1033_v40 }
 0x16f   :  { %v1038_v39 = vadd.f32 0.5, %v1037_v9 }
 0x170   :  { %v1045_v4 = vmul.f32 %v4653_v58, %v1034_v24 }
 0x171   :  { %v1044_v23 = vmul.f32 0.0, %v1038_v39 }
 0x173   :  { %v4655_v21 = vpop.eup %4654  ;;  %v5584_v48 = vadd.f32 %v1045_v4, %v1044_v23 }
 0x174   :  { %v4657_v31 = vpop.eup %4656  ;;  %v1051_v22 = vmul.f32 0.5, %v4655_v21 }
 0x175   :  { %4664 = vtanh.f32 %v5584_v48  ;;  %v1055_v41 = vmul.f32 0.5, %v4657_v31  ;;  %v4659_v53 = vpop.eup %4658  ;;  %v6520_v31 = vmov 0  }
 0x176   :  { %v1052_v33 = vadd.f32 0.5, %v1051_v22  ;;  %v4661_v49 = vpop.eup %4660  ;;  %v1042_v40 = vmul.f32 0.5, %v4659_v53  ;;  %v225_v53 = vadd.f32 %v5335_v8, %v5556_v42 }
 0x177   :  { %v1056_v5 = vadd.f32 0.5, %v1055_v41  ;;  %v4663_v43 = vpop.eup %4662 }
 0x178   :  { %v1063_v45 = vmul.f32 %v4661_v49, %v1052_v33  ;;  %v1043_v24 = vadd.f32 0.5, %v1042_v40  ;;  %v1060_v46 = vmul.f32 0.5, %v4663_v43  ;;  %v336_v33 = vadd.f32 %v5341_v11, %v5560_v28 }
 0x179   :  { %v1062_v1 = vmul.f32 0.0, %v1056_v5  ;;  %v227_v49 = vadd.f32 %v5339_v10, %v5558_v30  ;;  %v338_v5 = vadd.f32 %v5343_v12, %v5562_v38  ;;  %v507_v10 = vadd.f32 %v5543_v44, %v5572_v7 }
 0x17a   :  { %v1061_v23 = vadd.f32 0.5, %v1060_v46  ;;  %v618_v12 = vadd.f32 %v5549_v35, %v5578_v25 }
 0x17b   :  { %v5587_v9 = vadd.f32 %v1063_v45, %v1062_v1 }
 0x17d   :  { %4666 = vtanh.f32 %v5587_v9 }
 0x17f   :  { %v4665_v58 = vpop.eup %4664 }
 0x180   :  { %v1048_v39 = vmul.f32 %v4665_v58, %v1043_v24 }
 0x182   :  { %v1075_v4 = vpack.c.bf16 %v1048_v39, %v1048_v39 }
 0x184   :  { %4451 = vmatmul.mubr.msk.bf16.vlgmr.msra.gmra.mrb[68].mxu0 %vm800_vm3, %v1075_v4  ;;  %4453 = vmatmul.mubr.msk.bf16.vlgmr.msra.gmra.mrb[68].mxu1 %vm800_vm3, %v1075_v4 }
 0x185   :  { %1170 = vmatpush1.bf16.msra.mxu0 %v5284_v60  ;;  %1211 = vmatpush1.bf16.msra.mxu1 %v5289_v61 }
 0x186   :  { %4454 = vmatprep.subr.msk.bf16.mxu0 %vm804_vm2, %v5291_v62  ;;  %4456 = vmatprep.subr.msk.bf16.mxu1 %vm804_vm2, %v5293_v0 }
 0x187   :  { %v4667_v21 = vpop.eup %4666  ;;  %1201 = vmatprep.mubr.bf16.mxu0 %v6520_v31  ;;  %1242 = vmatprep.mubr.bf16.mxu1 %v6520_v31 }
 0x188   :  { %v1066_v22 = vmul.f32 %v4667_v21, %v1061_v23 }
 0x189   :  { %1172 = vmatpush1.bf16.msra.mxu0 %v5302_v2  ;;  %1213 = vmatpush1.bf16.msra.mxu1 %v5307_v3 }
 0x18a   :  { %v1165_v41 = vpack.c.bf16 %v1066_v22, %v1066_v22  ;;  %1303 = vmatprep.subr.bf16.mxu0 %v5099_v26  ;;  %1344 = vmatprep.subr.bf16.mxu1 %v5106_v27 }
 0x18c   :  { %4455 = vmatmul.mubr.msk.bf16.vlgmr.msra.gmra.mrb[72].mxu0 %vm800_vm3, %v1165_v41  ;;  %4457 = vmatmul.mubr.msk.bf16.vlgmr.msra.gmra.mrb[72].mxu1 %vm800_vm3, %v1165_v41  ;;  %v509_v41 = vadd.f32 %v5547_v59, %v5574_v29 }
 0x18d   :  { %1304 = vmatpush1.bf16.msra.mxu0 %v5193_v47  ;;  %1345 = vmatpush1.bf16.msra.mxu1 %v5201_v50 }
 0x18e   :  { %4458 = vmatprep.subr.msk.bf16.mxu0 %vm804_vm2, %v5203_v51  ;;  %4460 = vmatprep.subr.msk.bf16.mxu1 %vm804_vm2, %v5207_v52 }
 0x18f   :  { %1335 = vmatprep.mubr.bf16.mxu0 %v6520_v31  ;;  %1376 = vmatprep.mubr.bf16.mxu1 %v6520_v31 }
 0x191   :  { %1306 = vmatpush1.bf16.msra.mxu0 %v5215_v54  ;;  %1347 = vmatpush1.bf16.msra.mxu1 %v5228_v56 }
 0x192   :  { %1393 = vmatprep.subr.bf16.mxu0 %v5220_v55  ;;  %1434 = vmatprep.subr.bf16.mxu1 %v5233_v57 }
 0x257   :  { %v1113_v45 = vpop.f32.mrb[68].mxu0  ;;  %v1154_v1 = vpop.f32.mrb[68].mxu1 }
 0x258   :  { %v1161_v40 = vadd.f32 %v1113_v45, %v225_v53  ;;  %v1163_v43 = vadd.f32 %v1154_v1, %v336_v33  ;;  %v1115_v24 = vpop.f32.mrb[69].mxu0  ;;  %v1156_v58 = vpop.f32.mrb[69].mxu1  ;;  %v620_v53 = vadd.f32 %v5551_v32, %v5581_v6 }
 0x259   :  { %v1162_v39 = vadd.f32 %v1115_v24, %v227_v49  ;;  %v1164_v4 = vadd.f32 %v1156_v58, %v338_v5  ;;  %v1117_v46 = vpop.f32.mrb[70].mxu0  ;;  %v1158_v23 = vpop.f32.mrb[70].mxu1 }
 0x25a   :  { %v1255_v8 = vmul.f32 0.5, %v1161_v40  ;;  %v1118_v21 = vpop.f32.mrb[71].mxu0  ;;  %v1159_v22 = vpop.f32.mrb[71].mxu1 }
 0x25b   :  { %v1259_v11 = vmul.f32 0.5, %v1162_v39 }
 0x25c   :  { %4668 = vtanh.f32 %v1255_v8  ;;  %v1264_v8 = vmul.f32 0.5, %v1164_v4 }
 0x25d   :  { %4670 = vtanh.f32 %v1259_v11 }
 0x25e   :  { %4672 = vtanh.f32 %v1163_v43 }
 0x25f   :  { %v1203_v33 = vpop.f32.mrb[72].mxu0  ;;  %v1244_v49 = vpop.f32.mrb[72].mxu1 }
 0x260   :  { %v1251_v5 = vadd.f32 %v1203_v33, %v507_v10  ;;  %v1253_v45 = vadd.f32 %v1244_v49, %v618_v12  ;;  %v1205_v1 = vpop.f32.mrb[73].mxu0  ;;  %v1246_v40 = vpop.f32.mrb[73].mxu1 }
 0x261   :  { %v1252_v24 = vadd.f32 %v1205_v1, %v509_v41  ;;  %v1254_v58 = vadd.f32 %v1246_v40, %v620_v53  ;;  %v1207_v39 = vpop.f32.mrb[74].mxu0  ;;  %v1248_v44 = vpop.f32.mrb[74].mxu1 }
 0x262   :  { %v1273_v46 = vmul.f32 0.5, %v1251_v5  ;;  %v1208_v23 = vpop.f32.mrb[75].mxu0  ;;  %v1249_v35 = vpop.f32.mrb[75].mxu1 }
 0x263   :  { %v1277_v21 = vmul.f32 0.5, %v1252_v24  ;;  %v1282_v53 = vmul.f32 0.5, %v1254_v58 }
 0x264   :  { %4674 = vtanh.f32 %v1273_v46 }
 0x265   :  { %4676 = vtanh.f32 %v1277_v21 }
 0x266   :  { %v4669_v59 = vpop.eup %4668  ;;  %4678 = vtanh.f32 %v1264_v8 }
 0x267   :  { %v4671_v32 = vpop.eup %4670  ;;  %v1257_v22 = vmul.f32 0.5, %v4669_v59  ;;  %4680 = vtanh.f32 %v1253_v45 }
 0x268   :  { %v1261_v43 = vmul.f32 0.5, %v4671_v32  ;;  %v4673_v10 = vpop.eup %4672  ;;  %4682 = vtanh.f32 %v1282_v53 }
 0x269   :  { %v1258_v11 = vadd.f32 0.5, %v1257_v22 }
 0x26a   :  { %v1262_v12 = vadd.f32 0.5, %v1261_v43 }
 0x26b   :  { %v1269_v41 = vmul.f32 %v4673_v10, %v1258_v11 }
 0x26c   :  { %v1268_v33 = vmul.f32 %v1262_v12, %v5584_v48 }
 0x26e   :  { %v4675_v49 = vpop.eup %4674  ;;  %v5635_v5 = vadd.f32 %v1269_v41, %v1268_v33 }
 0x26f   :  { %v4677_v4 = vpop.eup %4676  ;;  %v1275_v1 = vmul.f32 0.5, %v4675_v49 }
 0x270   :  { %4684 = vtanh.f32 %v5635_v5  ;;  %v1279_v40 = vmul.f32 0.5, %v4677_v4  ;;  %v4679_v24 = vpop.eup %4678 }
 0x271   :  { %v1276_v39 = vadd.f32 0.5, %v1275_v1  ;;  %v4681_v44 = vpop.eup %4680  ;;  %v1266_v35 = vmul.f32 0.5, %v4679_v24 }
 0x272   :  { %v1280_v45 = vadd.f32 0.5, %v1279_v40  ;;  %v4683_v48 = vpop.eup %4682 }
 0x273   :  { %v1287_v46 = vmul.f32 %v4681_v44, %v1276_v39  ;;  %v1267_v8 = vadd.f32 0.5, %v1266_v35  ;;  %v1284_v22 = vmul.f32 0.5, %v4683_v48 }
 0x274   :  { %v1286_v23 = vmul.f32 %v1280_v45, %v5587_v9 }
 0x275   :  { %v1285_v9 = vadd.f32 0.5, %v1284_v22 }
 0x276   :  { %v5639_v58 = vadd.f32 %v1287_v46, %v1286_v23  ;;  %v505_v46 = vadd.f32 %v5539_v37, %v5574_v29  ;;  %v616_v23 = vadd.f32 %v5545_v63, %v5581_v6 }
 0x278   :  { %4686 = vtanh.f32 %v5639_v58 }
 0x27a   :  { %v4685_v21 = vpop.eup %4684 }
 0x27b   :  { %v1272_v59 = vmul.f32 %v4685_v21, %v1267_v8 }
 0x27d   :  { %v1299_v32 = vpack.c.bf16 %v1272_v59, %v1272_v59 }
 0x27f   :  { %4459 = vmatmul.mubr.msk.bf16.vlgmr.msra.gmra.mrb[76].mxu0 %vm800_vm3, %v1299_v32  ;;  %4461 = vmatmul.mubr.msk.bf16.vlgmr.msra.gmra.mrb[76].mxu1 %vm800_vm3, %v1299_v32 }
 0x280   :  { %1394 = vmatpush1.bf16.msra.mxu0 %v5284_v60  ;;  %1435 = vmatpush1.bf16.msra.mxu1 %v5289_v61 }
 0x281   :  { %4462 = vmatprep.subr.msk.bf16.mxu0 %vm804_vm2, %v5291_v62  ;;  %4464 = vmatprep.subr.msk.bf16.mxu1 %vm804_vm2, %v5293_v0 }
 0x282   :  { %v4687_v43 = vpop.eup %4686  ;;  %1425 = vmatprep.mubr.bf16.mxu0 %v6520_v31  ;;  %1466 = vmatprep.mubr.bf16.mxu1 %v6520_v31 }
 0x283   :  { %v1290_v11 = vmul.f32 %v4687_v43, %v1285_v9 }
 0x284   :  { %1396 = vmatpush1.bf16.msra.mxu0 %v5302_v2  ;;  %1437 = vmatpush1.bf16.msra.mxu1 %v5307_v3 }
 0x285   :  { %v1389_v10 = vpack.c.bf16 %v1290_v11, %v1290_v11  ;;  %1527 = vmatprep.subr.bf16.mxu0 %v5099_v26  ;;  %1568 = vmatprep.subr.bf16.mxu1 %v5106_v27  ;;  %v231_v26 = vadd.f32 %v5345_v13, %v5556_v42  ;;  %v342_v27 = vadd.f32 %v5349_v15, %v5560_v28 }
 0x287   :  { %4463 = vmatmul.mubr.msk.bf16.vlgmr.msra.gmra.mrb[80].mxu0 %vm800_vm3, %v1389_v10  ;;  %4465 = vmatmul.mubr.msk.bf16.vlgmr.msra.gmra.mrb[80].mxu1 %vm800_vm3, %v1389_v10 }
 0x288   :  { %1528 = vmatpush1.bf16.msra.mxu0 %v5193_v47  ;;  %1569 = vmatpush1.bf16.msra.mxu1 %v5201_v50  ;;  %v233_v47 = vadd.f32 %v5347_v14, %v5558_v30  ;;  %v344_v50 = vadd.f32 %v5353_v17, %v5562_v38  ;;  %v503_v14 = vadd.f32 %v5537_v36, %v5572_v7 }
 0x289   :  { %4466 = vmatprep.subr.msk.bf16.mxu0 %vm804_vm2, %v5203_v51  ;;  %4468 = vmatprep.subr.msk.bf16.mxu1 %vm804_vm2, %v5207_v52  ;;  %v614_v17 = vadd.f32 %v5541_v34, %v5578_v25 }
 0x28a   :  { %1559 = vmatprep.mubr.bf16.mxu0 %v6520_v31  ;;  %1600 = vmatprep.mubr.bf16.mxu1 %v6520_v31 }
 0x28c   :  { %1530 = vmatpush1.bf16.msra.mxu0 %v5215_v54  ;;  %1571 = vmatpush1.bf16.msra.mxu1 %v5228_v56 }
 0x28d   :  { %1617 = vmatprep.subr.bf16.mxu0 %v5220_v55  ;;  %1658 = vmatprep.subr.bf16.mxu1 %v5233_v57 }
 0x352   :  { %v1337_v12 = vpop.f32.mrb[76].mxu0  ;;  %v1378_v41 = vpop.f32.mrb[76].mxu1 }
 0x353   :  { %v1385_v53 = vadd.f32 %v1337_v12, %v231_v26  ;;  %v1387_v33 = vadd.f32 %v1378_v41, %v342_v27  ;;  %v1339_v49 = vpop.f32.mrb[77].mxu0  ;;  %v1380_v4 = vpop.f32.mrb[77].mxu1 }
 0x354   :  { %v1386_v1 = vadd.f32 %v1339_v49, %v233_v47  ;;  %v1388_v40 = vadd.f32 %v1380_v4, %v344_v50  ;;  %v1341_v24 = vpop.f32.mrb[78].mxu0  ;;  %v1382_v39 = vpop.f32.mrb[78].mxu1 }
 0x355   :  { %v1479_v13 = vmul.f32 0.5, %v1385_v53  ;;  %v1342_v44 = vpop.f32.mrb[79].mxu0  ;;  %v1383_v45 = vpop.f32.mrb[79].mxu1 }
 0x356   :  { %v1483_v15 = vmul.f32 0.5, %v1386_v1  ;;  %v1488_v26 = vmul.f32 0.5, %v1388_v40 }
 0x357   :  { %4688 = vtanh.f32 %v1479_v13 }
 0x358   :  { %4690 = vtanh.f32 %v1483_v15 }
 0x359   :  { %4692 = vtanh.f32 %v1387_v33 }
 0x35a   :  { %v1427_v35 = vpop.f32.mrb[80].mxu0  ;;  %v1468_v48 = vpop.f32.mrb[80].mxu1 }
 0x35b   :  { %v1475_v8 = vadd.f32 %v1427_v35, %v503_v14  ;;  %v1477_v21 = vadd.f32 %v1468_v48, %v614_v17  ;;  %v1429_v59 = vpop.f32.mrb[81].mxu0  ;;  %v1470_v32 = vpop.f32.mrb[81].mxu1 }
 0x35c   :  { %v1476_v22 = vadd.f32 %v1429_v59, %v505_v46  ;;  %v1478_v9 = vadd.f32 %v1470_v32, %v616_v23  ;;  %v1431_v43 = vpop.f32.mrb[82].mxu0  ;;  %v1472_v36 = vpop.f32.mrb[82].mxu1 }
 0x35d   :  { %v1497_v11 = vmul.f32 0.5, %v1475_v8  ;;  %v1432_v10 = vpop.f32.mrb[83].mxu0  ;;  %v1473_v34 = vpop.f32.mrb[83].mxu1  ;;  %v5715_v43 = vld [vmem:[%s6424_s3 + $0xc] ss:$16 sps:$4 sm:$0xff]  }
 0x35e   :  { %v1501_v27 = vmul.f32 0.5, %v1476_v22  ;;  %v1506_v49 = vmul.f32 0.5, %v1478_v9  ;;  %v5723_v36 = vld [vmem:[%s6424_s3] ss:$16 sps:$4 sm:$0xff]   ;;  %v235_v10 = vadd.f32 %v5351_v16, %v5556_v42  ;;  %v346_v34 = vadd.f32 %v5357_v19, %v5560_v28 }
 0x35f   :  { %4694 = vtanh.f32 %v1497_v11  ;;  %v5729_v11 = vld [vmem:[%s6424_s3 + $0x8] ss:$16 sps:$4 sm:$0xff]  }
 0x360   :  { %4696 = vtanh.f32 %v1501_v27  ;;  %v348_v27 = vadd.f32 %v5359_v20, %v5562_v38  ;;  %v6522_v20 = vld [vmem:[#allocation92_spill] sm:$0xff] }
 0x361   :  { %v4689_v37 = vpop.eup %4688  ;;  %4698 = vtanh.f32 %v1488_v26  ;;  %v237_v26 = vadd.f32 %v5355_v18, %v5558_v30  ;;  %v6521_v18 = vld [vmem:[#allocation89_spill] sm:$0xff] }
 0x362   :  { %v4691_v63 = vpop.eup %4690  ;;  %v1481_v47 = vmul.f32 0.5, %v4689_v37  ;;  %4700 = vtanh.f32 %v1477_v21 }
 0x363   :  { %v1485_v50 = vmul.f32 0.5, %v4691_v63  ;;  %v4693_v41 = vpop.eup %4692  ;;  %4702 = vtanh.f32 %v1506_v49 }
 0x364   :  { %v1482_v12 = vadd.f32 0.5, %v1481_v47 }
 0x365   :  { %v1486_v53 = vadd.f32 0.5, %v1485_v50 }
 0x366   :  { %v1493_v33 = vmul.f32 %v4693_v41, %v1482_v12 }
 0x367   :  { %v1492_v4 = vmul.f32 %v1486_v53, %v5635_v5 }
 0x369   :  { %v4695_v1 = vpop.eup %4694  ;;  %v5687_v24 = vadd.f32 %v1493_v33, %v1492_v4 }
 0x36a   :  { %v4697_v40 = vpop.eup %4696  ;;  %v1499_v39 = vmul.f32 0.5, %v4695_v1  ;;  %v497_v1 = vadd.f32 %v6521_v18, %v5572_v7 }
 0x36b   :  { %4704 = vtanh.f32 %v5687_v24  ;;  %v1503_v13 = vmul.f32 0.5, %v4697_v40  ;;  %v4699_v44 = vpop.eup %4698  ;;  %v608_v40 = vadd.f32 %v6522_v20, %v5578_v25 }
 0x36c   :  { %v1500_v45 = vadd.f32 0.5, %v1499_v39  ;;  %v4701_v15 = vpop.eup %4700  ;;  %v1490_v23 = vmul.f32 0.5, %v4699_v44  ;;  %v6523_v39 = vld [vmem:[#allocation91_spill] sm:$0xff]  ;;  %v6524_v44 = vld [vmem:[#allocation93_spill] sm:$0xff] }
 0x36d   :  { %v1504_v14 = vadd.f32 0.5, %v1503_v13  ;;  %v4703_v5 = vpop.eup %4702  ;;  %v499_v13 = vadd.f32 %v6523_v39, %v5574_v29 }
 0x36e   :  { %v1511_v17 = vmul.f32 %v4701_v15, %v1500_v45  ;;  %v1491_v48 = vadd.f32 0.5, %v1490_v23  ;;  %v1508_v32 = vmul.f32 0.5, %v4703_v5  ;;  %v610_v45 = vadd.f32 %v6524_v44, %v5581_v6 }
 0x36f   :  { %v1510_v46 = vmul.f32 %v1504_v14, %v5639_v58 }
 0x370   :  { %v1509_v58 = vadd.f32 0.5, %v1508_v32 }
 0x371   :  { %v5691_v35 = vadd.f32 %v1511_v17, %v1510_v46 }
 0x373   :  { %4706 = vtanh.f32 %v5691_v35 }
 0x375   :  { %v4705_v8 = vpop.eup %4704 }
 0x376   :  { %v1496_v21 = vmul.f32 %v4705_v8, %v1491_v48 }
 0x378   :  { %v1523_v59 = vpack.c.bf16 %v1496_v21, %v1496_v21 }
 0x37a   :  { %4467 = vmatmul.mubr.msk.bf16.vlgmr.msra.gmra.mrb[84].mxu0 %vm800_vm3, %v1523_v59  ;;  %4469 = vmatmul.mubr.msk.bf16.vlgmr.msra.gmra.mrb[84].mxu1 %vm800_vm3, %v1523_v59 }
 0x37b   :  { %1618 = vmatpush1.bf16.msra.mxu0 %v5284_v60  ;;  %1659 = vmatpush1.bf16.msra.mxu1 %v5289_v61  ;;  %v5709_v61 = vld [vmem:[%s6424_s3 + $0x4] ss:$16 sps:$4 sm:$0xff]  }
 0x37c   :  { %4470 = vmatprep.subr.msk.bf16.mxu0 %vm804_vm2, %v5291_v62  ;;  %4472 = vmatprep.subr.msk.bf16.mxu1 %vm804_vm2, %v5293_v0 }
 0x37d   :  { %v4707_v22 = vpop.eup %4706  ;;  %1649 = vmatprep.mubr.bf16.mxu0 %v6520_v31  ;;  %1690 = vmatprep.mubr.bf16.mxu1 %v6520_v31 }
 0x37e   :  { %v1514_v9 = vmul.f32 %v4707_v22, %v1509_v58 }
 0x37f   :  { %1620 = vmatpush1.bf16.msra.mxu0 %v5302_v2  ;;  %1661 = vmatpush1.bf16.msra.mxu1 %v5307_v3 }
 0x380   :  { %v1613_v60 = vpack.c.bf16 %v1514_v9, %v1514_v9  ;;  %1751 = vmatprep.subr.bf16.mxu0 %v5709_v61  ;;  %1792 = vmatprep.subr.bf16.mxu1 %v5715_v43 }
 0x382   :  { %4471 = vmatmul.mubr.msk.bf16.vlgmr.msra.gmra.mrb[88].mxu0 %vm800_vm3, %v1613_v60  ;;  %4473 = vmatmul.mubr.msk.bf16.vlgmr.msra.gmra.mrb[88].mxu1 %vm800_vm3, %v1613_v60 }
 0x383   :  { %1752 = vmatpush1.bf16.msra.mxu0 %v5723_v36  ;;  %1793 = vmatpush1.bf16.msra.mxu1 %v5729_v11 }
 0x384   :  { %4474 = vmatprep.subr.msk.bf16.mxu0 %vm804_vm2, %v5203_v51  ;;  %4476 = vmatprep.subr.msk.bf16.mxu1 %vm804_vm2, %v5207_v52 }
 0x385   :  { %1783 = vmatprep.mubr.bf16.mxu0 %v6520_v31  ;;  %1824 = vmatprep.mubr.bf16.mxu1 %v6520_v31 }
 0x387   :  { %1754 = vmatpush1.bf16.msra.mxu0 %v5215_v54  ;;  %1795 = vmatpush1.bf16.msra.mxu1 %v5228_v56 }
 0x388   :  { %1841 = vmatprep.subr.bf16.mxu0 %v5220_v55  ;;  %1882 = vmatprep.subr.bf16.mxu1 %v5233_v57 }
 0x44d   :  { %v1561_v37 = vpop.f32.mrb[84].mxu0  ;;  %v1602_v63 = vpop.f32.mrb[84].mxu1 }
 0x44e   :  { %v1609_v47 = vadd.f32 %v1561_v37, %v235_v10  ;;  %v1611_v50 = vadd.f32 %v1602_v63, %v346_v34  ;;  %v1563_v12 = vpop.f32.mrb[85].mxu0  ;;  %v1604_v55 = vpop.f32.mrb[85].mxu1 }
 0x44f   :  { %v1610_v41 = vadd.f32 %v1563_v12, %v237_v26  ;;  %v1612_v57 = vadd.f32 %v1604_v55, %v348_v27  ;;  %v1565_v53 = vpop.f32.mrb[86].mxu0  ;;  %v1606_v33 = vpop.f32.mrb[86].mxu1 }
 0x450   :  { %v1703_v16 = vmul.f32 0.5, %v1609_v47  ;;  %v1566_v49 = vpop.f32.mrb[87].mxu0  ;;  %v1607_v4 = vpop.f32.mrb[87].mxu1 }
 0x451   :  { %v1707_v19 = vmul.f32 0.5, %v1610_v41  ;;  %v1712_v9 = vmul.f32 0.5, %v1612_v57 }
 0x452   :  { %4708 = vtanh.f32 %v1703_v16 }
 0x453   :  { %4710 = vtanh.f32 %v1707_v19 }
 0x454   :  { %4712 = vtanh.f32 %v1611_v50 }
 0x455   :  { %v1651_v15 = vpop.f32.mrb[88].mxu0  ;;  %v1692_v14 = vpop.f32.mrb[88].mxu1 }
 0x456   :  { %v1699_v17 = vadd.f32 %v1651_v15, %v497_v1  ;;  %v1701_v46 = vadd.f32 %v1692_v14, %v608_v40  ;;  %v1653_v23 = vpop.f32.mrb[89].mxu0  ;;  %v1694_v5 = vpop.f32.mrb[89].mxu1 }
 0x457   :  { %v1700_v48 = vadd.f32 %v1653_v23, %v499_v13  ;;  %v1702_v8 = vadd.f32 %v1694_v5, %v610_v45  ;;  %v1655_v21 = vpop.f32.mrb[90].mxu0  ;;  %v1696_v59 = vpop.f32.mrb[90].mxu1 }
 0x458   :  { %v1721_v32 = vmul.f32 0.5, %v1699_v17  ;;  %v1656_v58 = vpop.f32.mrb[91].mxu0  ;;  %v1697_v22 = vpop.f32.mrb[91].mxu1  ;;  %v5771_v17 = vld [vmem:[%s6425_s4] ss:$16 sps:$4 sm:$0xff]   ;;  %v6525_v59 = vld [vmem:[#allocation6_spill] sm:$0xff] }
 0x459   :  { %v1725_v60 = vmul.f32 0.5, %v1700_v48  ;;  %v1730_v12 = vmul.f32 0.5, %v1702_v8  ;;  %v5805_v8 = vld [vmem:[%s6425_s4 + $0x4] ss:$16 sps:$4 sm:$0xff]   ;;  %v5811_v21 = vld [vmem:[%s6425_s4 + $0xc] ss:$16 sps:$4 sm:$0xff]  }
 0x45a   :  { %4714 = vtanh.f32 %v1721_v32  ;;  %v241_v32 = vadd.f32 %v6525_v59, %v5556_v42  ;;  %v6526_v58 = vld [vmem:[#allocation8_spill] sm:$0xff] }
 0x45b   :  { %4716 = vtanh.f32 %v1725_v60  ;;  %v352_v22 = vadd.f32 %v6526_v58, %v5560_v28 }
 0x45c   :  { %v4709_v10 = vpop.eup %4708  ;;  %4718 = vtanh.f32 %v1712_v9  ;;  %v6527_v9 = vld [vmem:[#allocation7_spill] sm:$0xff] }
 0x45d   :  { %v4711_v34 = vpop.eup %4710  ;;  %v1705_v26 = vmul.f32 0.5, %v4709_v10  ;;  %4720 = vtanh.f32 %v1701_v46  ;;  %v243_v60 = vadd.f32 %v6527_v9, %v5558_v30  ;;  %v6528_v10 = vld [vmem:[#allocation10_spill] sm:$0xff] }
 0x45e   :  { %v1709_v27 = vmul.f32 0.5, %v4711_v34  ;;  %v4713_v63 = vpop.eup %4712  ;;  %4722 = vtanh.f32 %v1730_v12  ;;  %v354_v34 = vadd.f32 %v6528_v10, %v5562_v38 }
 0x45f   :  { %v1706_v37 = vadd.f32 0.5, %v1705_v26 }
 0x460   :  { %v1710_v47 = vadd.f32 0.5, %v1709_v27 }
 0x461   :  { %v1717_v50 = vmul.f32 %v4713_v63, %v1706_v37 }
 0x462   :  { %v1716_v55 = vmul.f32 %v1710_v47, %v5687_v24 }
 0x464   :  { %v4715_v41 = vpop.eup %4714  ;;  %v5759_v53 = vadd.f32 %v1717_v50, %v1716_v55 }
 0x465   :  { %v4717_v57 = vpop.eup %4716  ;;  %v1723_v33 = vmul.f32 0.5, %v4715_v41 }
 0x466   :  { %4724 = vtanh.f32 %v5759_v53  ;;  %v1727_v16 = vmul.f32 0.5, %v4717_v57  ;;  %v4719_v49 = vpop.eup %4718 }
 0x467   :  { %v1724_v4 = vadd.f32 0.5, %v1723_v33  ;;  %v4721_v19 = vpop.eup %4720  ;;  %v1714_v40 = vmul.f32 0.5, %v4719_v49 }
 0x468   :  { %v1728_v18 = vadd.f32 0.5, %v1727_v16  ;;  %v4723_v24 = vpop.eup %4722 }
 0x469   :  { %v1735_v1 = vmul.f32 %v4721_v19, %v1724_v4  ;;  %v1715_v13 = vadd.f32 0.5, %v1714_v40  ;;  %v1732_v14 = vmul.f32 0.5, %v4723_v24  ;;  %v6529_v19 = vld [vmem:[#allocation86_spill] sm:$0xff]  ;;  %v6531_v40 = vld [vmem:[#allocation87_spill] sm:$0xff] }
 0x46a   :  { %v1734_v20 = vmul.f32 %v1728_v18, %v5691_v35  ;;  %v5777_v35 = vld [vmem:[%s6425_s4 + $0x8] ss:$16 sps:$4 sm:$0xff]   ;;  %v493_v18 = vadd.f32 %v6529_v19, %v5572_v7  ;;  %v495_v24 = vadd.f32 %v6531_v40, %v5574_v29 }
 0x46b   :  { %v1733_v46 = vadd.f32 0.5, %v1732_v14 }
 0x46c   :  { %v5763_v39 = vadd.f32 %v1735_v1, %v1734_v20  ;;  %v6530_v1 = vld [vmem:[#allocation88_spill] sm:$0xff] }
 0x46d   :  { %v604_v20 = vadd.f32 %v6530_v1, %v5578_v25 }
 0x46e   :  { %4726 = vtanh.f32 %v5763_v39 }
 0x470   :  { %v4725_v44 = vpop.eup %4724 }
 0x471   :  { %v1720_v45 = vmul.f32 %v4725_v44, %v1715_v13  ;;  %v6532_v13 = vld [vmem:[#allocation90_spill] sm:$0xff] }
 0x472   :  { %v606_v44 = vadd.f32 %v6532_v13, %v5581_v6 }
 0x473   :  { %v1747_v15 = vpack.c.bf16 %v1720_v45, %v1720_v45 }
 0x475   :  { %4475 = vmatmul.mubr.msk.bf16.vlgmr.msra.gmra.mrb[92].mxu0 %vm800_vm3, %v1747_v15  ;;  %4477 = vmatmul.mubr.msk.bf16.vlgmr.msra.gmra.mrb[92].mxu1 %vm800_vm3, %v1747_v15 }
 0x476   :  { %1842 = vmatpush1.bf16.msra.mxu0 %v5771_v17  ;;  %1883 = vmatpush1.bf16.msra.mxu1 %v5777_v35 }
 0x477   :  { %4478 = vmatprep.subr.msk.bf16.mxu0 %vm804_vm2, %v5291_v62  ;;  %4480 = vmatprep.subr.msk.bf16.mxu1 %vm804_vm2, %v5293_v0 }
 0x478   :  { %v4727_v23 = vpop.eup %4726  ;;  %1873 = vmatprep.mubr.bf16.mxu0 %v6520_v31  ;;  %1914 = vmatprep.mubr.bf16.mxu1 %v6520_v31 }
 0x479   :  { %v1738_v5 = vmul.f32 %v4727_v23, %v1733_v46 }
 0x47a   :  { %1844 = vmatpush1.bf16.msra.mxu0 %v5302_v2  ;;  %1885 = vmatpush1.bf16.msra.mxu1 %v5307_v3 }
 0x47b   :  { %v1837_v48 = vpack.c.bf16 %v1738_v5, %v1738_v5  ;;  %1975 = vmatprep.subr.bf16.mxu0 %v5709_v61  ;;  %2016 = vmatprep.subr.bf16.mxu1 %v5715_v43 }
 0x47d   :  { %4479 = vmatmul.mubr.msk.bf16.vlgmr.msra.gmra.mrb[96].mxu0 %vm800_vm3, %v1837_v48  ;;  %4481 = vmatmul.mubr.msk.bf16.vlgmr.msra.gmra.mrb[96].mxu1 %vm800_vm3, %v1837_v48 }
 0x47e   :  { %1976 = vmatpush1.bf16.msra.mxu0 %v5723_v36  ;;  %2017 = vmatpush1.bf16.msra.mxu1 %v5729_v11 }
 0x47f   :  { %4482 = vmatprep.subr.msk.bf16.mxu0 %vm804_vm2, %v5203_v51  ;;  %4484 = vmatprep.subr.msk.bf16.mxu1 %vm804_vm2, %v5207_v52 }
 0x480   :  { %2007 = vmatprep.mubr.bf16.mxu0 %v6520_v31  ;;  %2048 = vmatprep.mubr.bf16.mxu1 %v6520_v31 }
 0x482   :  { %1978 = vmatpush1.bf16.msra.mxu0 %v5215_v54  ;;  %2019 = vmatpush1.bf16.msra.mxu1 %v5228_v56 }
 0x483   :  { %2065 = vmatprep.subr.bf16.mxu0 %v5805_v8  ;;  %2106 = vmatprep.subr.bf16.mxu1 %v5811_v21 }
 0x548   :  { %v1785_v26 = vpop.f32.mrb[92].mxu0  ;;  %v1826_v27 = vpop.f32.mrb[92].mxu1 }
 0x549   :  { %v1833_v37 = vadd.f32 %v1785_v26, %v241_v32  ;;  %v1835_v63 = vadd.f32 %v1826_v27, %v352_v22  ;;  %v1787_v47 = vpop.f32.mrb[93].mxu0  ;;  %v1828_v50 = vpop.f32.mrb[93].mxu1 }
 0x54a   :  { %v1834_v12 = vadd.f32 %v1787_v47, %v243_v60  ;;  %v1836_v55 = vadd.f32 %v1828_v50, %v354_v34  ;;  %v1789_v41 = vpop.f32.mrb[94].mxu0  ;;  %v1830_v57 = vpop.f32.mrb[94].mxu1 }
 0x54b   :  { %v1927_v33 = vmul.f32 0.5, %v1833_v37  ;;  %v1790_v16 = vpop.f32.mrb[95].mxu0  ;;  %v1831_v49 = vpop.f32.mrb[95].mxu1 }
 0x54c   :  { %v1931_v4 = vmul.f32 0.5, %v1834_v12  ;;  %v1936_v10 = vmul.f32 0.5, %v1836_v55 }
 0x54d   :  { %4728 = vtanh.f32 %v1927_v33 }
 0x54e   :  { %4730 = vtanh.f32 %v1931_v4 }
 0x54f   :  { %4732 = vtanh.f32 %v1835_v63 }
 0x550   :  { %v1875_v45 = vpop.f32.mrb[96].mxu0  ;;  %v1916_v15 = vpop.f32.mrb[96].mxu1 }
 0x551   :  { %v1923_v14 = vadd.f32 %v1875_v45, %v493_v18  ;;  %v1925_v46 = vadd.f32 %v1916_v15, %v604_v20  ;;  %v1877_v23 = vpop.f32.mrb[97].mxu0  ;;  %v1918_v5 = vpop.f32.mrb[97].mxu1 }
 0x552   :  { %v1924_v48 = vadd.f32 %v1877_v23, %v495_v24  ;;  %v1926_v59 = vadd.f32 %v1918_v5, %v606_v44  ;;  %v1879_v32 = vpop.f32.mrb[98].mxu0  ;;  %v1920_v58 = vpop.f32.mrb[98].mxu1 }
 0x553   :  { %v1945_v22 = vmul.f32 0.5, %v1923_v14  ;;  %v1880_v9 = vpop.f32.mrb[99].mxu0  ;;  %v1921_v60 = vpop.f32.mrb[99].mxu1  ;;  %v6533_v58 = vld [vmem:[#allocation9_spill] sm:$0xff] }
 0x554   :  { %v1949_v34 = vmul.f32 0.5, %v1924_v48  ;;  %v1954_v57 = vmul.f32 0.5, %v1926_v59  ;;  %v6534_v9 = vld [vmem:[#allocation12_spill] sm:$0xff] }
 0x555   :  { %4734 = vtanh.f32 %v1945_v22  ;;  %v245_v22 = vadd.f32 %v6533_v58, %v5556_v42  ;;  %v356_v60 = vadd.f32 %v6534_v9, %v5560_v28 }
 0x556   :  { %4736 = vtanh.f32 %v1949_v34 }
 0x557   :  { %v4729_v26 = vpop.eup %4728  ;;  %4738 = vtanh.f32 %v1936_v10  ;;  %v6535_v10 = vld [vmem:[#allocation11_spill] sm:$0xff] }
 0x558   :  { %v4731_v27 = vpop.eup %4730  ;;  %v1929_v37 = vmul.f32 0.5, %v4729_v26  ;;  %4740 = vtanh.f32 %v1925_v46  ;;  %v247_v34 = vadd.f32 %v6535_v10, %v5558_v30  ;;  %v6536_v26 = vld [vmem:[#allocation13_spill] sm:$0xff] }
 0x559   :  { %v1933_v63 = vmul.f32 0.5, %v4731_v27  ;;  %v4733_v50 = vpop.eup %4732  ;;  %4742 = vtanh.f32 %v1954_v57  ;;  %v358_v27 = vadd.f32 %v6536_v26, %v5562_v38 }
 0x55a   :  { %v1930_v47 = vadd.f32 0.5, %v1929_v37 }
 0x55b   :  { %v1934_v12 = vadd.f32 0.5, %v1933_v63 }
 0x55c   :  { %v1941_v41 = vmul.f32 %v4733_v50, %v1930_v47 }
 0x55d   :  { %v1940_v33 = vmul.f32 %v1934_v12, %v5759_v53 }
 0x55f   :  { %v4735_v16 = vpop.eup %4734  ;;  %v5831_v49 = vadd.f32 %v1941_v41, %v1940_v33 }
 0x560   :  { %v4737_v55 = vpop.eup %4736  ;;  %v1947_v4 = vmul.f32 0.5, %v4735_v16 }
 0x561   :  { %4744 = vtanh.f32 %v5831_v49  ;;  %v1951_v19 = vmul.f32 0.5, %v4737_v55  ;;  %v4739_v18 = vpop.eup %4738 }
 0x562   :  { %v1948_v1 = vadd.f32 0.5, %v1947_v4  ;;  %v4741_v20 = vpop.eup %4740  ;;  %v1938_v44 = vmul.f32 0.5, %v4739_v18 }
 0x563   :  { %v1952_v40 = vadd.f32 0.5, %v1951_v19  ;;  %v4743_v53 = vpop.eup %4742 }
 0x564   :  { %v1959_v24 = vmul.f32 %v4741_v20, %v1948_v1  ;;  %v1939_v15 = vadd.f32 0.5, %v1938_v44  ;;  %v1956_v5 = vmul.f32 0.5, %v4743_v53  ;;  %v6537_v20 = vld [vmem:[#allocation81_spill] sm:$0xff]  ;;  %v6539_v44 = vld [vmem:[#allocation83_spill] sm:$0xff] }
 0x565   :  { %v1958_v13 = vmul.f32 %v1952_v40, %v5763_v39  ;;  %v487_v40 = vadd.f32 %v6537_v20, %v5572_v7  ;;  %v489_v53 = vadd.f32 %v6539_v44, %v5574_v29 }
 0x566   :  { %v1957_v39 = vadd.f32 0.5, %v1956_v5 }
 0x567   :  { %v5835_v45 = vadd.f32 %v1959_v24, %v1958_v13  ;;  %v6538_v24 = vld [vmem:[#allocation84_spill] sm:$0xff] }
 0x568   :  { %v598_v13 = vadd.f32 %v6538_v24, %v5578_v25 }
 0x569   :  { %4746 = vtanh.f32 %v5835_v45 }
 0x56b   :  { %v4745_v14 = vpop.eup %4744 }
 0x56c   :  { %v1944_v46 = vmul.f32 %v4745_v14, %v1939_v15  ;;  %v6540_v15 = vld [vmem:[#allocation85_spill] sm:$0xff] }
 0x56d   :  { %v600_v14 = vadd.f32 %v6540_v15, %v5581_v6 }
 0x56e   :  { %v1971_v23 = vpack.c.bf16 %v1944_v46, %v1944_v46 }
 0x570   :  { %4483 = vmatmul.mubr.msk.bf16.vlgmr.msra.gmra.mrb[100].mxu0 %vm800_vm3, %v1971_v23  ;;  %4485 = vmatmul.mubr.msk.bf16.vlgmr.msra.gmra.mrb[100].mxu1 %vm800_vm3, %v1971_v23 }
 0x571   :  { %2066 = vmatpush1.bf16.msra.mxu0 %v5771_v17  ;;  %2107 = vmatpush1.bf16.msra.mxu1 %v5777_v35 }
 0x572   :  { %4486 = vmatprep.subr.msk.bf16.mxu0 %vm804_vm2, %v5291_v62  ;;  %4488 = vmatprep.subr.msk.bf16.mxu1 %vm804_vm2, %v5293_v0 }
 0x573   :  { %v4747_v48 = vpop.eup %4746  ;;  %2097 = vmatprep.mubr.bf16.mxu0 %v6520_v31  ;;  %2138 = vmatprep.mubr.bf16.mxu1 %v6520_v31 }
 0x574   :  { %v1962_v59 = vmul.f32 %v4747_v48, %v1957_v39 }
 0x575   :  { %2068 = vmatpush1.bf16.msra.mxu0 %v5302_v2  ;;  %2109 = vmatpush1.bf16.msra.mxu1 %v5307_v3 }
 0x576   :  { %v2061_v32 = vpack.c.bf16 %v1962_v59, %v1962_v59  ;;  %2199 = vmatprep.subr.bf16.mxu0 %v5709_v61  ;;  %2240 = vmatprep.subr.bf16.mxu1 %v5715_v43 }
 0x578   :  { %4487 = vmatmul.mubr.msk.bf16.vlgmr.msra.gmra.mrb[104].mxu0 %vm800_vm3, %v2061_v32  ;;  %4489 = vmatmul.mubr.msk.bf16.vlgmr.msra.gmra.mrb[104].mxu1 %vm800_vm3, %v2061_v32 }
 0x579   :  { %2200 = vmatpush1.bf16.msra.mxu0 %v5723_v36  ;;  %2241 = vmatpush1.bf16.msra.mxu1 %v5729_v11 }
 0x57a   :  { %4490 = vmatprep.subr.msk.bf16.mxu0 %vm804_vm2, %v5203_v51  ;;  %4492 = vmatprep.subr.msk.bf16.mxu1 %vm804_vm2, %v5207_v52 }
 0x57b   :  { %2231 = vmatprep.mubr.bf16.mxu0 %v6520_v31  ;;  %2272 = vmatprep.mubr.bf16.mxu1 %v6520_v31 }
 0x57d   :  { %2202 = vmatpush1.bf16.msra.mxu0 %v5215_v54  ;;  %2243 = vmatpush1.bf16.msra.mxu1 %v5228_v56 }
 0x57e   :  { %2289 = vmatprep.subr.bf16.mxu0 %v5805_v8  ;;  %2330 = vmatprep.subr.bf16.mxu1 %v5811_v21 }
 0x643   :  { %v2009_v37 = vpop.f32.mrb[100].mxu0  ;;  %v2050_v63 = vpop.f32.mrb[100].mxu1 }
 0x644   :  { %v2057_v47 = vadd.f32 %v2009_v37, %v245_v22  ;;  %v2059_v50 = vadd.f32 %v2050_v63, %v356_v60  ;;  %v2011_v12 = vpop.f32.mrb[101].mxu0  ;;  %v2052_v41 = vpop.f32.mrb[101].mxu1 }
 0x645   :  { %v2058_v57 = vadd.f32 %v2011_v12, %v247_v34  ;;  %v2060_v33 = vadd.f32 %v2052_v41, %v358_v27  ;;  %v2013_v16 = vpop.f32.mrb[102].mxu0  ;;  %v2054_v55 = vpop.f32.mrb[102].mxu1 }
 0x646   :  { %v2151_v4 = vmul.f32 0.5, %v2057_v47  ;;  %v2014_v19 = vpop.f32.mrb[103].mxu0  ;;  %v2055_v18 = vpop.f32.mrb[103].mxu1 }
 0x647   :  { %v2155_v1 = vmul.f32 0.5, %v2058_v57  ;;  %v2160_v26 = vmul.f32 0.5, %v2060_v33 }
 0x648   :  { %4748 = vtanh.f32 %v2151_v4 }
 0x649   :  { %4750 = vtanh.f32 %v2155_v1 }
 0x64a   :  { %4752 = vtanh.f32 %v2059_v50 }
 0x64b   :  { %v2099_v46 = vpop.f32.mrb[104].mxu0  ;;  %v2140_v23 = vpop.f32.mrb[104].mxu1 }
 0x64c   :  { %v2147_v5 = vadd.f32 %v2099_v46, %v487_v40  ;;  %v2149_v39 = vadd.f32 %v2140_v23, %v598_v13  ;;  %v2101_v48 = vpop.f32.mrb[105].mxu0  ;;  %v2142_v59 = vpop.f32.mrb[105].mxu1 }
 0x64d   :  { %v2148_v32 = vadd.f32 %v2101_v48, %v489_v53  ;;  %v2150_v58 = vadd.f32 %v2142_v59, %v600_v14  ;;  %v2103_v22 = vpop.f32.mrb[106].mxu0  ;;  %v2144_v9 = vpop.f32.mrb[106].mxu1 }
 0x64e   :  { %v2169_v60 = vmul.f32 0.5, %v2147_v5  ;;  %v2104_v10 = vpop.f32.mrb[107].mxu0  ;;  %v2145_v34 = vpop.f32.mrb[107].mxu1  ;;  %v6541_v9 = vld [vmem:[#allocation14_spill] sm:$0xff] }
 0x64f   :  { %v2173_v27 = vmul.f32 0.5, %v2148_v32  ;;  %v2178_v55 = vmul.f32 0.5, %v2150_v58  ;;  %v6542_v10 = vld [vmem:[#allocation16_spill] sm:$0xff] }
 0x650   :  { %4754 = vtanh.f32 %v2169_v60  ;;  %v251_v60 = vadd.f32 %v6541_v9, %v5556_v42  ;;  %v362_v34 = vadd.f32 %v6542_v10, %v5560_v28 }
 0x651   :  { %4756 = vtanh.f32 %v2173_v27 }
 0x652   :  { %v4749_v37 = vpop.eup %4748  ;;  %4758 = vtanh.f32 %v2160_v26  ;;  %v6543_v26 = vld [vmem:[#allocation15_spill] sm:$0xff] }
 0x653   :  { %v4751_v63 = vpop.eup %4750  ;;  %v2153_v47 = vmul.f32 0.5, %v4749_v37  ;;  %4760 = vtanh.f32 %v2149_v39  ;;  %v253_v27 = vadd.f32 %v6543_v26, %v5558_v30  ;;  %v6544_v37 = vld [vmem:[#allocation18_spill] sm:$0xff] }
 0x654   :  { %v2157_v50 = vmul.f32 0.5, %v4751_v63  ;;  %v4753_v41 = vpop.eup %4752  ;;  %4762 = vtanh.f32 %v2178_v55  ;;  %v364_v63 = vadd.f32 %v6544_v37, %v5562_v38 }
 0x655   :  { %v2154_v12 = vadd.f32 0.5, %v2153_v47 }
 0x656   :  { %v2158_v57 = vadd.f32 0.5, %v2157_v50 }
 0x657   :  { %v2165_v16 = vmul.f32 %v4753_v41, %v2154_v12 }
 0x658   :  { %v2164_v4 = vmul.f32 %v2158_v57, %v5831_v49 }
 0x65a   :  { %v4755_v19 = vpop.eup %4754  ;;  %v5883_v18 = vadd.f32 %v2165_v16, %v2164_v4 }
 0x65b   :  { %v4757_v33 = vpop.eup %4756  ;;  %v2171_v1 = vmul.f32 0.5, %v4755_v19 }
 0x65c   :  { %4764 = vtanh.f32 %v5883_v18  ;;  %v2175_v20 = vmul.f32 0.5, %v4757_v33  ;;  %v4759_v40 = vpop.eup %4758 }
 0x65d   :  { %v2172_v24 = vadd.f32 0.5, %v2171_v1  ;;  %v4761_v13 = vpop.eup %4760  ;;  %v2162_v14 = vmul.f32 0.5, %v4759_v40 }
 0x65e   :  { %v2176_v44 = vadd.f32 0.5, %v2175_v20  ;;  %v4763_v49 = vpop.eup %4762 }
 0x65f   :  { %v2183_v53 = vmul.f32 %v4761_v13, %v2172_v24  ;;  %v2163_v23 = vadd.f32 0.5, %v2162_v14  ;;  %v2180_v59 = vmul.f32 0.5, %v4763_v49  ;;  %v6545_v13 = vld [vmem:[#allocation78_spill] sm:$0xff]  ;;  %v6547_v14 = vld [vmem:[#allocation79_spill] sm:$0xff] }
 0x660   :  { %v2182_v15 = vmul.f32 %v2176_v44, %v5835_v45  ;;  %v483_v44 = vadd.f32 %v6545_v13, %v5572_v7  ;;  %v485_v49 = vadd.f32 %v6547_v14, %v5574_v29 }
 0x661   :  { %v2181_v45 = vadd.f32 0.5, %v2180_v59 }
 0x662   :  { %v5887_v46 = vadd.f32 %v2183_v53, %v2182_v15  ;;  %v6546_v53 = vld [vmem:[#allocation80_spill] sm:$0xff] }
 0x663   :  { %v594_v15 = vadd.f32 %v6546_v53, %v5578_v25 }
 0x664   :  { %4766 = vtanh.f32 %v5887_v46 }
 0x666   :  { %v4765_v5 = vpop.eup %4764 }
 0x667   :  { %v2168_v39 = vmul.f32 %v4765_v5, %v2163_v23  ;;  %v6548_v23 = vld [vmem:[#allocation82_spill] sm:$0xff] }
 0x668   :  { %v596_v5 = vadd.f32 %v6548_v23, %v5581_v6 }
 0x669   :  { %v2195_v48 = vpack.c.bf16 %v2168_v39, %v2168_v39 }
 0x66b   :  { %4491 = vmatmul.mubr.msk.bf16.vlgmr.msra.gmra.mrb[108].mxu0 %vm800_vm3, %v2195_v48  ;;  %4493 = vmatmul.mubr.msk.bf16.vlgmr.msra.gmra.mrb[108].mxu1 %vm800_vm3, %v2195_v48 }
 0x66c   :  { %2290 = vmatpush1.bf16.msra.mxu0 %v5771_v17  ;;  %2331 = vmatpush1.bf16.msra.mxu1 %v5777_v35 }
 0x66d   :  { %4494 = vmatprep.subr.msk.bf16.mxu0 %vm804_vm2, %v5291_v62  ;;  %4496 = vmatprep.subr.msk.bf16.mxu1 %vm804_vm2, %v5293_v0 }
 0x66e   :  { %v4767_v32 = vpop.eup %4766  ;;  %2321 = vmatprep.mubr.bf16.mxu0 %v6520_v31  ;;  %2362 = vmatprep.mubr.bf16.mxu1 %v6520_v31 }
 0x66f   :  { %v2186_v58 = vmul.f32 %v4767_v32, %v2181_v45 }
 0x670   :  { %2292 = vmatpush1.bf16.msra.mxu0 %v5302_v2  ;;  %2333 = vmatpush1.bf16.msra.mxu1 %v5307_v3 }
 0x671   :  { %v2285_v22 = vpack.c.bf16 %v2186_v58, %v2186_v58  ;;  %2423 = vmatprep.subr.bf16.mxu0 %v5709_v61  ;;  %2464 = vmatprep.subr.bf16.mxu1 %v5715_v43 }
 0x673   :  { %4495 = vmatmul.mubr.msk.bf16.vlgmr.msra.gmra.mrb[112].mxu0 %vm800_vm3, %v2285_v22  ;;  %4497 = vmatmul.mubr.msk.bf16.vlgmr.msra.gmra.mrb[112].mxu1 %vm800_vm3, %v2285_v22 }
 0x674   :  { %2424 = vmatpush1.bf16.msra.mxu0 %v5723_v36  ;;  %2465 = vmatpush1.bf16.msra.mxu1 %v5729_v11 }
 0x675   :  { %4498 = vmatprep.subr.msk.bf16.mxu0 %vm804_vm2, %v5203_v51  ;;  %4500 = vmatprep.subr.msk.bf16.mxu1 %vm804_vm2, %v5207_v52 }
 0x676   :  { %2455 = vmatprep.mubr.bf16.mxu0 %v6520_v31  ;;  %2496 = vmatprep.mubr.bf16.mxu1 %v6520_v31 }
 0x678   :  { %2426 = vmatpush1.bf16.msra.mxu0 %v5215_v54  ;;  %2467 = vmatpush1.bf16.msra.mxu1 %v5228_v56 }
 0x679   :  { %2513 = vmatprep.subr.bf16.mxu0 %v5805_v8  ;;  %2554 = vmatprep.subr.bf16.mxu1 %v5811_v21 }
 0x73e   :  { %v2233_v47 = vpop.f32.mrb[108].mxu0  ;;  %v2274_v50 = vpop.f32.mrb[108].mxu1 }
 0x73f   :  { %v2281_v12 = vadd.f32 %v2233_v47, %v251_v60  ;;  %v2283_v41 = vadd.f32 %v2274_v50, %v362_v34  ;;  %v2235_v57 = vpop.f32.mrb[109].mxu0  ;;  %v2276_v16 = vpop.f32.mrb[109].mxu1 }
 0x740   :  { %v2282_v55 = vadd.f32 %v2235_v57, %v253_v27  ;;  %v2284_v4 = vadd.f32 %v2276_v16, %v364_v63  ;;  %v2237_v19 = vpop.f32.mrb[110].mxu0  ;;  %v2278_v33 = vpop.f32.mrb[110].mxu1 }
 0x741   :  { %v2375_v1 = vmul.f32 0.5, %v2281_v12  ;;  %v2238_v20 = vpop.f32.mrb[111].mxu0  ;;  %v2279_v40 = vpop.f32.mrb[111].mxu1 }
 0x742   :  { %v2379_v24 = vmul.f32 0.5, %v2282_v55  ;;  %v2384_v37 = vmul.f32 0.5, %v2284_v4 }
 0x743   :  { %4768 = vtanh.f32 %v2375_v1 }
 0x744   :  { %4770 = vtanh.f32 %v2379_v24 }
 0x745   :  { %4772 = vtanh.f32 %v2283_v41 }
 0x746   :  { %v2323_v39 = vpop.f32.mrb[112].mxu0  ;;  %v2364_v48 = vpop.f32.mrb[112].mxu1 }
 0x747   :  { %v2371_v59 = vadd.f32 %v2323_v39, %v483_v44  ;;  %v2373_v45 = vadd.f32 %v2364_v48, %v594_v15  ;;  %v2325_v32 = vpop.f32.mrb[113].mxu0  ;;  %v2366_v58 = vpop.f32.mrb[113].mxu1 }
 0x748   :  { %v2372_v22 = vadd.f32 %v2325_v32, %v485_v49  ;;  %v2374_v9 = vadd.f32 %v2366_v58, %v596_v5  ;;  %v2327_v60 = vpop.f32.mrb[114].mxu0  ;;  %v2368_v10 = vpop.f32.mrb[114].mxu1 }
 0x749   :  { %v2393_v34 = vmul.f32 0.5, %v2371_v59  ;;  %v2328_v26 = vpop.f32.mrb[115].mxu0  ;;  %v2369_v27 = vpop.f32.mrb[115].mxu1  ;;  %v6551_v10 = vld [vmem:[#allocation19_spill] sm:$0xff] }
 0x74a   :  { %v2397_v63 = vmul.f32 0.5, %v2372_v22  ;;  %v2402_v33 = vmul.f32 0.5, %v2374_v9  ;;  %v6552_v26 = vld [vmem:[#allocation21_spill] sm:$0xff] }
 0x74b   :  { %4774 = vtanh.f32 %v2393_v34  ;;  %v257_v34 = vadd.f32 %v6551_v10, %v5558_v30  ;;  %v368_v27 = vadd.f32 %v6552_v26, %v5562_v38 }
 0x74c   :  { %4776 = vtanh.f32 %v2397_v63 }
 0x74d   :  { %v4769_v47 = vpop.eup %4768  ;;  %4778 = vtanh.f32 %v2384_v37 }
 0x74e   :  { %v4771_v50 = vpop.eup %4770  ;;  %v2377_v12 = vmul.f32 0.5, %v4769_v47  ;;  %4780 = vtanh.f32 %v2373_v45 }
 0x74f   :  { %v2381_v41 = vmul.f32 0.5, %v4771_v50  ;;  %v4773_v16 = vpop.eup %4772  ;;  %4782 = vtanh.f32 %v2402_v33 }
 0x750   :  { %v2378_v57 = vadd.f32 0.5, %v2377_v12 }
 0x751   :  { %v2382_v55 = vadd.f32 0.5, %v2381_v41 }
 0x752   :  { %v2389_v19 = vmul.f32 %v4773_v16, %v2378_v57 }
 0x753   :  { %v2388_v1 = vmul.f32 %v2382_v55, %v5883_v18 }
 0x755   :  { %v4775_v20 = vpop.eup %4774  ;;  %v5935_v40 = vadd.f32 %v2389_v19, %v2388_v1 }
 0x756   :  { %v4777_v4 = vpop.eup %4776  ;;  %v2395_v24 = vmul.f32 0.5, %v4775_v20 }
 0x757   :  { %4784 = vtanh.f32 %v5935_v40  ;;  %v2399_v13 = vmul.f32 0.5, %v4777_v4  ;;  %v4779_v44 = vpop.eup %4778 }
 0x758   :  { %v2396_v53 = vadd.f32 0.5, %v2395_v24  ;;  %v4781_v15 = vpop.eup %4780  ;;  %v2386_v5 = vmul.f32 0.5, %v4779_v44  ;;  %v6553_v24 = vld [vmem:[#allocation73_spill] sm:$0xff]  ;;  %v6554_v44 = vld [vmem:[#allocation76_spill] sm:$0xff] }
 0x759   :  { %v2400_v14 = vadd.f32 0.5, %v2399_v13  ;;  %v4783_v18 = vpop.eup %4782  ;;  %v477_v13 = vadd.f32 %v6553_v24, %v5572_v7 }
 0x75a   :  { %v2407_v49 = vmul.f32 %v4781_v15, %v2396_v53  ;;  %v2387_v48 = vadd.f32 0.5, %v2386_v5  ;;  %v2404_v58 = vmul.f32 0.5, %v4783_v18  ;;  %v588_v53 = vadd.f32 %v6554_v44, %v5578_v25  ;;  %v6555_v15 = vld [vmem:[#allocation75_spill] sm:$0xff] }
 0x75b   :  { %v2406_v23 = vmul.f32 %v2400_v14, %v5887_v46  ;;  %v479_v14 = vadd.f32 %v6555_v15, %v5574_v29 }
 0x75c   :  { %v2405_v46 = vadd.f32 0.5, %v2404_v58 }
 0x75d   :  { %v5939_v39 = vadd.f32 %v2407_v49, %v2406_v23  ;;  %v6556_v49 = vld [vmem:[#allocation77_spill] sm:$0xff] }
 0x75e   :  { %v590_v23 = vadd.f32 %v6556_v49, %v5581_v6 }
 0x75f   :  { %4786 = vtanh.f32 %v5939_v39 }
 0x761   :  { %v4785_v59 = vpop.eup %4784 }
 0x762   :  { %v2392_v45 = vmul.f32 %v4785_v59, %v2387_v48 }
 0x764   :  { %v2419_v32 = vpack.c.bf16 %v2392_v45, %v2392_v45 }
 0x766   :  { %4499 = vmatmul.mubr.msk.bf16.vlgmr.msra.gmra.mrb[116].mxu0 %vm800_vm3, %v2419_v32  ;;  %4501 = vmatmul.mubr.msk.bf16.vlgmr.msra.gmra.mrb[116].mxu1 %vm800_vm3, %v2419_v32 }
 0x767   :  { %2514 = vmatpush1.bf16.msra.mxu0 %v5771_v17  ;;  %2555 = vmatpush1.bf16.msra.mxu1 %v5777_v35 }
 0x768   :  { %4502 = vmatprep.subr.msk.bf16.mxu0 %vm804_vm2, %v5291_v62  ;;  %4504 = vmatprep.subr.msk.bf16.mxu1 %vm804_vm2, %v5293_v0 }
 0x769   :  { %v4787_v22 = vpop.eup %4786  ;;  %2545 = vmatprep.mubr.bf16.mxu0 %v6520_v31  ;;  %2586 = vmatprep.mubr.bf16.mxu1 %v6520_v31 }
 0x76a   :  { %v2410_v9 = vmul.f32 %v4787_v22, %v2405_v46 }
 0x76b   :  { %2516 = vmatpush1.bf16.msra.mxu0 %v5302_v2  ;;  %2557 = vmatpush1.bf16.msra.mxu1 %v5307_v3 }
 0x76c   :  { %v2509_v60 = vpack.c.bf16 %v2410_v9, %v2410_v9  ;;  %2647 = vmatprep.subr.bf16.mxu0 %v5709_v61  ;;  %2688 = vmatprep.subr.bf16.mxu1 %v5715_v43  ;;  %v6549_v61 = vld [vmem:[#allocation17_spill] sm:$0xff] }
 0x76d   :  { %v255_v43 = vadd.f32 %v6549_v61, %v5556_v42 }
 0x76e   :  { %4503 = vmatmul.mubr.msk.bf16.vlgmr.msra.gmra.mrb[120].mxu0 %vm800_vm3, %v2509_v60  ;;  %4505 = vmatmul.mubr.msk.bf16.vlgmr.msra.gmra.mrb[120].mxu1 %vm800_vm3, %v2509_v60 }
 0x76f   :  { %2648 = vmatpush1.bf16.msra.mxu0 %v5723_v36  ;;  %2689 = vmatpush1.bf16.msra.mxu1 %v5729_v11  ;;  %v6550_v36 = vld [vmem:[#allocation20_spill] sm:$0xff] }
 0x770   :  { %4506 = vmatprep.subr.msk.bf16.mxu0 %vm804_vm2, %v5203_v51  ;;  %4508 = vmatprep.subr.msk.bf16.mxu1 %vm804_vm2, %v5207_v52  ;;  %v366_v11 = vadd.f32 %v6550_v36, %v5560_v28 }
 0x771   :  { %2679 = vmatprep.mubr.bf16.mxu0 %v6520_v31  ;;  %2720 = vmatprep.mubr.bf16.mxu1 %v6520_v31 }
 0x773   :  { %2650 = vmatpush1.bf16.msra.mxu0 %v5215_v54  ;;  %2691 = vmatpush1.bf16.msra.mxu1 %v5228_v56 }
 0x774   :  { %2737 = vmatprep.subr.bf16.mxu0 %v5805_v8  ;;  %2778 = vmatprep.subr.bf16.mxu1 %v5811_v21 }
 0x839   :  { %v2457_v37 = vpop.f32.mrb[116].mxu0  ;;  %v2498_v63 = vpop.f32.mrb[116].mxu1 }
 0x83a   :  { %v2505_v47 = vadd.f32 %v2457_v37, %v255_v43  ;;  %v2507_v50 = vadd.f32 %v2498_v63, %v366_v11  ;;  %v2459_v12 = vpop.f32.mrb[117].mxu0  ;;  %v2500_v41 = vpop.f32.mrb[117].mxu1 }
 0x83b   :  { %v2506_v57 = vadd.f32 %v2459_v12, %v257_v34  ;;  %v2508_v16 = vadd.f32 %v2500_v41, %v368_v27  ;;  %v2461_v55 = vpop.f32.mrb[118].mxu0  ;;  %v2502_v19 = vpop.f32.mrb[118].mxu1 }
 0x83c   :  { %v2599_v33 = vmul.f32 0.5, %v2505_v47  ;;  %v2462_v1 = vpop.f32.mrb[119].mxu0  ;;  %v2503_v20 = vpop.f32.mrb[119].mxu1 }
 0x83d   :  { %v2603_v4 = vmul.f32 0.5, %v2506_v57  ;;  %v2608_v36 = vmul.f32 0.5, %v2508_v16 }
 0x83e   :  { %4788 = vtanh.f32 %v2599_v33 }
 0x83f   :  { %4790 = vtanh.f32 %v2603_v4 }
 0x840   :  { %4792 = vtanh.f32 %v2507_v50 }
 0x841   :  { %v2547_v5 = vpop.f32.mrb[120].mxu0  ;;  %v2588_v18 = vpop.f32.mrb[120].mxu1 }
 0x842   :  { %v2595_v48 = vadd.f32 %v2547_v5, %v477_v13  ;;  %v2597_v59 = vadd.f32 %v2588_v18, %v588_v53  ;;  %v2549_v45 = vpop.f32.mrb[121].mxu0  ;;  %v2590_v32 = vpop.f32.mrb[121].mxu1 }
 0x843   :  { %v2596_v58 = vadd.f32 %v2549_v45, %v479_v14  ;;  %v2598_v46 = vadd.f32 %v2590_v32, %v590_v23  ;;  %v2551_v22 = vpop.f32.mrb[122].mxu0  ;;  %v2592_v9 = vpop.f32.mrb[122].mxu1  ;;  %v6015_v45 = vld [vmem:[%s6424_s3 + $0xc] ss:$16 sps:$4 sm:$0xff]   ;;  %v6023_v32 = vld [vmem:[%s6424_s3] ss:$16 sps:$4 sm:$0xff]  }
 0x844   :  { %v2617_v60 = vmul.f32 0.5, %v2595_v48  ;;  %v2552_v61 = vpop.f32.mrb[123].mxu0  ;;  %v2593_v43 = vpop.f32.mrb[123].mxu1  ;;  %v6558_v9 = vld [vmem:[#allocation24_spill] sm:$0xff] }
 0x845   :  { %v2621_v11 = vmul.f32 0.5, %v2596_v58  ;;  %v2626_v12 = vmul.f32 0.5, %v2598_v46  ;;  %v6029_v58 = vld [vmem:[%s6424_s3 + $0x8] ss:$16 sps:$4 sm:$0xff]   ;;  %v6559_v61 = vld [vmem:[#allocation23_spill] sm:$0xff] }
 0x846   :  { %4794 = vtanh.f32 %v2617_v60  ;;  %v6557_v46 = vld [vmem:[#allocation22_spill] sm:$0xff]  ;;  %v372_v60 = vadd.f32 %v6558_v9, %v5560_v28  ;;  %v263_v43 = vadd.f32 %v6559_v61, %v5558_v30 }
 0x847   :  { %4796 = vtanh.f32 %v2621_v11  ;;  %v261_v22 = vadd.f32 %v6557_v46, %v5556_v42 }
 0x848   :  { %v4789_v10 = vpop.eup %4788  ;;  %4798 = vtanh.f32 %v2608_v36  ;;  %v6560_v36 = vld [vmem:[#allocation26_spill] sm:$0xff] }
 0x849   :  { %v4791_v34 = vpop.eup %4790  ;;  %v2601_v26 = vmul.f32 0.5, %v4789_v10  ;;  %4800 = vtanh.f32 %v2597_v59  ;;  %v374_v11 = vadd.f32 %v6560_v36, %v5562_v38 }
 0x84a   :  { %v2605_v27 = vmul.f32 0.5, %v4791_v34  ;;  %v4793_v63 = vpop.eup %4792  ;;  %4802 = vtanh.f32 %v2626_v12 }
 0x84b   :  { %v2602_v37 = vadd.f32 0.5, %v2601_v26 }
 0x84c   :  { %v2606_v47 = vadd.f32 0.5, %v2605_v27 }
 0x84d   :  { %v2613_v50 = vmul.f32 %v4793_v63, %v2602_v37 }
 0x84e   :  { %v2612_v41 = vmul.f32 %v2606_v47, %v5935_v40 }
 0x850   :  { %v4795_v57 = vpop.eup %4794  ;;  %v5987_v55 = vadd.f32 %v2613_v50, %v2612_v41 }
 0x851   :  { %v4797_v16 = vpop.eup %4796  ;;  %v2619_v19 = vmul.f32 0.5, %v4795_v57 }
 0x852   :  { %4804 = vtanh.f32 %v5987_v55  ;;  %v2623_v33 = vmul.f32 0.5, %v4797_v16  ;;  %v4799_v1 = vpop.eup %4798 }
 0x853   :  { %v2620_v20 = vadd.f32 0.5, %v2619_v19  ;;  %v4801_v4 = vpop.eup %4800  ;;  %v2610_v53 = vmul.f32 0.5, %v4799_v1  ;;  %v6561_v19 = vld [vmem:[#allocation70_spill] sm:$0xff]  ;;  %v6562_v1 = vld [vmem:[#allocation72_spill] sm:$0xff] }
 0x854   :  { %v2624_v24 = vadd.f32 0.5, %v2623_v33  ;;  %v4803_v40 = vpop.eup %4802  ;;  %v473_v33 = vadd.f32 %v6561_v19, %v5572_v7 }
 0x855   :  { %v2631_v13 = vmul.f32 %v4801_v4, %v2620_v20  ;;  %v2611_v14 = vadd.f32 0.5, %v2610_v53  ;;  %v2628_v18 = vmul.f32 0.5, %v4803_v40  ;;  %v584_v20 = vadd.f32 %v6562_v1, %v5578_v25  ;;  %v6563_v4 = vld [vmem:[#allocation71_spill] sm:$0xff] }
 0x856   :  { %v2630_v44 = vmul.f32 %v2624_v24, %v5939_v39  ;;  %v475_v24 = vadd.f32 %v6563_v4, %v5574_v29 }
 0x857   :  { %v2629_v39 = vadd.f32 0.5, %v2628_v18 }
 0x858   :  { %v5991_v15 = vadd.f32 %v2631_v13, %v2630_v44  ;;  %v6564_v13 = vld [vmem:[#allocation74_spill] sm:$0xff] }
 0x859   :  { %v586_v44 = vadd.f32 %v6564_v13, %v5581_v6 }
 0x85a   :  { %4806 = vtanh.f32 %v5991_v15 }
 0x85c   :  { %v4805_v49 = vpop.eup %4804 }
 0x85d   :  { %v2616_v23 = vmul.f32 %v4805_v49, %v2611_v14 }
 0x85f   :  { %v2643_v5 = vpack.c.bf16 %v2616_v23, %v2616_v23 }
 0x861   :  { %4507 = vmatmul.mubr.msk.bf16.vlgmr.msra.gmra.mrb[124].mxu0 %vm800_vm3, %v2643_v5  ;;  %4509 = vmatmul.mubr.msk.bf16.vlgmr.msra.gmra.mrb[124].mxu1 %vm800_vm3, %v2643_v5 }
 0x862   :  { %2738 = vmatpush1.bf16.msra.mxu0 %v5771_v17  ;;  %2779 = vmatpush1.bf16.msra.mxu1 %v5777_v35  ;;  %v6009_v35 = vld [vmem:[%s6424_s3 + $0x4] ss:$16 sps:$4 sm:$0xff]  }
 0x863   :  { %4510 = vmatprep.subr.msk.bf16.mxu0 %vm804_vm2, %v5291_v62  ;;  %4512 = vmatprep.subr.msk.bf16.mxu1 %vm804_vm2, %v5293_v0 }
 0x864   :  { %v4807_v48 = vpop.eup %4806  ;;  %2769 = vmatprep.mubr.bf16.mxu0 %v6520_v31  ;;  %2810 = vmatprep.mubr.bf16.mxu1 %v6520_v31 }
 0x865   :  { %v2634_v59 = vmul.f32 %v4807_v48, %v2629_v39 }
 0x866   :  { %2740 = vmatpush1.bf16.msra.mxu0 %v5302_v2  ;;  %2781 = vmatpush1.bf16.msra.mxu1 %v5307_v3 }
 0x867   :  { %v2733_v17 = vpack.c.bf16 %v2634_v59, %v2634_v59  ;;  %2871 = vmatprep.subr.bf16.mxu0 %v6009_v35  ;;  %2912 = vmatprep.subr.bf16.mxu1 %v6015_v45 }
 0x869   :  { %4511 = vmatmul.mubr.msk.bf16.vlgmr.msra.gmra.mrb[128].mxu0 %vm800_vm3, %v2733_v17  ;;  %4513 = vmatmul.mubr.msk.bf16.vlgmr.msra.gmra.mrb[128].mxu1 %vm800_vm3, %v2733_v17 }
 0x86a   :  { %2872 = vmatpush1.bf16.msra.mxu0 %v6023_v32  ;;  %2913 = vmatpush1.bf16.msra.mxu1 %v6029_v58 }
 0x86b   :  { %4514 = vmatprep.subr.msk.bf16.mxu0 %vm804_vm2, %v5203_v51  ;;  %4516 = vmatprep.subr.msk.bf16.mxu1 %vm804_vm2, %v5207_v52 }
 0x86c   :  { %2903 = vmatprep.mubr.bf16.mxu0 %v6520_v31  ;;  %2944 = vmatprep.mubr.bf16.mxu1 %v6520_v31 }
 0x86e   :  { %2874 = vmatpush1.bf16.msra.mxu0 %v5215_v54  ;;  %2915 = vmatpush1.bf16.msra.mxu1 %v5228_v56 }
 0x86f   :  { %2961 = vmatprep.subr.bf16.mxu0 %v5805_v8  ;;  %3002 = vmatprep.subr.bf16.mxu1 %v5811_v21 }
 0x934   :  { %v2681_v10 = vpop.f32.mrb[124].mxu0  ;;  %v2722_v34 = vpop.f32.mrb[124].mxu1 }
 0x935   :  { %v2729_v26 = vadd.f32 %v2681_v10, %v261_v22  ;;  %v2731_v27 = vadd.f32 %v2722_v34, %v372_v60  ;;  %v2683_v37 = vpop.f32.mrb[125].mxu0  ;;  %v2724_v8 = vpop.f32.mrb[125].mxu1 }
 0x936   :  { %v2730_v63 = vadd.f32 %v2683_v37, %v263_v43  ;;  %v2732_v21 = vadd.f32 %v2724_v8, %v374_v11  ;;  %v2685_v47 = vpop.f32.mrb[126].mxu0  ;;  %v2726_v50 = vpop.f32.mrb[126].mxu1 }
 0x937   :  { %v2823_v12 = vmul.f32 0.5, %v2729_v26  ;;  %v2686_v41 = vpop.f32.mrb[127].mxu0  ;;  %v2727_v57 = vpop.f32.mrb[127].mxu1 }
 0x938   :  { %v2827_v16 = vmul.f32 0.5, %v2730_v63  ;;  %v2832_v9 = vmul.f32 0.5, %v2732_v21 }
 0x939   :  { %4808 = vtanh.f32 %v2823_v12 }
 0x93a   :  { %4810 = vtanh.f32 %v2827_v16 }
 0x93b   :  { %4812 = vtanh.f32 %v2731_v27 }
 0x93c   :  { %v2771_v53 = vpop.f32.mrb[128].mxu0  ;;  %v2812_v40 = vpop.f32.mrb[128].mxu1 }
 0x93d   :  { %v2819_v14 = vadd.f32 %v2771_v53, %v473_v33  ;;  %v2821_v49 = vadd.f32 %v2812_v40, %v584_v20  ;;  %v2773_v23 = vpop.f32.mrb[129].mxu0  ;;  %v2814_v5 = vpop.f32.mrb[129].mxu1 }
 0x93e   :  { %v2820_v18 = vadd.f32 %v2773_v23, %v475_v24  ;;  %v2822_v39 = vadd.f32 %v2814_v5, %v586_v44  ;;  %v2775_v48 = vpop.f32.mrb[130].mxu0  ;;  %v2816_v59 = vpop.f32.mrb[130].mxu1 }
 0x93f   :  { %v2841_v17 = vmul.f32 0.5, %v2819_v14  ;;  %v2776_v46 = vpop.f32.mrb[131].mxu0  ;;  %v2817_v22 = vpop.f32.mrb[131].mxu1  ;;  %v6071_v14 = vld [vmem:[%s6425_s4] ss:$16 sps:$4 sm:$0xff]  }
 0x940   :  { %v2845_v60 = vmul.f32 0.5, %v2820_v18  ;;  %v2850_v37 = vmul.f32 0.5, %v2822_v39  ;;  %v6105_v39 = vld [vmem:[%s6425_s4 + $0x4] ss:$16 sps:$4 sm:$0xff]   ;;  %v6111_v48 = vld [vmem:[%s6425_s4 + $0xc] ss:$16 sps:$4 sm:$0xff]  }
 0x941   :  { %4814 = vtanh.f32 %v2841_v17  ;;  %v6565_v59 = vld [vmem:[#allocation25_spill] sm:$0xff]  ;;  %v6566_v46 = vld [vmem:[#allocation28_spill] sm:$0xff] }
 0x942   :  { %4816 = vtanh.f32 %v2845_v60  ;;  %v265_v17 = vadd.f32 %v6565_v59, %v5556_v42  ;;  %v376_v22 = vadd.f32 %v6566_v46, %v5560_v28 }
 0x943   :  { %v4809_v61 = vpop.eup %4808  ;;  %4818 = vtanh.f32 %v2832_v9  ;;  %v6567_v9 = vld [vmem:[#allocation27_spill] sm:$0xff] }
 0x944   :  { %v4811_v43 = vpop.eup %4810  ;;  %v2825_v36 = vmul.f32 0.5, %v4809_v61  ;;  %4820 = vtanh.f32 %v2821_v49  ;;  %v267_v60 = vadd.f32 %v6567_v9, %v5558_v30  ;;  %v6568_v61 = vld [vmem:[#allocation29_spill] sm:$0xff] }
 0x945   :  { %v2829_v11 = vmul.f32 0.5, %v4811_v43  ;;  %v4813_v34 = vpop.eup %4812  ;;  %4822 = vtanh.f32 %v2850_v37  ;;  %v378_v43 = vadd.f32 %v6568_v61, %v5562_v38 }
 0x946   :  { %v2826_v10 = vadd.f32 0.5, %v2825_v36 }
 0x947   :  { %v2830_v26 = vadd.f32 0.5, %v2829_v11 }
 0x948   :  { %v2837_v27 = vmul.f32 %v4813_v34, %v2826_v10 }
 0x949   :  { %v2836_v8 = vmul.f32 %v2830_v26, %v5987_v55 }
 0x94b   :  { %v4815_v63 = vpop.eup %4814  ;;  %v6059_v47 = vadd.f32 %v2837_v27, %v2836_v8 }
 0x94c   :  { %v4817_v21 = vpop.eup %4816  ;;  %v2843_v50 = vmul.f32 0.5, %v4815_v63 }
 0x94d   :  { %4824 = vtanh.f32 %v6059_v47  ;;  %v2847_v12 = vmul.f32 0.5, %v4817_v21  ;;  %v4819_v41 = vpop.eup %4818 }
 0x94e   :  { %v2844_v57 = vadd.f32 0.5, %v2843_v50  ;;  %v4821_v16 = vpop.eup %4820  ;;  %v2834_v20 = vmul.f32 0.5, %v4819_v41 }
 0x94f   :  { %v2848_v19 = vadd.f32 0.5, %v2847_v12  ;;  %v4823_v55 = vpop.eup %4822 }
 0x950   :  { %v2855_v33 = vmul.f32 %v4821_v16, %v2844_v57  ;;  %v2835_v24 = vadd.f32 0.5, %v2834_v20  ;;  %v2852_v40 = vmul.f32 0.5, %v4823_v55  ;;  %v6569_v16 = vld [vmem:[#allocation65_spill] sm:$0xff]  ;;  %v6571_v20 = vld [vmem:[#allocation67_spill] sm:$0xff] }
 0x951   :  { %v2854_v1 = vmul.f32 %v2848_v19, %v5991_v15  ;;  %v6077_v15 = vld [vmem:[%s6425_s4 + $0x8] ss:$16 sps:$4 sm:$0xff]   ;;  %v467_v19 = vadd.f32 %v6569_v16, %v5572_v7  ;;  %v469_v55 = vadd.f32 %v6571_v20, %v5574_v29 }
 0x952   :  { %v2853_v49 = vadd.f32 0.5, %v2852_v40 }
 0x953   :  { %v6063_v4 = vadd.f32 %v2855_v33, %v2854_v1  ;;  %v6570_v33 = vld [vmem:[#allocation68_spill] sm:$0xff] }
 0x954   :  { %v578_v1 = vadd.f32 %v6570_v33, %v5578_v25 }
 0x955   :  { %4826 = vtanh.f32 %v6063_v4 }
 0x957   :  { %v4825_v13 = vpop.eup %4824 }
 0x958   :  { %v2840_v44 = vmul.f32 %v4825_v13, %v2835_v24  ;;  %v6572_v24 = vld [vmem:[#allocation69_spill] sm:$0xff] }
 0x959   :  { %v580_v13 = vadd.f32 %v6572_v24, %v5581_v6 }
 0x95a   :  { %v2867_v53 = vpack.c.bf16 %v2840_v44, %v2840_v44 }
 0x95c   :  { %4515 = vmatmul.mubr.msk.bf16.vlgmr.msra.gmra.mrb[132].mxu0 %vm800_vm3, %v2867_v53  ;;  %4517 = vmatmul.mubr.msk.bf16.vlgmr.msra.gmra.mrb[132].mxu1 %vm800_vm3, %v2867_v53 }
 0x95d   :  { %2962 = vmatpush1.bf16.msra.mxu0 %v6071_v14  ;;  %3003 = vmatpush1.bf16.msra.mxu1 %v6077_v15 }
 0x95e   :  { %4518 = vmatprep.subr.msk.bf16.mxu0 %vm804_vm2, %v5291_v62  ;;  %4520 = vmatprep.subr.msk.bf16.mxu1 %vm804_vm2, %v5293_v0 }
 0x95f   :  { %v4827_v23 = vpop.eup %4826  ;;  %2993 = vmatprep.mubr.bf16.mxu0 %v6520_v31  ;;  %3034 = vmatprep.mubr.bf16.mxu1 %v6520_v31 }
 0x960   :  { %v2858_v5 = vmul.f32 %v4827_v23, %v2853_v49 }
 0x961   :  { %2964 = vmatpush1.bf16.msra.mxu0 %v5302_v2  ;;  %3005 = vmatpush1.bf16.msra.mxu1 %v5307_v3 }
 0x962   :  { %v2957_v18 = vpack.c.bf16 %v2858_v5, %v2858_v5  ;;  %3095 = vmatprep.subr.bf16.mxu0 %v6009_v35  ;;  %3136 = vmatprep.subr.bf16.mxu1 %v6015_v45 }
 0x964   :  { %4519 = vmatmul.mubr.msk.bf16.vlgmr.msra.gmra.mrb[136].mxu0 %vm800_vm3, %v2957_v18  ;;  %4521 = vmatmul.mubr.msk.bf16.vlgmr.msra.gmra.mrb[136].mxu1 %vm800_vm3, %v2957_v18 }
 0x965   :  { %3096 = vmatpush1.bf16.msra.mxu0 %v6023_v32  ;;  %3137 = vmatpush1.bf16.msra.mxu1 %v6029_v58 }
 0x966   :  { %4522 = vmatprep.subr.msk.bf16.mxu0 %vm804_vm2, %v5203_v51  ;;  %4524 = vmatprep.subr.msk.bf16.mxu1 %vm804_vm2, %v5207_v52 }
 0x967   :  { %3127 = vmatprep.mubr.bf16.mxu0 %v6520_v31  ;;  %3168 = vmatprep.mubr.bf16.mxu1 %v6520_v31 }
 0x969   :  { %3098 = vmatpush1.bf16.msra.mxu0 %v5215_v54  ;;  %3139 = vmatpush1.bf16.msra.mxu1 %v5228_v56 }
 0x96a   :  { %3185 = vmatprep.subr.bf16.mxu0 %v6105_v39  ;;  %3226 = vmatprep.subr.bf16.mxu1 %v6111_v48 }
 0xa2f   :  { %v2905_v36 = vpop.f32.mrb[132].mxu0  ;;  %v2946_v11 = vpop.f32.mrb[132].mxu1 }
 0xa30   :  { %v2953_v10 = vadd.f32 %v2905_v36, %v265_v17  ;;  %v2955_v34 = vadd.f32 %v2946_v11, %v376_v22  ;;  %v2907_v26 = vpop.f32.mrb[133].mxu0  ;;  %v2948_v27 = vpop.f32.mrb[133].mxu1 }
 0xa31   :  { %v2954_v37 = vadd.f32 %v2907_v26, %v267_v60  ;;  %v2956_v8 = vadd.f32 %v2948_v27, %v378_v43  ;;  %v2909_v63 = vpop.f32.mrb[134].mxu0  ;;  %v2950_v21 = vpop.f32.mrb[134].mxu1 }
 0xa32   :  { %v3047_v50 = vmul.f32 0.5, %v2953_v10  ;;  %v2910_v12 = vpop.f32.mrb[135].mxu0  ;;  %v2951_v41 = vpop.f32.mrb[135].mxu1 }
 0xa33   :  { %v3051_v57 = vmul.f32 0.5, %v2954_v37  ;;  %v3056_v61 = vmul.f32 0.5, %v2956_v8 }
 0xa34   :  { %4828 = vtanh.f32 %v3047_v50 }
 0xa35   :  { %4830 = vtanh.f32 %v3051_v57 }
 0xa36   :  { %4832 = vtanh.f32 %v2955_v34 }
 0xa37   :  { %v2995_v44 = vpop.f32.mrb[136].mxu0  ;;  %v3036_v53 = vpop.f32.mrb[136].mxu1 }
 0xa38   :  { %v3043_v40 = vadd.f32 %v2995_v44, %v467_v19  ;;  %v3045_v49 = vadd.f32 %v3036_v53, %v578_v1  ;;  %v2997_v23 = vpop.f32.mrb[137].mxu0  ;;  %v3038_v5 = vpop.f32.mrb[137].mxu1 }
 0xa39   :  { %v3044_v18 = vadd.f32 %v2997_v23, %v469_v55  ;;  %v3046_v59 = vadd.f32 %v3038_v5, %v580_v13  ;;  %v2999_v17 = vpop.f32.mrb[138].mxu0  ;;  %v3040_v46 = vpop.f32.mrb[138].mxu1 }
 0xa3a   :  { %v3065_v22 = vmul.f32 0.5, %v3043_v40  ;;  %v3000_v9 = vpop.f32.mrb[139].mxu0  ;;  %v3041_v60 = vpop.f32.mrb[139].mxu1  ;;  %v6573_v46 = vld [vmem:[#allocation30_spill] sm:$0xff] }
 0xa3b   :  { %v3069_v43 = vmul.f32 0.5, %v3044_v18  ;;  %v3074_v21 = vmul.f32 0.5, %v3046_v59  ;;  %v6574_v9 = vld [vmem:[#allocation32_spill] sm:$0xff] }
 0xa3c   :  { %4834 = vtanh.f32 %v3065_v22  ;;  %v271_v22 = vadd.f32 %v6573_v46, %v5556_v42  ;;  %v382_v60 = vadd.f32 %v6574_v9, %v5560_v28 }
 0xa3d   :  { %4836 = vtanh.f32 %v3069_v43 }
 0xa3e   :  { %v4829_v36 = vpop.eup %4828  ;;  %4838 = vtanh.f32 %v3056_v61  ;;  %v6575_v61 = vld [vmem:[#allocation31_spill] sm:$0xff] }
 0xa3f   :  { %v4831_v11 = vpop.eup %4830  ;;  %v3049_v10 = vmul.f32 0.5, %v4829_v36  ;;  %4840 = vtanh.f32 %v3045_v49  ;;  %v273_v43 = vadd.f32 %v6575_v61, %v5558_v30  ;;  %v6576_v36 = vld [vmem:[#allocation34_spill] sm:$0xff] }
 0xa40   :  { %v3053_v34 = vmul.f32 0.5, %v4831_v11  ;;  %v4833_v27 = vpop.eup %4832  ;;  %4842 = vtanh.f32 %v3074_v21  ;;  %v384_v11 = vadd.f32 %v6576_v36, %v5562_v38 }
 0xa41   :  { %v3050_v26 = vadd.f32 0.5, %v3049_v10 }
 0xa42   :  { %v3054_v37 = vadd.f32 0.5, %v3053_v34 }
 0xa43   :  { %v3061_v63 = vmul.f32 %v4833_v27, %v3050_v26 }
 0xa44   :  { %v3060_v50 = vmul.f32 %v3054_v37, %v6059_v47 }
 0xa46   :  { %v4835_v12 = vpop.eup %4834  ;;  %v6131_v41 = vadd.f32 %v3061_v63, %v3060_v50 }
 0xa47   :  { %v4837_v8 = vpop.eup %4836  ;;  %v3067_v57 = vmul.f32 0.5, %v4835_v12 }
 0xa48   :  { %4844 = vtanh.f32 %v6131_v41  ;;  %v3071_v16 = vmul.f32 0.5, %v4837_v8  ;;  %v4839_v19 = vpop.eup %4838 }
 0xa49   :  { %v3068_v33 = vadd.f32 0.5, %v3067_v57  ;;  %v4841_v1 = vpop.eup %4840  ;;  %v3058_v13 = vmul.f32 0.5, %v4839_v19 }
 0xa4a   :  { %v3072_v20 = vadd.f32 0.5, %v3071_v16  ;;  %v4843_v47 = vpop.eup %4842 }
 0xa4b   :  { %v3079_v55 = vmul.f32 %v4841_v1, %v3068_v33  ;;  %v3059_v53 = vadd.f32 0.5, %v3058_v13  ;;  %v3076_v5 = vmul.f32 0.5, %v4843_v47  ;;  %v6577_v1 = vld [vmem:[#allocation62_spill] sm:$0xff]  ;;  %v6579_v13 = vld [vmem:[#allocation63_spill] sm:$0xff] }
 0xa4c   :  { %v3078_v24 = vmul.f32 %v3072_v20, %v6063_v4  ;;  %v463_v20 = vadd.f32 %v6577_v1, %v5572_v7  ;;  %v465_v47 = vadd.f32 %v6579_v13, %v5574_v29 }
 0xa4d   :  { %v3077_v4 = vadd.f32 0.5, %v3076_v5 }
 0xa4e   :  { %v6135_v44 = vadd.f32 %v3079_v55, %v3078_v24  ;;  %v6578_v55 = vld [vmem:[#allocation64_spill] sm:$0xff] }
 0xa4f   :  { %v574_v24 = vadd.f32 %v6578_v55, %v5578_v25 }
 0xa50   :  { %4846 = vtanh.f32 %v6135_v44 }
 0xa52   :  { %v4845_v40 = vpop.eup %4844 }
 0xa53   :  { %v3064_v49 = vmul.f32 %v4845_v40, %v3059_v53  ;;  %v6580_v53 = vld [vmem:[#allocation66_spill] sm:$0xff] }
 0xa54   :  { %v576_v40 = vadd.f32 %v6580_v53, %v5581_v6 }
 0xa55   :  { %v3091_v23 = vpack.c.bf16 %v3064_v49, %v3064_v49 }
 0xa57   :  { %4523 = vmatmul.mubr.msk.bf16.vlgmr.msra.gmra.mrb[140].mxu0 %vm800_vm3, %v3091_v23  ;;  %4525 = vmatmul.mubr.msk.bf16.vlgmr.msra.gmra.mrb[140].mxu1 %vm800_vm3, %v3091_v23 }
 0xa58   :  { %3186 = vmatpush1.bf16.msra.mxu0 %v6071_v14  ;;  %3227 = vmatpush1.bf16.msra.mxu1 %v6077_v15 }
 0xa59   :  { %4526 = vmatprep.subr.msk.bf16.mxu0 %vm804_vm2, %v5291_v62  ;;  %4528 = vmatprep.subr.msk.bf16.mxu1 %vm804_vm2, %v5293_v0 }
 0xa5a   :  { %v4847_v18 = vpop.eup %4846  ;;  %3217 = vmatprep.mubr.bf16.mxu0 %v6520_v31  ;;  %3258 = vmatprep.mubr.bf16.mxu1 %v6520_v31 }
 0xa5b   :  { %v3082_v59 = vmul.f32 %v4847_v18, %v3077_v4 }
 0xa5c   :  { %3188 = vmatpush1.bf16.msra.mxu0 %v5302_v2  ;;  %3229 = vmatpush1.bf16.msra.mxu1 %v5307_v3 }
 0xa5d   :  { %v3181_v17 = vpack.c.bf16 %v3082_v59, %v3082_v59  ;;  %3319 = vmatprep.subr.bf16.mxu0 %v6009_v35  ;;  %3360 = vmatprep.subr.bf16.mxu1 %v6015_v45 }
 0xa5f   :  { %4527 = vmatmul.mubr.msk.bf16.vlgmr.msra.gmra.mrb[144].mxu0 %vm800_vm3, %v3181_v17  ;;  %4529 = vmatmul.mubr.msk.bf16.vlgmr.msra.gmra.mrb[144].mxu1 %vm800_vm3, %v3181_v17 }
 0xa60   :  { %3320 = vmatpush1.bf16.msra.mxu0 %v6023_v32  ;;  %3361 = vmatpush1.bf16.msra.mxu1 %v6029_v58 }
 0xa61   :  { %4530 = vmatprep.subr.msk.bf16.mxu0 %vm804_vm2, %v5203_v51  ;;  %4532 = vmatprep.subr.msk.bf16.mxu1 %vm804_vm2, %v5207_v52 }
 0xa62   :  { %3351 = vmatprep.mubr.bf16.mxu0 %v6520_v31  ;;  %3392 = vmatprep.mubr.bf16.mxu1 %v6520_v31 }
 0xa64   :  { %3322 = vmatpush1.bf16.msra.mxu0 %v5215_v54  ;;  %3363 = vmatpush1.bf16.msra.mxu1 %v5228_v56 }
 0xa65   :  { %3409 = vmatprep.subr.bf16.mxu0 %v6105_v39  ;;  %3450 = vmatprep.subr.bf16.mxu1 %v6111_v48 }
 0xb2a   :  { %v3129_v10 = vpop.f32.mrb[140].mxu0  ;;  %v3170_v34 = vpop.f32.mrb[140].mxu1 }
 0xb2b   :  { %v3177_v26 = vadd.f32 %v3129_v10, %v271_v22  ;;  %v3179_v27 = vadd.f32 %v3170_v34, %v382_v60  ;;  %v3131_v37 = vpop.f32.mrb[141].mxu0  ;;  %v3172_v63 = vpop.f32.mrb[141].mxu1 }
 0xb2c   :  { %v3178_v21 = vadd.f32 %v3131_v37, %v273_v43  ;;  %v3180_v50 = vadd.f32 %v3172_v63, %v384_v11  ;;  %v3133_v12 = vpop.f32.mrb[142].mxu0  ;;  %v3174_v8 = vpop.f32.mrb[142].mxu1 }
 0xb2d   :  { %v3271_v57 = vmul.f32 0.5, %v3177_v26  ;;  %v3134_v16 = vpop.f32.mrb[143].mxu0  ;;  %v3175_v19 = vpop.f32.mrb[143].mxu1 }
 0xb2e   :  { %v3275_v33 = vmul.f32 0.5, %v3178_v21  ;;  %v3280_v36 = vmul.f32 0.5, %v3180_v50 }
 0xb2f   :  { %4848 = vtanh.f32 %v3271_v57 }
 0xb30   :  { %4850 = vtanh.f32 %v3275_v33 }
 0xb31   :  { %4852 = vtanh.f32 %v3179_v27 }
 0xb32   :  { %v3219_v49 = vpop.f32.mrb[144].mxu0  ;;  %v3260_v23 = vpop.f32.mrb[144].mxu1 }
 0xb33   :  { %v3267_v5 = vadd.f32 %v3219_v49, %v463_v20  ;;  %v3269_v4 = vadd.f32 %v3260_v23, %v574_v24  ;;  %v3221_v18 = vpop.f32.mrb[145].mxu0  ;;  %v3262_v59 = vpop.f32.mrb[145].mxu1 }
 0xb34   :  { %v3268_v17 = vadd.f32 %v3221_v18, %v465_v47  ;;  %v3270_v46 = vadd.f32 %v3262_v59, %v576_v40  ;;  %v3223_v22 = vpop.f32.mrb[146].mxu0  ;;  %v3264_v9 = vpop.f32.mrb[146].mxu1 }
 0xb35   :  { %v3289_v60 = vmul.f32 0.5, %v3267_v5  ;;  %v3224_v61 = vpop.f32.mrb[147].mxu0  ;;  %v3265_v43 = vpop.f32.mrb[147].mxu1  ;;  %v6581_v9 = vld [vmem:[#allocation33_spill] sm:$0xff] }
 0xb36   :  { %v3293_v11 = vmul.f32 0.5, %v3268_v17  ;;  %v3298_v8 = vmul.f32 0.5, %v3270_v46  ;;  %v6582_v61 = vld [vmem:[#allocation36_spill] sm:$0xff] }
 0xb37   :  { %4854 = vtanh.f32 %v3289_v60  ;;  %v275_v60 = vadd.f32 %v6581_v9, %v5556_v42  ;;  %v386_v43 = vadd.f32 %v6582_v61, %v5560_v28 }
 0xb38   :  { %4856 = vtanh.f32 %v3293_v11 }
 0xb39   :  { %v4849_v10 = vpop.eup %4848  ;;  %4858 = vtanh.f32 %v3280_v36  ;;  %v6583_v36 = vld [vmem:[#allocation35_spill] sm:$0xff] }
 0xb3a   :  { %v4851_v34 = vpop.eup %4850  ;;  %v3273_v26 = vmul.f32 0.5, %v4849_v10  ;;  %4860 = vtanh.f32 %v3269_v4  ;;  %v277_v11 = vadd.f32 %v6583_v36, %v5558_v30  ;;  %v6584_v10 = vld [vmem:[#allocation37_spill] sm:$0xff] }
 0xb3b   :  { %v3277_v27 = vmul.f32 0.5, %v4851_v34  ;;  %v4853_v63 = vpop.eup %4852  ;;  %4862 = vtanh.f32 %v3298_v8  ;;  %v388_v34 = vadd.f32 %v6584_v10, %v5562_v38 }
 0xb3c   :  { %v3274_v37 = vadd.f32 0.5, %v3273_v26 }
 0xb3d   :  { %v3278_v21 = vadd.f32 0.5, %v3277_v27 }
 0xb3e   :  { %v3285_v12 = vmul.f32 %v4853_v63, %v3274_v37 }
 0xb3f   :  { %v3284_v57 = vmul.f32 %v3278_v21, %v6131_v41 }
 0xb41   :  { %v4855_v16 = vpop.eup %4854  ;;  %v6183_v19 = vadd.f32 %v3285_v12, %v3284_v57 }
 0xb42   :  { %v4857_v50 = vpop.eup %4856  ;;  %v3291_v33 = vmul.f32 0.5, %v4855_v16 }
 0xb43   :  { %4864 = vtanh.f32 %v6183_v19  ;;  %v3295_v1 = vmul.f32 0.5, %v4857_v50  ;;  %v4859_v20 = vpop.eup %4858 }
 0xb44   :  { %v3292_v55 = vadd.f32 0.5, %v3291_v33  ;;  %v4861_v24 = vpop.eup %4860  ;;  %v3282_v40 = vmul.f32 0.5, %v4859_v20 }
 0xb45   :  { %v3296_v13 = vadd.f32 0.5, %v3295_v1  ;;  %v4863_v41 = vpop.eup %4862 }
 0xb46   :  { %v3303_v47 = vmul.f32 %v4861_v24, %v3292_v55  ;;  %v3283_v23 = vadd.f32 0.5, %v3282_v40  ;;  %v3300_v59 = vmul.f32 0.5, %v4863_v41  ;;  %v6585_v24 = vld [vmem:[#allocation57_spill] sm:$0xff]  ;;  %v6587_v40 = vld [vmem:[#allocation59_spill] sm:$0xff] }
 0xb47   :  { %v3302_v53 = vmul.f32 %v3296_v13, %v6135_v44  ;;  %v457_v13 = vadd.f32 %v6585_v24, %v5572_v7  ;;  %v459_v41 = vadd.f32 %v6587_v40, %v5574_v29 }
 0xb48   :  { %v3301_v44 = vadd.f32 0.5, %v3300_v59 }
 0xb49   :  { %v6187_v49 = vadd.f32 %v3303_v47, %v3302_v53  ;;  %v6586_v47 = vld [vmem:[#allocation60_spill] sm:$0xff] }
 0xb4a   :  { %v568_v53 = vadd.f32 %v6586_v47, %v5578_v25 }
 0xb4b   :  { %4866 = vtanh.f32 %v6187_v49 }
 0xb4d   :  { %v4865_v5 = vpop.eup %4864 }
 0xb4e   :  { %v3288_v4 = vmul.f32 %v4865_v5, %v3283_v23  ;;  %v6588_v23 = vld [vmem:[#allocation61_spill] sm:$0xff] }
 0xb4f   :  { %v570_v5 = vadd.f32 %v6588_v23, %v5581_v6 }
 0xb50   :  { %v3315_v18 = vpack.c.bf16 %v3288_v4, %v3288_v4 }
 0xb52   :  { %4531 = vmatmul.mubr.msk.bf16.vlgmr.msra.gmra.mrb[148].mxu0 %vm800_vm3, %v3315_v18  ;;  %4533 = vmatmul.mubr.msk.bf16.vlgmr.msra.gmra.mrb[148].mxu1 %vm800_vm3, %v3315_v18 }
 0xb53   :  { %3410 = vmatpush1.bf16.msra.mxu0 %v6071_v14  ;;  %3451 = vmatpush1.bf16.msra.mxu1 %v6077_v15 }
 0xb54   :  { %4534 = vmatprep.subr.msk.bf16.mxu0 %vm804_vm2, %v5291_v62  ;;  %4536 = vmatprep.subr.msk.bf16.mxu1 %vm804_vm2, %v5293_v0 }
 0xb55   :  { %v4867_v17 = vpop.eup %4866  ;;  %3441 = vmatprep.mubr.bf16.mxu0 %v6520_v31  ;;  %3482 = vmatprep.mubr.bf16.mxu1 %v6520_v31 }
 0xb56   :  { %v3306_v46 = vmul.f32 %v4867_v17, %v3301_v44 }
 0xb57   :  { %3412 = vmatpush1.bf16.msra.mxu0 %v5302_v2  ;;  %3453 = vmatpush1.bf16.msra.mxu1 %v5307_v3 }
 0xb58   :  { %v3405_v22 = vpack.c.bf16 %v3306_v46, %v3306_v46  ;;  %3543 = vmatprep.subr.bf16.mxu0 %v6009_v35  ;;  %3584 = vmatprep.subr.bf16.mxu1 %v6015_v45 }
 0xb5a   :  { %4535 = vmatmul.mubr.msk.bf16.vlgmr.msra.gmra.mrb[152].mxu0 %vm800_vm3, %v3405_v22  ;;  %4537 = vmatmul.mubr.msk.bf16.vlgmr.msra.gmra.mrb[152].mxu1 %vm800_vm3, %v3405_v22 }
 0xb5b   :  { %3544 = vmatpush1.bf16.msra.mxu0 %v6023_v32  ;;  %3585 = vmatpush1.bf16.msra.mxu1 %v6029_v58 }
 0xb5c   :  { %4538 = vmatprep.subr.msk.bf16.mxu0 %vm804_vm2, %v5203_v51  ;;  %4540 = vmatprep.subr.msk.bf16.mxu1 %vm804_vm2, %v5207_v52 }
 0xb5d   :  { %3575 = vmatprep.mubr.bf16.mxu0 %v6520_v31  ;;  %3616 = vmatprep.mubr.bf16.mxu1 %v6520_v31 }
 0xb5f   :  { %3546 = vmatpush1.bf16.msra.mxu0 %v5215_v54  ;;  %3587 = vmatpush1.bf16.msra.mxu1 %v5228_v56 }
 0xb60   :  { %3633 = vmatprep.subr.bf16.mxu0 %v6105_v39  ;;  %3674 = vmatprep.subr.bf16.mxu1 %v6111_v48 }
 0xc25   :  { %v3353_v26 = vpop.f32.mrb[148].mxu0  ;;  %v3394_v27 = vpop.f32.mrb[148].mxu1 }
 0xc26   :  { %v3401_v37 = vadd.f32 %v3353_v26, %v275_v60  ;;  %v3403_v63 = vadd.f32 %v3394_v27, %v386_v43  ;;  %v3355_v21 = vpop.f32.mrb[149].mxu0  ;;  %v3396_v12 = vpop.f32.mrb[149].mxu1 }
 0xc27   :  { %v3402_v8 = vadd.f32 %v3355_v21, %v277_v11  ;;  %v3404_v57 = vadd.f32 %v3396_v12, %v388_v34  ;;  %v3357_v16 = vpop.f32.mrb[150].mxu0  ;;  %v3398_v50 = vpop.f32.mrb[150].mxu1 }
 0xc28   :  { %v3495_v33 = vmul.f32 0.5, %v3401_v37  ;;  %v3358_v1 = vpop.f32.mrb[151].mxu0  ;;  %v3399_v20 = vpop.f32.mrb[151].mxu1 }
 0xc29   :  { %v3499_v55 = vmul.f32 0.5, %v3402_v8  ;;  %v3504_v10 = vmul.f32 0.5, %v3404_v57 }
 0xc2a   :  { %4868 = vtanh.f32 %v3495_v33 }
 0xc2b   :  { %4870 = vtanh.f32 %v3499_v55 }
 0xc2c   :  { %4872 = vtanh.f32 %v3403_v63 }
 0xc2d   :  { %v3443_v4 = vpop.f32.mrb[152].mxu0  ;;  %v3484_v18 = vpop.f32.mrb[152].mxu1 }
 0xc2e   :  { %v3491_v59 = vadd.f32 %v3443_v4, %v457_v13  ;;  %v3493_v44 = vadd.f32 %v3484_v18, %v568_v53  ;;  %v3445_v17 = vpop.f32.mrb[153].mxu0  ;;  %v3486_v46 = vpop.f32.mrb[153].mxu1 }
 0xc2f   :  { %v3492_v22 = vadd.f32 %v3445_v17, %v459_v41  ;;  %v3494_v9 = vadd.f32 %v3486_v46, %v570_v5  ;;  %v3447_v60 = vpop.f32.mrb[154].mxu0  ;;  %v3488_v61 = vpop.f32.mrb[154].mxu1 }
 0xc30   :  { %v3513_v43 = vmul.f32 0.5, %v3491_v59  ;;  %v3448_v36 = vpop.f32.mrb[155].mxu0  ;;  %v3489_v11 = vpop.f32.mrb[155].mxu1  ;;  %v6591_v61 = vld [vmem:[#allocation39_spill] sm:$0xff] }
 0xc31   :  { %v3517_v34 = vmul.f32 0.5, %v3492_v22  ;;  %v3522_v50 = vmul.f32 0.5, %v3494_v9  ;;  %v6592_v36 = vld [vmem:[#allocation42_spill] sm:$0xff] }
 0xc32   :  { %4874 = vtanh.f32 %v3513_v43  ;;  %v283_v43 = vadd.f32 %v6591_v61, %v5558_v30  ;;  %v394_v11 = vadd.f32 %v6592_v36, %v5562_v38 }
 0xc33   :  { %4876 = vtanh.f32 %v3517_v34 }
 0xc34   :  { %v4869_v26 = vpop.eup %4868  ;;  %4878 = vtanh.f32 %v3504_v10 }
 0xc35   :  { %v4871_v27 = vpop.eup %4870  ;;  %v3497_v37 = vmul.f32 0.5, %v4869_v26  ;;  %4880 = vtanh.f32 %v3493_v44 }
 0xc36   :  { %v3501_v63 = vmul.f32 0.5, %v4871_v27  ;;  %v4873_v12 = vpop.eup %4872  ;;  %4882 = vtanh.f32 %v3522_v50 }
 0xc37   :  { %v3498_v21 = vadd.f32 0.5, %v3497_v37 }
 0xc38   :  { %v3502_v8 = vadd.f32 0.5, %v3501_v63 }
 0xc39   :  { %v3509_v16 = vmul.f32 %v4873_v12, %v3498_v21 }
 0xc3a   :  { %v3508_v33 = vmul.f32 %v3502_v8, %v6183_v19 }
 0xc3c   :  { %v4875_v1 = vpop.eup %4874  ;;  %v6235_v20 = vadd.f32 %v3509_v16, %v3508_v33 }
 0xc3d   :  { %v4877_v57 = vpop.eup %4876  ;;  %v3515_v55 = vmul.f32 0.5, %v4875_v1 }
 0xc3e   :  { %4884 = vtanh.f32 %v6235_v20  ;;  %v3519_v24 = vmul.f32 0.5, %v4877_v57  ;;  %v4879_v13 = vpop.eup %4878 }
 0xc3f   :  { %v3516_v47 = vadd.f32 0.5, %v3515_v55  ;;  %v4881_v53 = vpop.eup %4880  ;;  %v3506_v5 = vmul.f32 0.5, %v4879_v13  ;;  %v6593_v55 = vld [vmem:[#allocation54_spill] sm:$0xff]  ;;  %v6594_v13 = vld [vmem:[#allocation56_spill] sm:$0xff] }
 0xc40   :  { %v3520_v40 = vadd.f32 0.5, %v3519_v24  ;;  %v4883_v19 = vpop.eup %4882  ;;  %v453_v24 = vadd.f32 %v6593_v55, %v5572_v7 }
 0xc41   :  { %v3527_v41 = vmul.f32 %v4881_v53, %v3516_v47  ;;  %v3507_v18 = vadd.f32 0.5, %v3506_v5  ;;  %v3524_v46 = vmul.f32 0.5, %v4883_v19  ;;  %v564_v47 = vadd.f32 %v6594_v13, %v5578_v25  ;;  %v6595_v53 = vld [vmem:[#allocation55_spill] sm:$0xff] }
 0xc42   :  { %v3526_v23 = vmul.f32 %v3520_v40, %v6187_v49  ;;  %v455_v40 = vadd.f32 %v6595_v53, %v5574_v29 }
 0xc43   :  { %v3525_v49 = vadd.f32 0.5, %v3524_v46 }
 0xc44   :  { %v6239_v4 = vadd.f32 %v3527_v41, %v3526_v23  ;;  %v6596_v41 = vld [vmem:[#allocation58_spill] sm:$0xff] }
 0xc45   :  { %v566_v23 = vadd.f32 %v6596_v41, %v5581_v6 }
 0xc46   :  { %4886 = vtanh.f32 %v6239_v4 }
 0xc48   :  { %v4885_v59 = vpop.eup %4884 }
 0xc49   :  { %v3512_v44 = vmul.f32 %v4885_v59, %v3507_v18 }
 0xc4b   :  { %v3539_v17 = vpack.c.bf16 %v3512_v44, %v3512_v44 }
 0xc4d   :  { %4539 = vmatmul.mubr.msk.bf16.vlgmr.msra.gmra.mrb[156].mxu0 %vm800_vm3, %v3539_v17  ;;  %4541 = vmatmul.mubr.msk.bf16.vlgmr.msra.gmra.mrb[156].mxu1 %vm800_vm3, %v3539_v17 }
 0xc4e   :  { %3634 = vmatpush1.bf16.msra.mxu0 %v6071_v14  ;;  %3675 = vmatpush1.bf16.msra.mxu1 %v6077_v15 }
 0xc4f   :  { %4542 = vmatprep.subr.msk.bf16.mxu0 %vm804_vm2, %v5291_v62  ;;  %4544 = vmatprep.subr.msk.bf16.mxu1 %vm804_vm2, %v5293_v0 }
 0xc50   :  { %v4887_v22 = vpop.eup %4886  ;;  %3665 = vmatprep.mubr.bf16.mxu0 %v6520_v31  ;;  %3706 = vmatprep.mubr.bf16.mxu1 %v6520_v31 }
 0xc51   :  { %v3530_v9 = vmul.f32 %v4887_v22, %v3525_v49 }
 0xc52   :  { %3636 = vmatpush1.bf16.msra.mxu0 %v5302_v2  ;;  %3677 = vmatpush1.bf16.msra.mxu1 %v5307_v3 }
 0xc53   :  { %v3629_v60 = vpack.c.bf16 %v3530_v9, %v3530_v9  ;;  %3767 = vmatprep.subr.bf16.mxu0 %v6009_v35  ;;  %3808 = vmatprep.subr.bf16.mxu1 %v6015_v45  ;;  %v6589_v35 = vld [vmem:[#allocation38_spill] sm:$0xff] }
 0xc54   :  { %v281_v45 = vadd.f32 %v6589_v35, %v5556_v42 }
 0xc55   :  { %4543 = vmatmul.mubr.msk.bf16.vlgmr.msra.gmra.mrb[160].mxu0 %vm800_vm3, %v3629_v60  ;;  %4545 = vmatmul.mubr.msk.bf16.vlgmr.msra.gmra.mrb[160].mxu1 %vm800_vm3, %v3629_v60 }
 0xc56   :  { %3768 = vmatpush1.bf16.msra.mxu0 %v6023_v32  ;;  %3809 = vmatpush1.bf16.msra.mxu1 %v6029_v58  ;;  %v6590_v32 = vld [vmem:[#allocation40_spill] sm:$0xff] }
 0xc57   :  { %4546 = vmatprep.subr.msk.bf16.mxu0 %vm804_vm2, %v5203_v51  ;;  %4548 = vmatprep.subr.msk.bf16.mxu1 %vm804_vm2, %v5207_v52  ;;  %v392_v58 = vadd.f32 %v6590_v32, %v5560_v28 }
 0xc58   :  { %3799 = vmatprep.mubr.bf16.mxu0 %v6520_v31  ;;  %3840 = vmatprep.mubr.bf16.mxu1 %v6520_v31 }
 0xc5a   :  { %3770 = vmatpush1.bf16.msra.mxu0 %v5215_v54  ;;  %3811 = vmatpush1.bf16.msra.mxu1 %v5228_v56 }
 0xc5b   :  { %3857 = vmatprep.subr.bf16.mxu0 %v6105_v39  ;;  %3898 = vmatprep.subr.bf16.mxu1 %v6111_v48 }
 0xd20   :  { %v3577_v10 = vpop.f32.mrb[156].mxu0  ;;  %v3618_v34 = vpop.f32.mrb[156].mxu1 }
 0xd21   :  { %v3625_v26 = vadd.f32 %v3577_v10, %v281_v45  ;;  %v3627_v27 = vadd.f32 %v3618_v34, %v392_v58  ;;  %v3579_v37 = vpop.f32.mrb[157].mxu0  ;;  %v3620_v63 = vpop.f32.mrb[157].mxu1 }
 0xd22   :  { %v3626_v21 = vadd.f32 %v3579_v37, %v283_v43  ;;  %v3628_v12 = vadd.f32 %v3620_v63, %v394_v11  ;;  %v3581_v8 = vpop.f32.mrb[158].mxu0  ;;  %v3622_v16 = vpop.f32.mrb[158].mxu1 }
 0xd23   :  { %v3719_v50 = vmul.f32 0.5, %v3625_v26  ;;  %v3582_v33 = vpop.f32.mrb[159].mxu0  ;;  %v3623_v1 = vpop.f32.mrb[159].mxu1 }
 0xd24   :  { %v3723_v57 = vmul.f32 0.5, %v3626_v21  ;;  %v3728_v32 = vmul.f32 0.5, %v3628_v12 }
 0xd25   :  { %4888 = vtanh.f32 %v3719_v50 }
 0xd26   :  { %4890 = vtanh.f32 %v3723_v57 }
 0xd27   :  { %4892 = vtanh.f32 %v3627_v27 }
 0xd28   :  { %v3667_v5 = vpop.f32.mrb[160].mxu0  ;;  %v3708_v19 = vpop.f32.mrb[160].mxu1 }
 0xd29   :  { %v3715_v18 = vadd.f32 %v3667_v5, %v453_v24  ;;  %v3717_v59 = vadd.f32 %v3708_v19, %v564_v47  ;;  %v3669_v44 = vpop.f32.mrb[161].mxu0  ;;  %v3710_v17 = vpop.f32.mrb[161].mxu1 }
 0xd2a   :  { %v3716_v46 = vadd.f32 %v3669_v44, %v455_v40  ;;  %v3718_v49 = vadd.f32 %v3710_v17, %v566_v23  ;;  %v3671_v22 = vpop.f32.mrb[162].mxu0  ;;  %v3712_v9 = vpop.f32.mrb[162].mxu1  ;;  %v4965_v44 = vld [vmem:[%s6424_s3 + $0xc] ss:$16 sps:$4 sm:$0xff]   ;;  %v4966_v17 = vld [vmem:[%s6424_s3] ss:$16 sps:$4 sm:$0xff]  }
 0xd2b   :  { %v3737_v60 = vmul.f32 0.5, %v3715_v18  ;;  %v3672_v35 = vpop.f32.mrb[163].mxu0  ;;  %v3713_v45 = vpop.f32.mrb[163].mxu1 }
 0xd2c   :  { %v3741_v58 = vmul.f32 0.5, %v3716_v46  ;;  %v3746_v37 = vmul.f32 0.5, %v3718_v49  ;;  %v4967_v46 = vld [vmem:[%s6424_s3 + $0x8] ss:$16 sps:$4 sm:$0xff]   ;;  %v6597_v49 = vld [vmem:[#allocation41_spill] sm:$0xff] }
 0xd2d   :  { %4894 = vtanh.f32 %v3737_v60  ;;  %v285_v22 = vadd.f32 %v6597_v49, %v5556_v42  ;;  %v6600_v35 = vld [vmem:[#allocation45_spill] sm:$0xff] }
 0xd2e   :  { %4896 = vtanh.f32 %v3741_v58  ;;  %v398_v45 = vadd.f32 %v6600_v35, %v5562_v38 }
 0xd2f   :  { %v4889_v61 = vpop.eup %4888  ;;  %4898 = vtanh.f32 %v3728_v32 }
 0xd30   :  { %v4891_v43 = vpop.eup %4890  ;;  %v3721_v36 = vmul.f32 0.5, %v4889_v61  ;;  %4900 = vtanh.f32 %v3717_v59 }
 0xd31   :  { %v3725_v11 = vmul.f32 0.5, %v4891_v43  ;;  %v4893_v34 = vpop.eup %4892  ;;  %4902 = vtanh.f32 %v3746_v37  ;;  %v6601_v37 = vld [vmem:[#allocation49_spill] sm:$0xff] }
 0xd32   :  { %v3722_v10 = vadd.f32 0.5, %v3721_v36 }
 0xd33   :  { %v3726_v26 = vadd.f32 0.5, %v3725_v11 }
 0xd34   :  { %v3733_v27 = vmul.f32 %v4893_v34, %v3722_v10 }
 0xd35   :  { %v3732_v63 = vmul.f32 %v3726_v26, %v6235_v20 }
 0xd37   :  { %v4895_v21 = vpop.eup %4894  ;;  %v6287_v8 = vadd.f32 %v3733_v27, %v3732_v63  ;;  %v447_v63 = vadd.f32 %v6601_v37, %v5572_v7 }
 0xd38   :  { %v4897_v12 = vpop.eup %4896  ;;  %v3739_v16 = vmul.f32 0.5, %v4895_v21  ;;  %v6602_v21 = vld [vmem:[#allocation52_spill] sm:$0xff] }
 0xd39   :  { %4904 = vtanh.f32 %v6287_v8  ;;  %v3743_v50 = vmul.f32 0.5, %v4897_v12  ;;  %v4899_v33 = vpop.eup %4898  ;;  %v558_v12 = vadd.f32 %v6602_v21, %v5578_v25  ;;  %v4968_v21 = vld [vmem:[%s6425_s4] ss:$16 sps:$4 sm:$0xff]  }
 0xd3a   :  { %v3740_v1 = vadd.f32 0.5, %v3739_v16  ;;  %v4901_v57 = vpop.eup %4900  ;;  %v3730_v47 = vmul.f32 0.5, %v4899_v33  ;;  %v6603_v16 = vld [vmem:[#allocation51_spill] sm:$0xff]  ;;  %v6604_v33 = vld [vmem:[#allocation53_spill] sm:$0xff] }
 0xd3b   :  { %v3744_v55 = vadd.f32 0.5, %v3743_v50  ;;  %v4903_v20 = vpop.eup %4902  ;;  %v449_v50 = vadd.f32 %v6603_v16, %v5574_v29 }
 0xd3c   :  { %v3751_v24 = vmul.f32 %v4901_v57, %v3740_v1  ;;  %v3731_v40 = vadd.f32 0.5, %v3730_v47  ;;  %v3748_v19 = vmul.f32 0.5, %v4903_v20  ;;  %v560_v1 = vadd.f32 %v6604_v33, %v5581_v6 }
 0xd3d   :  { %v3750_v13 = vmul.f32 %v3744_v55, %v6239_v4 }
 0xd3e   :  { %v3749_v4 = vadd.f32 0.5, %v3748_v19 }
 0xd3f   :  { %v6291_v53 = vadd.f32 %v3751_v24, %v3750_v13 }
 0xd41   :  { %4906 = vtanh.f32 %v6291_v53 }
 0xd43   :  { %v4905_v41 = vpop.eup %4904 }
 0xd44   :  { %v3736_v23 = vmul.f32 %v4905_v41, %v3731_v40 }
 0xd46   :  { %v3763_v5 = vpack.c.bf16 %v3736_v23, %v3736_v23 }
 0xd48   :  { %4547 = vmatmul.mubr.msk.bf16.vlgmr.msra.gmra.mrb[164].mxu0 %vm800_vm3, %v3763_v5  ;;  %4549 = vmatmul.mubr.msk.bf16.vlgmr.msra.gmra.mrb[164].mxu1 %vm800_vm3, %v3763_v5 }
 0xd49   :  { %3858 = vmatpush1.bf16.msra.mxu0 %v6071_v14  ;;  %3899 = vmatpush1.bf16.msra.mxu1 %v6077_v15  ;;  %v4964_v15 = vld [vmem:[%s6424_s3 + $0x4] ss:$16 sps:$4 sm:$0xff]  }
 0xd4a   :  { %4550 = vmatprep.subr.msk.bf16.mxu0 %vm804_vm2, %v5291_v62  ;;  %4552 = vmatprep.subr.msk.bf16.mxu1 %vm804_vm2, %v5293_v0 }
 0xd4b   :  { %v4907_v18 = vpop.eup %4906  ;;  %3889 = vmatprep.mubr.bf16.mxu0 %v6520_v31  ;;  %3930 = vmatprep.mubr.bf16.mxu1 %v6520_v31 }
 0xd4c   :  { %v3754_v59 = vmul.f32 %v4907_v18, %v3749_v4 }
 0xd4d   :  { %3860 = vmatpush1.bf16.msra.mxu0 %v5302_v2  ;;  %3901 = vmatpush1.bf16.msra.mxu1 %v5307_v3 }
 0xd4e   :  { %v3853_v14 = vpack.c.bf16 %v3754_v59, %v3754_v59  ;;  %3991 = vmatprep.subr.bf16.mxu0 %v4964_v15  ;;  %4032 = vmatprep.subr.bf16.mxu1 %v4965_v44 }
 0xd50   :  { %4551 = vmatmul.mubr.msk.bf16.vlgmr.msra.gmra.mrb[168].mxu0 %vm800_vm3, %v3853_v14  ;;  %4553 = vmatmul.mubr.msk.bf16.vlgmr.msra.gmra.mrb[168].mxu1 %vm800_vm3, %v3853_v14 }
 0xd51   :  { %3992 = vmatpush1.bf16.msra.mxu0 %v4966_v17  ;;  %4033 = vmatpush1.bf16.msra.mxu1 %v4967_v46 }
 0xd52   :  { %4554 = vmatprep.subr.msk.bf16.mxu0 %vm804_vm2, %v5203_v51  ;;  %4556 = vmatprep.subr.msk.bf16.mxu1 %vm804_vm2, %v5207_v52  ;;  %v6598_v51 = vld [vmem:[#allocation44_spill] sm:$0xff]  ;;  %v6599_v52 = vld [vmem:[#allocation43_spill] sm:$0xff] }
 0xd53   :  { %4023 = vmatprep.mubr.bf16.mxu0 %v6520_v31  ;;  %4064 = vmatprep.mubr.bf16.mxu1 %v6520_v31  ;;  %v396_v9 = vadd.f32 %v6598_v51, %v5560_v28  ;;  %v287_v60 = vadd.f32 %v6599_v52, %v5558_v30 }
 0xd55   :  { %3994 = vmatpush1.bf16.msra.mxu0 %v5215_v54  ;;  %4035 = vmatpush1.bf16.msra.mxu1 %v5228_v56 }
 0xd56   :  { %4081 = vmatprep.subr.bf16.mxu0 %v6105_v39  ;;  %4122 = vmatprep.subr.bf16.mxu1 %v6111_v48 }
 0xe1b   :  { %v3801_v32 = vpop.f32.mrb[164].mxu0  ;;  %v3842_v54 = vpop.f32.mrb[164].mxu1 }
 0xe1c   :  { %v3849_v58 = vadd.f32 %v3801_v32, %v285_v22  ;;  %v3851_v56 = vadd.f32 %v3842_v54, %v396_v9  ;;  %v3803_v61 = vpop.f32.mrb[165].mxu0  ;;  %v3844_v39 = vpop.f32.mrb[165].mxu1 }
 0xe1d   :  { %v3850_v43 = vadd.f32 %v3803_v61, %v287_v60  ;;  %v3852_v48 = vadd.f32 %v3844_v39, %v398_v45  ;;  %v3805_v36 = vpop.f32.mrb[166].mxu0  ;;  %v3846_v11 = vpop.f32.mrb[166].mxu1 }
 0xe1e   :  { %v3943_v10 = vmul.f32 0.5, %v3849_v58  ;;  %v3806_v34 = vpop.f32.mrb[167].mxu0  ;;  %v3847_v26 = vpop.f32.mrb[167].mxu1 }
 0xe1f   :  { %v3947_v27 = vmul.f32 0.5, %v3850_v43  ;;  %v3952_v59 = vmul.f32 0.5, %v3852_v48 }
 0xe20   :  { %4908 = vtanh.f32 %v3943_v10 }
 0xe21   :  { %4910 = vtanh.f32 %v3947_v27 }
 0xe22   :  { %4912 = vtanh.f32 %v3851_v56 }
 0xe23   :  { %v3891_v57 = vpop.f32.mrb[168].mxu0  ;;  %v3932_v55 = vpop.f32.mrb[168].mxu1 }
 0xe24   :  { %v3939_v24 = vadd.f32 %v3891_v57, %v447_v63  ;;  %v3941_v13 = vadd.f32 %v3932_v55, %v558_v12  ;;  %v3893_v47 = vpop.f32.mrb[169].mxu0  ;;  %v3934_v20 = vpop.f32.mrb[169].mxu1  ;;  %v4206_v57 = vld [vmem:[%s6427_s6] sm:$0xff]  ;;  %v4207_v55 = vld [vmem:[%s6427_s6 + $0x8] sm:$0xff] }
 0xe25   :  { %v3940_v40 = vadd.f32 %v3893_v47, %v449_v50  ;;  %v3942_v41 = vadd.f32 %v3934_v20, %v560_v1  ;;  %v3895_v23 = vpop.f32.mrb[170].mxu0  ;;  %v3936_v5 = vpop.f32.mrb[170].mxu1 }
 0xe26   :  { %v3961_v19 = vmul.f32 0.5, %v3939_v24  ;;  %v3896_v4 = vpop.f32.mrb[171].mxu0  ;;  %v3937_v18 = vpop.f32.mrb[171].mxu1  ;;  %v4594_v24 = vpack.c.bf16 %v4207_v55, %v4206_v57 }
 0xe27   :  { %v3965_v14 = vmul.f32 0.5, %v3940_v40  ;;  %v3970_v52 = vmul.f32 0.5, %v3942_v41 }
 0xe28   :  { %4914 = vtanh.f32 %v3961_v19 }
 0xe29   :  { %4916 = vtanh.f32 %v3965_v14 }
 0xe2a   :  { %v4909_v15 = vpop.eup %4908  ;;  %4918 = vtanh.f32 %v3952_v59 }
 0xe2b   :  { %v4911_v44 = vpop.eup %4910  ;;  %v3945_v17 = vmul.f32 0.5, %v4909_v15  ;;  %4920 = vtanh.f32 %v3941_v13  ;;  %v4208_v13 = vld [vmem:[%s6427_s6 + $0x10] sm:$0xf] }
 0xe2c   :  { %v3949_v46 = vmul.f32 0.5, %v4911_v44  ;;  %v4913_v22 = vpop.eup %4912  ;;  %4922 = vtanh.f32 %v3970_v52 }
 0xe2d   :  { %v3946_v49 = vadd.f32 0.5, %v3945_v17  ;;  %v6605_v17 = vld [vmem:[#allocation46_spill] sm:$0xff] }
 0xe2e   :  { %v3950_v51 = vadd.f32 0.5, %v3949_v46  ;;  %v443_v46 = vadd.f32 %v6605_v17, %v5572_v7 }
 0xe2f   :  { %v3957_v9 = vmul.f32 %v4913_v22, %v3946_v49  ;;  %v6606_v49 = vld [vmem:[#allocation48_spill] sm:$0xff]  ;;  %v6607_v22 = vld [vmem:[#allocation47_spill] sm:$0xff] }
 0xe30   :  { %v3956_v60 = vmul.f32 %v3950_v51, %v6287_v8  ;;  %v445_v51 = vadd.f32 %v6607_v22, %v5574_v29 }
 0xe32   :  { %v4915_v35 = vpop.eup %4914  ;;  %v6347_v45 = vadd.f32 %v3957_v9, %v3956_v60 }
 0xe33   :  { %v4917_v32 = vpop.eup %4916  ;;  %v3963_v54 = vmul.f32 0.5, %v4915_v35 }
 0xe34   :  { %4924 = vtanh.f32 %v6347_v45  ;;  %v3967_v58 = vmul.f32 0.5, %v4917_v32  ;;  %v4919_v56 = vpop.eup %4918 }
 0xe35   :  { %v3964_v61 = vadd.f32 0.5, %v3963_v54  ;;  %v4921_v39 = vpop.eup %4920  ;;  %v3954_v11 = vmul.f32 0.5, %v4919_v56 }
 0xe36   :  { %v3968_v43 = vadd.f32 0.5, %v3967_v58  ;;  %v4923_v8 = vpop.eup %4922 }
 0xe37   :  { %v3975_v48 = vmul.f32 %v4921_v39, %v3964_v61  ;;  %v3955_v34 = vadd.f32 0.5, %v3954_v11  ;;  %v3972_v63 = vmul.f32 0.5, %v4923_v8 }
 0xe38   :  { %v3974_v36 = vmul.f32 %v3968_v43, %v6291_v53  ;;  %v4969_v53 = vld [vmem:[%s6425_s4 + $0x8] ss:$16 sps:$4 sm:$0xff]  }
 0xe39   :  { %v3973_v12 = vadd.f32 0.5, %v3972_v63 }
 0xe3a   :  { %v6351_v10 = vadd.f32 %v3975_v48, %v3974_v36 }
 0xe3c   :  { %4926 = vtanh.f32 %v6351_v10 }
 0xe3e   :  { %v4925_v26 = vpop.eup %4924 }
 0xe3f   :  { %v3960_v27 = vmul.f32 %v4925_v26, %v3955_v34 }
 0xe41   :  { %v3987_v37 = vpack.c.bf16 %v3960_v27, %v3960_v27 }
 0xe43   :  { %4555 = vmatmul.mubr.msk.bf16.vlgmr.msra.gmra.mrb[28].mxu0 %vm800_vm3, %v3987_v37  ;;  %4557 = vmatmul.mubr.msk.bf16.vlgmr.msra.gmra.mrb[28].mxu1 %vm800_vm3, %v3987_v37 }
 0xe44   :  { %4082 = vmatpush1.bf16.msra.mxu0 %v4968_v21  ;;  %4123 = vmatpush1.bf16.msra.mxu1 %v4969_v53 }
 0xe45   :  { %4558 = vmatprep.subr.msk.bf16.mxu0 %vm804_vm2, %v5291_v62  ;;  %4560 = vmatprep.subr.msk.bf16.mxu1 %vm804_vm2, %v5293_v0  ;;  %v4203_v62 = vld [vmem:[%s6426_s5] sm:$0xff]  ;;  %v4204_v0 = vld [vmem:[%s6426_s5 + $0x8] sm:$0xff] }
 0xe46   :  { %v4927_v16 = vpop.eup %4926  ;;  %4113 = vmatprep.mubr.bf16.mxu0 %v6520_v31  ;;  %4154 = vmatprep.mubr.bf16.mxu1 %v6520_v31  ;;  %v4597_v1 = vpack.c.bf16 %v4204_v0, %v4203_v62  ;;  %v4995_v31 = vmov 0.0|0.0  }
 0xe47   :  { %v3978_v50 = vmul.f32 %v4927_v16, %v3973_v12 }
 0xe48   :  { %4084 = vmatpush1.bf16.msra.mxu0 %v5302_v2  ;;  %4125 = vmatpush1.bf16.msra.mxu1 %v5307_v3  ;;  %v4996_v2 = vmov 0.0   ;;  %v4205_v3 = vld [vmem:[%s6426_s5 + $0x10] sm:$0xf] }
 0xe49   :  { %v4077_v33 = vpack.c.bf16 %v3978_v50, %v3978_v50  ;;  %4596 = vmatprep.subr.bf16.mxu1 %v4995_v31  ;;  %4593 = vmatprep.subr.bf16.mxu0 %v4995_v31 }
 0xe4b   :  { %4559 = vmatmul.mubr.msk.bf16.vlgmr.msra.gmra.mrb[172].mxu0 %vm800_vm3, %v4077_v33  ;;  %4561 = vmatmul.mubr.msk.bf16.vlgmr.msra.gmra.mrb[172].mxu1 %vm800_vm3, %v4077_v33 }
 0xe4c   :  { %4598 = vmatpush3.bf16.msra.mxu1 %v4597_v1  ;;  %4590 = vmatprep.mubr.msk.f32.mxu1 %vm4997_vm5, %v4996_v2 }
 0xe4d   :  { %4588 = vmatprep.subr.mxu1 %v4996_v2  ;;  %4581 = vmatprep.mubr.msk.f32.mxu0 %vm4997_vm5, %v4996_v2 }
 0xe4e   :  { %4595 = vmatpush3.bf16.msra.mxu0 %v4594_v24 }
 0xe4f   :  { %4579 = vmatprep.subr.mxu0 %v4996_v2 }
 0xe50   :  { %4589 = vmatpush3.msk.msra.mxu1 %vm4212_vm4, %v4205_v3 }
 0xe52   :  { %4580 = vmatpush3.msk.msra.mxu0 %vm4212_vm4, %v4208_v13 }
 0xf16   :  { %v4025_v47 = vpop.f32.mrb[28].mxu0  ;;  %v4066_v20 = vpop.f32.mrb[28].mxu1 }
 0xf17   :  { %v4599_v40 = vadd.f32 %v4025_v47, %v5556_v42  ;;  %v4027_v41 = vpop.f32.mrb[29].mxu0  ;;  %v4068_v23 = vpop.f32.mrb[29].mxu1  ;;  %v4601_v44 = vadd.f32 %v4066_v20, %v5560_v28  ;;  %v554_v42 = vadd.f32 %v6606_v49, %v5578_v25 }
 0xf18   :  { %v4600_v5 = vadd.f32 %v4027_v41, %v5558_v30  ;;  %v4029_v19 = vpop.f32.mrb[30].mxu0  ;;  %v4070_v4 = vpop.f32.mrb[30].mxu1  ;;  %v6608_v30 = vld [vmem:[#allocation50_spill] sm:$0xff]  ;;  %v4602_v52 = vadd.f32 %v4068_v23, %v5562_v38 }
 0xf19   :  { %v4167_v18 = vmul.f32 0.5, %v4599_v40  ;;  %v4030_v59 = vpop.f32.mrb[31].mxu0  ;;  %v4071_v14 = vpop.f32.mrb[31].mxu1  ;;  %v556_v9 = vadd.f32 %v6608_v30, %v5581_v6 }
 0xf1a   :  { %v4171_v15 = vmul.f32 0.5, %v4600_v5  ;;  %v4176_v29 = vmul.f32 0.5, %v4602_v52 }
 0xf1b   :  { %4928 = vtanh.f32 %v4167_v18 }
 0xf1c   :  { %4930 = vtanh.f32 %v4171_v15 }
 0xf1d   :  { %4932 = vtanh.f32 %v4601_v44 }
 0xf1e   :  { %v4115_v60 = vpop.f32.mrb[172].mxu0  ;;  %v4156_v35 = vpop.f32.mrb[172].mxu1 }
 0xf1f   :  { %v4163_v32 = vadd.f32 %v4115_v60, %v443_v46  ;;  %v4165_v28 = vadd.f32 %v4156_v35, %v554_v42  ;;  %v4117_v54 = vpop.f32.mrb[173].mxu0  ;;  %v4158_v58 = vpop.f32.mrb[173].mxu1 }
 0xf20   :  { %v4164_v56 = vadd.f32 %v4117_v54, %v445_v51  ;;  %v4166_v7 = vadd.f32 %v4158_v58, %v556_v9  ;;  %v4119_v61 = vpop.f32.mrb[174].mxu0  ;;  %v4160_v39 = vpop.f32.mrb[174].mxu1 }
 0xf21   :  { %v4185_v25 = vmul.f32 0.5, %v4163_v32  ;;  %v4120_v43 = vpop.f32.mrb[175].mxu0  ;;  %v4161_v48 = vpop.f32.mrb[175].mxu1 }
 0xf22   :  { %v4189_v36 = vmul.f32 0.5, %v4164_v56  ;;  %v4194_v63 = vmul.f32 0.5, %v4166_v7 }
 0xf23   :  { %4934 = vtanh.f32 %v4185_v25 }
 0xf24   :  { %4936 = vtanh.f32 %v4189_v36 }
 0xf25   :  { %v4929_v6 = vpop.eup %4928  ;;  %4938 = vtanh.f32 %v4176_v29 }
 0xf26   :  { %v4931_v38 = vpop.eup %4930  ;;  %v4169_v11 = vmul.f32 0.5, %v4929_v6  ;;  %4940 = vtanh.f32 %v4165_v28 }
 0xf27   :  { %v4173_v8 = vmul.f32 0.5, %v4931_v38  ;;  %v4933_v26 = vpop.eup %4932  ;;  %4942 = vtanh.f32 %v4194_v63 }
 0xf28   :  { %v4170_v34 = vadd.f32 0.5, %v4169_v11 }
 0xf29   :  { %v4174_v27 = vadd.f32 0.5, %v4173_v8 }
 0xf2a   :  { %v4181_v37 = vmul.f32 %v4933_v26, %v4170_v34 }
 0xf2b   :  { %v4180_v21 = vmul.f32 %v4174_v27, %v6347_v45 }
 0xf2d   :  { %v4935_v53 = vpop.eup %4934  ;;  %v4182_v12 = vadd.f32 %v4181_v37, %v4180_v21 }
 0xf2e   :  { %v4937_v16 = vpop.eup %4936  ;;  %v4187_v50 = vmul.f32 0.5, %v4935_v53 }
 0xf2f   :  { %4944 = vtanh.f32 %v4182_v12  ;;  %v4191_v33 = vmul.f32 0.5, %v4937_v16  ;;  %v4939_v62 = vpop.eup %4938 }
 0xf30   :  { %v4188_v0 = vadd.f32 0.5, %v4187_v50  ;;  %v4941_v1 = vpop.eup %4940  ;;  %v4178_v57 = vmul.f32 0.5, %v4939_v62 }
 0xf31   :  { %v4192_v31 = vadd.f32 0.5, %v4191_v33  ;;  %v4943_v24 = vpop.eup %4942 }
 0xf32   :  { %v4199_v2 = vmul.f32 %v4941_v1, %v4188_v0  ;;  %v4179_v13 = vadd.f32 0.5, %v4178_v57  ;;  %v4196_v20 = vmul.f32 0.5, %v4943_v24 }
 0xf33   :  { %v4198_v3 = vmul.f32 %v4192_v31, %v6351_v10  ;;  %v4566_v10 = vld [vmem:[%s6428_s7] ss:$0 sm:$0xff] }
 0xf34   :  { %v4197_v40 = vadd.f32 0.5, %v4196_v20 }
 0xf35   :  { %v4200_v55 = vadd.f32 %v4199_v2, %v4198_v3 }
 0xf37   :  { %4946 = vtanh.f32 %v4200_v55 }
 0xf39   :  { %v4945_v45 = vpop.eup %4944 }
 0xf3a   :  { %v4184_v47 = vmul.f32 %v4945_v45, %v4179_v13 }
 0xf3c   :  { %4591 = vmatmul.mubr.msk.f32.vlgmr.msra.gmra.mrb[176].mxu1 %vm800_vm3, %v4184_v47 }
 0xf41   :  { %v4947_v41 = vpop.eup %4946 }
 0xf42   :  { %v4202_v23 = vmul.f32 %v4947_v41, %v4197_v40 }
 0xf44   :  { %4582 = vmatmul.mubr.msk.f32.vlgmr.msra.gmra.mrb[176].mxu0 %vm800_vm3, %v4202_v23 }
0x100f   :  { %v4358_v5 = vpop.f32.mrb[176].mxu1 }
0x1010   :  { %v4592_v19 = vpop.f32.mrb[177].mxu1 }
0x1017   :  { %v4282_v4 = vpop.f32.mrb[176].mxu0 }
0x1018   :  { %v4359_v18 = vadd.f32 %v4358_v5, %v4282_v4  ;;  %v4583_v59 = vpop.f32.mrb[177].mxu0 }
0x101a   :  { %v4369_v14 = vadd.f32 %v4566_v10, %v4359_v18 }
0x101c   :  { %4371 = vst.msk [vmem:[#allocation3] sm:$0x7] %vm4370_vm6, %v4369_v14 }
0x101d   :  { %4981 = shalt.err (!%p4978_p4)
}
0x101e   :  { %s4982_s14 = scalar_lea.hbm %s6429_s8, 64 }
0x101f   :  { %p4983_p5 = scmp.ne.s32.totalorder %s6429_s8, %s4982_s14  ;;  %p4986_p6 = scmp.lt.u32.totalorder %s4982_s14, %s6429_s8 }
0x1021   :  { %p4988_p7 = pnand %p4986_p6, %p4983_p5 }
0x1023   :  { %4991 = shalt.err (!%p4988_p7)
}
0x1024   :  { %4381 = dma.vmem_to_hbm [thread:$0]  %s4379_s11, 64, %s6429_s8, [#allocation4]  }
0x1025   :  { %4992 = dma.done.wait [#allocation4], 64  }
0x1026   :  { %4993 = vsyncadd [#allocation4], 4294967232 }
0x1027   :  { %4385 = vsyncpa [#allocation4], 1 }

</bundles_post_ra>
